<compile_context>
chip_gen: v7x
topology: tpu7x:2x2x1
jax: 0.10.0
libtpu: 0.0.40
codegen_flags: <defaults>
</compile_context>

<pallas_src>
import jax
import jax.numpy as jnp
from jax.experimental import pallas as pl
from jax.experimental.pallas import tpu as pltpu

_MIB = 1024 * 1024


# ----------------------------- fused kernel ----------------------------------

def fused_head_kernel(x_ref, w1_ref, b1_ref, w2_ref, b2_ref,
                      w3_ref, b3_ref, w4_ref, b4_ref, o_ref, acc_ref):
    """One batch tile (TM) x one K tile (TS sequence positions) per grid step.

    LayerNorm (biased var, eps=1e-5) is applied tile-locally, the tile is
    flattened, and its layer-1 contribution is accumulated in acc_ref.
    Layers 2-4 (+ biases / ReLUs) run on the last K step only.  The LayerNorm
    affine is pre-folded into w1/b1 by prepare_params().
    """
    k = pl.program_id(1)

    @pl.when(k == 0)
    def _():
        acc_ref[...] = jnp.zeros_like(acc_ref)

    TM, TS, D = x_ref.shape
    x = x_ref[...].astype(jnp.float32)
    mean = jnp.mean(x, axis=-1, keepdims=True)
    var = jnp.mean(jnp.square(x - mean), axis=-1, keepdims=True)
    xn = (x - mean) * jax.lax.rsqrt(var + 1e-5)

    # Flatten (in-VMEM relayout; hidden under the layer-1 MXU matmul).
    h = xn.reshape(TM, TS * D)
    acc_ref[...] += jnp.dot(h, w1_ref[...], preferred_element_type=jnp.float32)

    @pl.when(k == pl.num_programs(1) - 1)
    def _():
        h1 = jnp.maximum(acc_ref[...] + b1_ref[...], 0.0)
        h2 = jnp.maximum(
            jnp.dot(h1, w2_ref[...], preferred_element_type=jnp.float32) + b2_ref[...], 0.0)
        h3 = jnp.maximum(
            jnp.dot(h2, w3_ref[...], preferred_element_type=jnp.float32) + b3_ref[...], 0.0)
        out = jnp.dot(h3, w4_ref[...], preferred_element_type=jnp.float32) + b4_ref[...]
        o_ref[...] = out.astype(o_ref.dtype)


# ----------------------------- sizing helpers ---------------------------------

def _round_up(n, m):
    return ((n + m - 1) // m) * m


def _vmem_capacity_bytes():
    """Physical VMEM per TensorCore; conservative 64 MiB (v7x) fallback."""
    try:
        info = pltpu.get_tpu_info()
        cap = int(getattr(info, "vmem_capacity_bytes", 0))
        if cap > 0:
            return cap
    except Exception:
        pass
    return 64 * _MIB


def _vmem_budget_bytes():
    # ~96 MiB usable on v5e/v6e (128 MiB VMEM), ~48 MiB on v7x (64 MiB VMEM).
    return min(int(0.75 * _vmem_capacity_bytes()), 110 * _MIB)


def _estimate_vmem_bytes(tm, ts, d, nc_pad, streaming):
    """Rough per-core working-set estimate (f32, lane/sublane padded)."""
    lane_d = _round_up(d, 128)
    sub_ts = _round_up(ts, 8)
    x_blocks = 2 * tm * sub_ts * lane_d * 4                  # double-buffered input
    w1_tile = (2 if streaming else 1) * ts * d * 512 * 4     # streamed or resident
    resident = (512 * 256 + 256 * 128 + 128 * nc_pad
                + 512 + 256 + 128 + nc_pad) * 4              # w2..w4 + biases
    acc = tm * 512 * 4
    out_blocks = 2 * tm * nc_pad * 4
    ln_tmp = 3 * tm * sub_ts * lane_d * 4 + tm * ts * d * 4  # xn / centered / flattened h
    return x_blocks + w1_tile + resident + acc + out_blocks + ln_tmp


# ----------------------------- parameter prep ---------------------------------

def prepare_params(params, *, d_model, seq_len):
    """One-time parameter preparation (hoisted out of the per-call path)."""
    D, S = d_model, seq_len
    n_classes = params["w4"].shape[1]
    nc_pad = _round_up(n_classes, 128)
    budget = _vmem_budget_bytes()

    # K tiling: keep w1 fully resident when it is small relative to the VMEM
    # budget, otherwise stream it in (TS*D, 512) tiles (TS whole sequence
    # positions so LayerNorm stays per-tile).
    w1_bytes = S * D * 512 * 4
    if w1_bytes <= budget // 4:
        ts = S
    else:
        ts = max(8, ((budget // 8) // (512 * 4 * D)) // 8 * 8)
        ts = min(ts, S)
    s_pad = _round_up(S, ts)

    # Fold LayerNorm affine into layer 1 (flattened layout: index s*D + d).
    gamma_flat = jnp.tile(params["gamma"].reshape(-1).astype(jnp.float32), S)  # (S*D,)
    beta_flat = jnp.tile(params["beta"].reshape(-1).astype(jnp.float32), S)    # (S*D,)
    w1 = params["w1"].astype(jnp.float32)
    w1p = w1 * gamma_flat[:, None]
    b1p = (beta_flat[None, :] @ w1 + params["b1"].reshape(1, -1)).astype(jnp.float32)
    if s_pad != S:
        w1p = jnp.pad(w1p, ((0, (s_pad - S) * D), (0, 0)))  # zero rows: no contribution

    # Lane-dense final layer: zero-pad to a multiple of 128 output columns.
    w4p = jnp.zeros((128, nc_pad), jnp.float32).at[:, :n_classes].set(
        params["w4"].astype(jnp.float32))
    b4p = jnp.zeros((1, nc_pad), jnp.float32).at[:, :n_classes].set(
        params["b4"].reshape(1, -1).astype(jnp.float32))

    return dict(
        w1=w1p, b1=b1p,
        w2=params["w2"].astype(jnp.float32),
        b2=params["b2"].reshape(1, -1).astype(jnp.float32),
        w3=params["w3"].astype(jnp.float32),
        b3=params["b3"].reshape(1, -1).astype(jnp.float32),
        w4=w4p, b4=b4p,
        meta=dict(d_model=D, seq_len=S, seq_pad=s_pad, ts=ts,
                  n_classes=n_classes, nc_pad=nc_pad, vmem_budget=budget),
    )


# ----------------------------- wrapper ----------------------------------------

def classification_head(x, prep, *, tm_max=256):
    """x: (B, S, D) float32 activations.  prep: output of prepare_params()."""
    meta = prep["meta"]
    B, S, D = x.shape
    assert S == meta["seq_len"] and D == meta["d_model"], (x.shape, meta)
    ts, s_pad, nc_pad = meta["ts"], meta["seq_pad"], meta["nc_pad"]
    budget = meta["vmem_budget"]
    nk = s_pad // ts
    streaming = nk > 1

    # Batch tile: largest of {<=tm_max, <=padded batch} whose working-set
    # estimate (incl. lane-padded LN temporaries) fits the VMEM budget.
    tm_max = max(8, (tm_max // 8) * 8)
    b_cap = _round_up(B, 8)
    tm = 8
    for cand in (512, 256, 128, 64, 32, 16, 8):
        c = min(cand, b_cap, tm_max)
        if _estimate_vmem_bytes(c, ts, D, nc_pad, streaming) <= int(0.8 * budget):
            tm = c
            break
    b_pad = _round_up(B, tm)

    x_pad = x
    if b_pad != B or s_pad != S:
        # Zero rows LayerNorm to exactly zero -> zero layer-1 contribution.
        x_pad = jnp.pad(x, ((0, b_pad - B), (0, s_pad - S), (0, 0)))

    def call(single_buffer_resident):
        def const_spec(shape):
            if single_buffer_resident:
                return pl.BlockSpec(shape, lambda i, k: (0, 0),
                                    pipeline_mode=pl.Buffered(1))
            return pl.BlockSpec(shape, lambda i, k: (0, 0))

        if streaming:
            w1_spec = pl.BlockSpec((ts * D, 512), lambda i, k: (k, 0))  # double-buffered stream
        else:
            w1_spec = const_spec((ts * D, 512))                         # resident

        grid_spec = pltpu.PrefetchScalarGridSpec(
            num_scalar_prefetch=0,
            grid=(b_pad // tm, nk),
            in_specs=[
                pl.BlockSpec((tm, ts, D), lambda i, k: (i, k, 0)),  # activations (pipelined)
                w1_spec,                                            # w1 (resident or K-streamed)
                const_spec((1, 512)),                               # b1 (affine-folded)
                const_spec((512, 256)),                             # w2
                const_spec((1, 256)),                               # b2
                const_spec((256, 128)),                             # w3
                const_spec((1, 128)),                               # b3
                const_spec((128, nc_pad)),                          # w4 (lane-padded)
                const_spec((1, nc_pad)),                            # b4 (lane-padded)
            ],
            out_specs=pl.BlockSpec((tm, nc_pad), lambda i, k: (i, 0)),
            scratch_shapes=[pltpu.VMEM((tm, 512), jnp.float32)],    # layer-1 accumulator
        )
        return pl.pallas_call(
            fused_head_kernel,
            out_shape=jax.ShapeDtypeStruct((b_pad, nc_pad), jnp.float32),
            grid_spec=grid_spec,
            compiler_params=pltpu.CompilerParams(
                # TODO(synk): verify "parallel" shards the batch axis across
                # v7x's two TensorCores; switch to CORE_PARALLEL if it does not.
                dimension_semantics=("parallel", "arbitrary"),
                vmem_limit_bytes=budget,
            ),
        )(x_pad, prep["w1"], prep["b1"], prep["w2"], prep["b2"],
          prep["w3"], prep["b3"], prep["w4"], prep["b4"])

    try:
        out = call(True)     # single-buffer the constant (resident) weights
    except Exception:
        out = call(False)    # JAX without pipeline_mode/Buffered support

    return out[:B, :meta["n_classes"]]


# -------------------------- parameter init ------------------------------------

def init_params(key, d_model, seq_len, n_classes=1):
    """Mimics PyTorch defaults (LayerNorm ones/zeros, Linear U(+-1/sqrt(fan_in)))."""
    dims = [d_model * seq_len, 512, 256, 128, n_classes]
    params = {
        "gamma": jnp.ones((1, d_model), jnp.float32),
        "beta": jnp.zeros((1, d_model), jnp.float32),
    }
    keys = jax.random.split(key, 8)
    for i in range(4):
        fan_in, fan_out = dims[i], dims[i + 1]
        bound = 1.0 / (fan_in ** 0.5)
        params[f"w{i+1}"] = jax.random.uniform(
            keys[2 * i], (fan_in, fan_out), jnp.float32, -bound, bound)
        params[f"b{i+1}"] = jax.random.uniform(
            keys[2 * i + 1], (1, fan_out), jnp.float32, -bound, bound)
    return params


# --------------------------- reference (pure JAX) ------------------------------

def reference(x, p):
    mean = jnp.mean(x, axis=-1, keepdims=True)
    var = jnp.mean(jnp.square(x - mean), axis=-1, keepdims=True)
    xn = (x - mean) * jax.lax.rsqrt(var + 1e-5) * p["gamma"][0] + p["beta"][0]
    h = xn.reshape(x.shape[0], -1)
    h = jnp.maximum(h @ p["w1"] + p["b1"], 0.0)
    h = jnp.maximum(h @ p["w2"] + p["b2"], 0.0)
    h = jnp.maximum(h @ p["w3"] + p["b3"], 0.0)
    return h @ p["w4"] + p["b4"]


if __name__ == "__main__":
    B, S, D, NC = 2, 8, 32, 1  # batch, seq_len, d_model, n_classes

    key = jax.random.PRNGKey(0)
    kx, kp = jax.random.split(key)
    x = jax.random.normal(kx, (B, S, D), jnp.float32)
    params = init_params(kp, d_model=D, seq_len=S, n_classes=NC)

    prep = prepare_params(params, d_model=D, seq_len=S)   # one-time weight prep
    out = classification_head(x, prep)
    out = jax.block_until_ready(out)

    ref = reference(x, params)
    assert out.shape == (B, NC), out.shape
    assert jnp.allclose(out, ref, rtol=1e-4, atol=1e-4), (out, ref)
    print("KERNEL_OK")
</pallas_src>

<mosaic_0001>
module attributes {stable_mosaic.version = 11 : i64} {
  func.func @fused_head_kernel(%arg0: i32, %arg1: i32, %arg2: memref<8x8x32xf32, #tpu.memory_space<vmem>>, %arg3: memref<256x512xf32, #tpu.memory_space<vmem>>, %arg4: memref<1x512xf32, #tpu.memory_space<vmem>>, %arg5: memref<512x256xf32, #tpu.memory_space<vmem>>, %arg6: memref<1x256xf32, #tpu.memory_space<vmem>>, %arg7: memref<256x128xf32, #tpu.memory_space<vmem>>, %arg8: memref<1x128xf32, #tpu.memory_space<vmem>>, %arg9: memref<128x128xf32, #tpu.memory_space<vmem>>, %arg10: memref<1x128xf32, #tpu.memory_space<vmem>>, %arg11: memref<8x128xf32, #tpu.memory_space<vmem>>, %arg12: memref<8x512xf32, #tpu.memory_space<vmem>>) attributes {dimension_semantics = [#tpu.dimension_semantics<parallel>, #tpu.dimension_semantics<arbitrary>], iteration_bounds = array<i64: 1, 1>, scalar_prefetch = 0 : i64, scratch_operands = 1 : i64, tpu.core_type = #tpu.core_type<tc>, window_params = [{transform_indices = @transform_0, window_bounds = array<i64: 8, 8, 32>}, {pipeline_mode = #tpu.pipeline_mode<synchronous>, transform_indices = @transform_1, window_bounds = array<i64: 256, 512>}, {pipeline_mode = #tpu.pipeline_mode<synchronous>, transform_indices = @transform_2, window_bounds = array<i64: 1, 512>}, {pipeline_mode = #tpu.pipeline_mode<synchronous>, transform_indices = @transform_3, window_bounds = array<i64: 512, 256>}, {pipeline_mode = #tpu.pipeline_mode<synchronous>, transform_indices = @transform_4, window_bounds = array<i64: 1, 256>}, {pipeline_mode = #tpu.pipeline_mode<synchronous>, transform_indices = @transform_5, window_bounds = array<i64: 256, 128>}, {pipeline_mode = #tpu.pipeline_mode<synchronous>, transform_indices = @transform_6, window_bounds = array<i64: 1, 128>}, {pipeline_mode = #tpu.pipeline_mode<synchronous>, transform_indices = @transform_7, window_bounds = array<i64: 128, 128>}, {pipeline_mode = #tpu.pipeline_mode<synchronous>, transform_indices = @transform_8, window_bounds = array<i64: 1, 128>}, {transform_indices = @transform_9, window_bounds = array<i64: 8, 128>}]} {
    %c0_i32 = arith.constant 0 : i32
    %0 = arith.cmpi eq, %arg1, %c0_i32 : i32
    %1 = arith.extui %0 : i1 to i32
    %c0_i32_0 = arith.constant 0 : i32
    %2 = arith.cmpi ne, %1, %c0_i32_0 : i32
    scf.if %2 {
      %cst_16 = arith.constant 0.000000e+00 : f32
      %31 = vector.broadcast %cst_16 : f32 to vector<8x512xf32>
      %c0_17 = arith.constant 0 : index
      %c0_18 = arith.constant 0 : index
      %32 = vector.load %arg12[%c0_17, %c0_18] : memref<8x512xf32, #tpu.memory_space<vmem>>, vector<8x512xf32>
      tpu.vector_store %arg12[%c0_17, %c0_18], %31 {strides = array<i32>} : memref<8x512xf32, #tpu.memory_space<vmem>>, vector<8x512xf32>,
    } else {
    }
    %c0 = arith.constant 0 : index
    %c0_1 = arith.constant 0 : index
    %c0_2 = arith.constant 0 : index
    %3 = vector.load %arg2[%c0, %c0_1, %c0_2] : memref<8x8x32xf32, #tpu.memory_space<vmem>>, vector<8x8x32xf32>
    %cst = arith.constant dense<0.000000e+00> : vector<8x8xf32>
    %4 = vector.multi_reduction <add>, %3, %cst [2] : vector<8x8x32xf32> to vector<8x8xf32>
    %5 = vector.shape_cast %4 : vector<8x8xf32> to vector<8x8x1xf32>
    %cst_3 = arith.constant 3.200000e+01 : f32
    %6 = vector.broadcast %cst_3 : f32 to vector<8x8x1xf32>
    %7 = arith.divf %5, %6 : vector<8x8x1xf32>
    %8 = vector.broadcast %7 : vector<8x8x1xf32> to vector<8x8x32xf32>
    %9 = arith.subf %3, %8 : vector<8x8x32xf32>
    %10 = arith.mulf %9, %9 : vector<8x8x32xf32>
    %cst_4 = arith.constant dense<0.000000e+00> : vector<8x8xf32>
    %11 = vector.multi_reduction <add>, %10, %cst_4 [2] : vector<8x8x32xf32> to vector<8x8xf32>
    %12 = vector.shape_cast %11 : vector<8x8xf32> to vector<8x8x1xf32>
    %cst_5 = arith.constant 3.200000e+01 : f32
    %13 = vector.broadcast %cst_5 : f32 to vector<8x8x1xf32>
    %14 = arith.divf %12, %13 : vector<8x8x1xf32>
    %15 = vector.broadcast %7 : vector<8x8x1xf32> to vector<8x8x32xf32>
    %16 = arith.subf %3, %15 : vector<8x8x32xf32>
    %cst_6 = arith.constant 9.99999974E-6 : f32
    %17 = vector.broadcast %cst_6 : f32 to vector<8x8x1xf32>
    %18 = arith.addf %14, %17 : vector<8x8x1xf32>
    %19 = math.rsqrt %18 : vector<8x8x1xf32>
    %20 = vector.broadcast %19 : vector<8x8x1xf32> to vector<8x8x32xf32>
    %21 = arith.mulf %16, %20 : vector<8x8x32xf32>
    %22 = vector.shape_cast %21 : vector<8x8x32xf32> to vector<8x256xf32>
    %c0_7 = arith.constant 0 : index
    %c0_8 = arith.constant 0 : index
    %23 = vector.load %arg12[%c0_7, %c0_8] : memref<8x512xf32, #tpu.memory_space<vmem>>, vector<8x512xf32>
    %c0_9 = arith.constant 0 : index
    %c0_10 = arith.constant 0 : index
    %24 = vector.load %arg3[%c0_9, %c0_10] : memref<256x512xf32, #tpu.memory_space<vmem>>, vector<256x512xf32>
    %cst_11 = arith.constant dense<0.000000e+00> : vector<8x512xf32>
    %25 = tpu.matmul %22, %24, %cst_11 {dimension_numbers = #tpu.dot_dimension_numbers<[1], [0], [0], [1], [0, 0, 1, 1], [], []>} : vector<8x256xf32>, vector<256x512xf32>, vector<8x512xf32> -> vector<8x512xf32>
    %26 = arith.addf %23, %25 : vector<8x512xf32>
    %c0_12 = arith.constant 0 : index
    %c0_13 = arith.constant 0 : index
    %27 = vector.load %arg12[%c0_12, %c0_13] : memref<8x512xf32, #tpu.memory_space<vmem>>, vector<8x512xf32>
    tpu.vector_store %arg12[%c0_12, %c0_13], %26 {strides = array<i32>} : memref<8x512xf32, #tpu.memory_space<vmem>>, vector<8x512xf32>,
    %c0_i32_14 = arith.constant 0 : i32
    %28 = arith.cmpi eq, %arg1, %c0_i32_14 : i32
    %29 = arith.extui %28 : i1 to i32
    %c0_i32_15 = arith.constant 0 : i32
    %30 = arith.cmpi ne, %29, %c0_i32_15 : i32
    scf.if %30 {
      %c0_16 = arith.constant 0 : index
      %c0_17 = arith.constant 0 : index
      %31 = vector.load %arg12[%c0_16, %c0_17] : memref<8x512xf32, #tpu.memory_space<vmem>>, vector<8x512xf32>
      %c0_18 = arith.constant 0 : index
      %c0_19 = arith.constant 0 : index
      %32 = vector.load %arg4[%c0_18, %c0_19] : memref<1x512xf32, #tpu.memory_space<vmem>>, vector<1x512xf32>
      %33 = vector.broadcast %32 : vector<1x512xf32> to vector<8x512xf32>
      %34 = arith.addf %31, %33 : vector<8x512xf32>
      %cst_20 = arith.constant 0.000000e+00 : f32
      %35 = vector.broadcast %cst_20 : f32 to vector<8x512xf32>
      %36 = arith.maximumf %34, %35 : vector<8x512xf32>
      %c0_21 = arith.constant 0 : index
      %c0_22 = arith.constant 0 : index
      %37 = vector.load %arg5[%c0_21, %c0_22] : memref<512x256xf32, #tpu.memory_space<vmem>>, vector<512x256xf32>
      %cst_23 = arith.constant dense<0.000000e+00> : vector<8x256xf32>
      %38 = tpu.matmul %36, %37, %cst_23 {dimension_numbers = #tpu.dot_dimension_numbers<[1], [0], [0], [1], [0, 0, 1, 1], [], []>} : vector<8x512xf32>, vector<512x256xf32>, vector<8x256xf32> -> vector<8x256xf32>
      %c0_24 = arith.constant 0 : index
      %c0_25 = arith.constant 0 : index
      %39 = vector.load %arg6[%c0_24, %c0_25] : memref<1x256xf32, #tpu.memory_space<vmem>>, vector<1x256xf32>
      %40 = vector.broadcast %39 : vector<1x256xf32> to vector<8x256xf32>
      %41 = arith.addf %38, %40 : vector<8x256xf32>
      %cst_26 = arith.constant 0.000000e+00 : f32
      %42 = vector.broadcast %cst_26 : f32 to vector<8x256xf32>
      %43 = arith.maximumf %41, %42 : vector<8x256xf32>
      %c0_27 = arith.constant 0 : index
      %c0_28 = arith.constant 0 : index
      %44 = vector.load %arg7[%c0_27, %c0_28] : memref<256x128xf32, #tpu.memory_space<vmem>>, vector<256x128xf32>
      %cst_29 = arith.constant dense<0.000000e+00> : vector<8x128xf32>
      %45 = tpu.matmul %43, %44, %cst_29 {dimension_numbers = #tpu.dot_dimension_numbers<[1], [0], [0], [1], [0, 0, 1, 1], [], []>} : vector<8x256xf32>, vector<256x128xf32>, vector<8x128xf32> -> vector<8x128xf32>
      %c0_30 = arith.constant 0 : index
      %c0_31 = arith.constant 0 : index
      %46 = vector.load %arg8[%c0_30, %c0_31] : memref<1x128xf32, #tpu.memory_space<vmem>>, vector<1x128xf32>
      %47 = vector.broadcast %46 : vector<1x128xf32> to vector<8x128xf32>
      %48 = arith.addf %45, %47 : vector<8x128xf32>
      %cst_32 = arith.constant 0.000000e+00 : f32
      %49 = vector.broadcast %cst_32 : f32 to vector<8x128xf32>
      %50 = arith.maximumf %48, %49 : vector<8x128xf32>
      %c0_33 = arith.constant 0 : index
      %c0_34 = arith.constant 0 : index
      %51 = vector.load %arg9[%c0_33, %c0_34] : memref<128x128xf32, #tpu.memory_space<vmem>>, vector<128x128xf32>
      %cst_35 = arith.constant dense<0.000000e+00> : vector<8x128xf32>
      %52 = tpu.matmul %50, %51, %cst_35 {dimension_numbers = #tpu.dot_dimension_numbers<[1], [0], [0], [1], [0, 0, 1, 1], [], []>} : vector<8x128xf32>, vector<128x128xf32>, vector<8x128xf32> -> vector<8x128xf32>
      %c0_36 = arith.constant 0 : index
      %c0_37 = arith.constant 0 : index
      %53 = vector.load %arg10[%c0_36, %c0_37] : memref<1x128xf32, #tpu.memory_space<vmem>>, vector<1x128xf32>
      %54 = vector.broadcast %53 : vector<1x128xf32> to vector<8x128xf32>
      %55 = arith.addf %52, %54 : vector<8x128xf32>
      %c0_38 = arith.constant 0 : index
      %c0_39 = arith.constant 0 : index
      %56 = vector.load %arg11[%c0_38, %c0_39] : memref<8x128xf32, #tpu.memory_space<vmem>>, vector<8x128xf32>
      tpu.vector_store %arg11[%c0_38, %c0_39], %55 {strides = array<i32>} : memref<8x128xf32, #tpu.memory_space<vmem>>, vector<8x128xf32>,
    } else {
    }
    return
  }
  func.func @transform_0(%arg0: i32, %arg1: i32) -> (i32, i32, i32) {
    %c0_i32 = arith.constant 0 : i32
    %c0_i32_0 = arith.constant 0 : i32
    return %arg0, %arg1, %c0_i32 : i32, i32, i32
  }
  func.func @transform_1(%arg0: i32, %arg1: i32) -> (i32, i32) {
    %c0_i32 = arith.constant 0 : i32
    %c0_i32_0 = arith.constant 0 : i32
    %c0_i32_1 = arith.constant 0 : i32
    return %c0_i32, %c0_i32_0 : i32, i32
  }
  func.func @transform_2(%arg0: i32, %arg1: i32) -> (i32, i32) {
    %c0_i32 = arith.constant 0 : i32
    %c0_i32_0 = arith.constant 0 : i32
    %c0_i32_1 = arith.constant 0 : i32
    return %c0_i32, %c0_i32_0 : i32, i32
  }
  func.func @transform_3(%arg0: i32, %arg1: i32) -> (i32, i32) {
    %c0_i32 = arith.constant 0 : i32
    %c0_i32_0 = arith.constant 0 : i32
    %c0_i32_1 = arith.constant 0 : i32
    return %c0_i32, %c0_i32_0 : i32, i32
  }
  func.func @transform_4(%arg0: i32, %arg1: i32) -> (i32, i32) {
    %c0_i32 = arith.constant 0 : i32
    %c0_i32_0 = arith.constant 0 : i32
    %c0_i32_1 = arith.constant 0 : i32
    return %c0_i32, %c0_i32_0 : i32, i32
  }
  func.func @transform_5(%arg0: i32, %arg1: i32) -> (i32, i32) {
    %c0_i32 = arith.constant 0 : i32
    %c0_i32_0 = arith.constant 0 : i32
    %c0_i32_1 = arith.constant 0 : i32
    return %c0_i32, %c0_i32_0 : i32, i32
  }
  func.func @transform_6(%arg0: i32, %arg1: i32) -> (i32, i32) {
    %c0_i32 = arith.constant 0 : i32
    %c0_i32_0 = arith.constant 0 : i32
    %c0_i32_1 = arith.constant 0 : i32
    return %c0_i32, %c0_i32_0 : i32, i32
  }
  func.func @transform_7(%arg0: i32, %arg1: i32) -> (i32, i32) {
    %c0_i32 = arith.constant 0 : i32
    %c0_i32_0 = arith.constant 0 : i32
    %c0_i32_1 = arith.constant 0 : i32
    return %c0_i32, %c0_i32_0 : i32, i32
  }
  func.func @transform_8(%arg0: i32, %arg1: i32) -> (i32, i32) {
    %c0_i32 = arith.constant 0 : i32
    %c0_i32_0 = arith.constant 0 : i32
    %c0_i32_1 = arith.constant 0 : i32
    return %c0_i32, %c0_i32_0 : i32, i32
  }
  func.func @transform_9(%arg0: i32, %arg1: i32) -> (i32, i32) {
    %c0_i32 = arith.constant 0 : i32
    %c0_i32_0 = arith.constant 0 : i32
    return %arg0, %c0_i32 : i32, i32
  }
}

module attributes {stable_mosaic.version = 11 : i64} {
  func.func @fused_head_kernel(%arg0: i32, %arg1: i32, %arg2: memref<8x8x32xf32, #tpu.memory_space<vmem>>, %arg3: memref<256x512xf32, #tpu.memory_space<vmem>>, %arg4: memref<1x512xf32, #tpu.memory_space<vmem>>, %arg5: memref<512x256xf32, #tpu.memory_space<vmem>>, %arg6: memref<1x256xf32, #tpu.memory_space<vmem>>, %arg7: memref<256x128xf32, #tpu.memory_space<vmem>>, %arg8: memref<1x128xf32, #tpu.memory_space<vmem>>, %arg9: memref<128x128xf32, #tpu.memory_space<vmem>>, %arg10: memref<1x128xf32, #tpu.memory_space<vmem>>, %arg11: memref<8x128xf32, #tpu.memory_space<vmem>>, %arg12: memref<8x512xf32, #tpu.memory_space<vmem>>) attributes {dimension_semantics = [#tpu.dimension_semantics<parallel>, #tpu.dimension_semantics<arbitrary>], iteration_bounds = array<i64: 1, 1>, scalar_prefetch = 0 : i64, scratch_operands = 1 : i64, tpu.core_type = #tpu.core_type<tc>, window_params = [{transform_indices = @transform_0, window_bounds = array<i64: 8, 8, 32>}, {pipeline_mode = #tpu.pipeline_mode<synchronous>, transform_indices = @transform_1, window_bounds = array<i64: 256, 512>}, {pipeline_mode = #tpu.pipeline_mode<synchronous>, transform_indices = @transform_2, window_bounds = array<i64: 1, 512>}, {pipeline_mode = #tpu.pipeline_mode<synchronous>, transform_indices = @transform_3, window_bounds = array<i64: 512, 256>}, {pipeline_mode = #tpu.pipeline_mode<synchronous>, transform_indices = @transform_4, window_bounds = array<i64: 1, 256>}, {pipeline_mode = #tpu.pipeline_mode<synchronous>, transform_indices = @transform_5, window_bounds = array<i64: 256, 128>}, {pipeline_mode = #tpu.pipeline_mode<synchronous>, transform_indices = @transform_6, window_bounds = array<i64: 1, 128>}, {pipeline_mode = #tpu.pipeline_mode<synchronous>, transform_indices = @transform_7, window_bounds = array<i64: 128, 128>}, {pipeline_mode = #tpu.pipeline_mode<synchronous>, transform_indices = @transform_8, window_bounds = array<i64: 1, 128>}, {transform_indices = @transform_9, window_bounds = array<i64: 8, 128>}]} {
    %c0_i32 = arith.constant 0 : i32
    %0 = arith.cmpi eq, %arg1, %c0_i32 : i32
    %1 = arith.extui %0 : i1 to i32
    %c0_i32_0 = arith.constant 0 : i32
    %2 = arith.cmpi ne, %1, %c0_i32_0 : i32
    scf.if %2 {
      %cst_16 = arith.constant 0.000000e+00 : f32
      %31 = vector.broadcast %cst_16 : f32 to vector<8x512xf32>
      %c0_17 = arith.constant 0 : index
      %c0_18 = arith.constant 0 : index
      %32 = vector.load %arg12[%c0_17, %c0_18] : memref<8x512xf32, #tpu.memory_space<vmem>>, vector<8x512xf32>
      tpu.vector_store %arg12[%c0_17, %c0_18], %31 {strides = array<i32>} : memref<8x512xf32, #tpu.memory_space<vmem>>, vector<8x512xf32>,
    } else {
    }
    %c0 = arith.constant 0 : index
    %c0_1 = arith.constant 0 : index
    %c0_2 = arith.constant 0 : index
    %3 = vector.load %arg2[%c0, %c0_1, %c0_2] : memref<8x8x32xf32, #tpu.memory_space<vmem>>, vector<8x8x32xf32>
    %cst = arith.constant dense<0.000000e+00> : vector<8x8xf32>
    %4 = vector.multi_reduction <add>, %3, %cst [2] : vector<8x8x32xf32> to vector<8x8xf32>
    %5 = vector.shape_cast %4 : vector<8x8xf32> to vector<8x8x1xf32>
    %cst_3 = arith.constant 3.200000e+01 : f32
    %6 = vector.broadcast %cst_3 : f32 to vector<8x8x1xf32>
    %7 = arith.divf %5, %6 : vector<8x8x1xf32>
    %8 = vector.broadcast %7 : vector<8x8x1xf32> to vector<8x8x32xf32>
    %9 = arith.subf %3, %8 : vector<8x8x32xf32>
    %10 = arith.mulf %9, %9 : vector<8x8x32xf32>
    %cst_4 = arith.constant dense<0.000000e+00> : vector<8x8xf32>
    %11 = vector.multi_reduction <add>, %10, %cst_4 [2] : vector<8x8x32xf32> to vector<8x8xf32>
    %12 = vector.shape_cast %11 : vector<8x8xf32> to vector<8x8x1xf32>
    %cst_5 = arith.constant 3.200000e+01 : f32
    %13 = vector.broadcast %cst_5 : f32 to vector<8x8x1xf32>
    %14 = arith.divf %12, %13 : vector<8x8x1xf32>
    %15 = vector.broadcast %7 : vector<8x8x1xf32> to vector<8x8x32xf32>
    %16 = arith.subf %3, %15 : vector<8x8x32xf32>
    %cst_6 = arith.constant 9.99999974E-6 : f32
    %17 = vector.broadcast %cst_6 : f32 to vector<8x8x1xf32>
    %18 = arith.addf %14, %17 : vector<8x8x1xf32>
    %19 = math.rsqrt %18 : vector<8x8x1xf32>
    %20 = vector.broadcast %19 : vector<8x8x1xf32> to vector<8x8x32xf32>
    %21 = arith.mulf %16, %20 : vector<8x8x32xf32>
    %22 = vector.shape_cast %21 : vector<8x8x32xf32> to vector<8x256xf32>
    %c0_7 = arith.constant 0 : index
    %c0_8 = arith.constant 0 : index
    %23 = vector.load %arg12[%c0_7, %c0_8] : memref<8x512xf32, #tpu.memory_space<vmem>>, vector<8x512xf32>
    %c0_9 = arith.constant 0 : index
    %c0_10 = arith.constant 0 : index
    %24 = vector.load %arg3[%c0_9, %c0_10] : memref<256x512xf32, #tpu.memory_space<vmem>>, vector<256x512xf32>
    %cst_11 = arith.constant dense<0.000000e+00> : vector<8x512xf32>
    %25 = tpu.matmul %22, %24, %cst_11 {dimension_numbers = #tpu.dot_dimension_numbers<[1], [0], [0], [1], [0, 0, 1, 1], [], []>} : vector<8x256xf32>, vector<256x512xf32>, vector<8x512xf32> -> vector<8x512xf32>
    %26 = arith.addf %23, %25 : vector<8x512xf32>
    %c0_12 = arith.constant 0 : index
    %c0_13 = arith.constant 0 : index
    %27 = vector.load %arg12[%c0_12, %c0_13] : memref<8x512xf32, #tpu.memory_space<vmem>>, vector<8x512xf32>
    tpu.vector_store %arg12[%c0_12, %c0_13], %26 {strides = array<i32>} : memref<8x512xf32, #tpu.memory_space<vmem>>, vector<8x512xf32>,
    %c0_i32_14 = arith.constant 0 : i32
    %28 = arith.cmpi eq, %arg1, %c0_i32_14 : i32
    %29 = arith.extui %28 : i1 to i32
    %c0_i32_15 = arith.constant 0 : i32
    %30 = arith.cmpi ne, %29, %c0_i32_15 : i32
    scf.if %30 {
      %c0_16 = arith.constant 0 : index
      %c0_17 = arith.constant 0 : index
      %31 = vector.load %arg12[%c0_16, %c0_17] : memref<8x512xf32, #tpu.memory_space<vmem>>, vector<8x512xf32>
      %c0_18 = arith.constant 0 : index
      %c0_19 = arith.constant 0 : index
      %32 = vector.load %arg4[%c0_18, %c0_19] : memref<1x512xf32, #tpu.memory_space<vmem>>, vector<1x512xf32>
      %33 = vector.broadcast %32 : vector<1x512xf32> to vector<8x512xf32>
      %34 = arith.addf %31, %33 : vector<8x512xf32>
      %cst_20 = arith.constant 0.000000e+00 : f32
      %35 = vector.broadcast %cst_20 : f32 to vector<8x512xf32>
      %36 = arith.maximumf %34, %35 : vector<8x512xf32>
      %c0_21 = arith.constant 0 : index
      %c0_22 = arith.constant 0 : index
      %37 = vector.load %arg5[%c0_21, %c0_22] : memref<512x256xf32, #tpu.memory_space<vmem>>, vector<512x256xf32>
      %cst_23 = arith.constant dense<0.000000e+00> : vector<8x256xf32>
      %38 = tpu.matmul %36, %37, %cst_23 {dimension_numbers = #tpu.dot_dimension_numbers<[1], [0], [0], [1], [0, 0, 1, 1], [], []>} : vector<8x512xf32>, vector<512x256xf32>, vector<8x256xf32> -> vector<8x256xf32>
      %c0_24 = arith.constant 0 : index
      %c0_25 = arith.constant 0 : index
      %39 = vector.load %arg6[%c0_24, %c0_25] : memref<1x256xf32, #tpu.memory_space<vmem>>, vector<1x256xf32>
      %40 = vector.broadcast %39 : vector<1x256xf32> to vector<8x256xf32>
      %41 = arith.addf %38, %40 : vector<8x256xf32>
      %cst_26 = arith.constant 0.000000e+00 : f32
      %42 = vector.broadcast %cst_26 : f32 to vector<8x256xf32>
      %43 = arith.maximumf %41, %42 : vector<8x256xf32>
      %c0_27 = arith.constant 0 : index
      %c0_28 = arith.constant 0 : index
      %44 = vector.load %arg7[%c0_27, %c0_28] : memref<256x128xf32, #tpu.memory_space<vmem>>, vector<256x128xf32>
      %cst_29 = arith.constant dense<0.000000e+00> : vector<8x128xf32>
      %45 = tpu.matmul %43, %44, %cst_29 {dimension_numbers = #tpu.dot_dimension_numbers<[1], [0], [0], [1], [0, 0, 1, 1], [], []>} : vector<8x256xf32>, vector<256x128xf32>, vector<8x128xf32> -> vector<8x128xf32>
      %c0_30 = arith.constant 0 : index
      %c0_31 = arith.constant 0 : index
      %46 = vector.load %arg8[%c0_30, %c0_31] : memref<1x128xf32, #tpu.memory_space<vmem>>, vector<1x128xf32>
      %47 = vector.broadcast %46 : vector<1x128xf32> to vector<8x128xf32>
      %48 = arith.addf %45, %47 : vector<8x128xf32>
      %cst_32 = arith.constant 0.000000e+00 : f32
      %49 = vector.broadcast %cst_32 : f32 to vector<8x128xf32>
      %50 = arith.maximumf %48, %49 : vector<8x128xf32>
      %c0_33 = arith.constant 0 : index
      %c0_34 = arith.constant 0 : index
      %51 = vector.load %arg9[%c0_33, %c0_34] : memref<128x128xf32, #tpu.memory_space<vmem>>, vector<128x128xf32>
      %cst_35 = arith.constant dense<0.000000e+00> : vector<8x128xf32>
      %52 = tpu.matmul %50, %51, %cst_35 {dimension_numbers = #tpu.dot_dimension_numbers<[1], [0], [0], [1], [0, 0, 1, 1], [], []>} : vector<8x128xf32>, vector<128x128xf32>, vector<8x128xf32> -> vector<8x128xf32>
      %c0_36 = arith.constant 0 : index
      %c0_37 = arith.constant 0 : index
      %53 = vector.load %arg10[%c0_36, %c0_37] : memref<1x128xf32, #tpu.memory_space<vmem>>, vector<1x128xf32>
      %54 = vector.broadcast %53 : vector<1x128xf32> to vector<8x128xf32>
      %55 = arith.addf %52, %54 : vector<8x128xf32>
      %c0_38 = arith.constant 0 : index
      %c0_39 = arith.constant 0 : index
      %56 = vector.load %arg11[%c0_38, %c0_39] : memref<8x128xf32, #tpu.memory_space<vmem>>, vector<8x128xf32>
      tpu.vector_store %arg11[%c0_38, %c0_39], %55 {strides = array<i32>} : memref<8x128xf32, #tpu.memory_space<vmem>>, vector<8x128xf32>,
    } else {
    }
    return
  }
  func.func @transform_0(%arg0: i32, %arg1: i32) -> (i32, i32, i32) {
    %c0_i32 = arith.constant 0 : i32
    %c0_i32_0 = arith.constant 0 : i32
    return %arg0, %arg1, %c0_i32 : i32, i32, i32
  }
  func.func @transform_1(%arg0: i32, %arg1: i32) -> (i32, i32) {
    %c0_i32 = arith.constant 0 : i32
    %c0_i32_0 = arith.constant 0 : i32
    %c0_i32_1 = arith.constant 0 : i32
    return %c0_i32, %c0_i32_0 : i32, i32
  }
  func.func @transform_2(%arg0: i32, %arg1: i32) -> (i32, i32) {
    %c0_i32 = arith.constant 0 : i32
    %c0_i32_0 = arith.constant 0 : i32
    %c0_i32_1 = arith.constant 0 : i32
    return %c0_i32, %c0_i32_0 : i32, i32
  }
  func.func @transform_3(%arg0: i32, %arg1: i32) -> (i32, i32) {
    %c0_i32 = arith.constant 0 : i32
    %c0_i32_0 = arith.constant 0 : i32
    %c0_i32_1 = arith.constant 0 : i32
    return %c0_i32, %c0_i32_0 : i32, i32
  }
  func.func @transform_4(%arg0: i32, %arg1: i32) -> (i32, i32) {
    %c0_i32 = arith.constant 0 : i32
    %c0_i32_0 = arith.constant 0 : i32
    %c0_i32_1 = arith.constant 0 : i32
    return %c0_i32, %c0_i32_0 : i32, i32
  }
  func.func @transform_5(%arg0: i32, %arg1: i32) -> (i32, i32) {
    %c0_i32 = arith.constant 0 : i32
    %c0_i32_0 = arith.constant 0 : i32
    %c0_i32_1 = arith.constant 0 : i32
    return %c0_i32, %c0_i32_0 : i32, i32
  }
  func.func @transform_6(%arg0: i32, %arg1: i32) -> (i32, i32) {
    %c0_i32 = arith.constant 0 : i32
    %c0_i32_0 = arith.constant 0 : i32
    %c0_i32_1 = arith.constant 0 : i32
    return %c0_i32, %c0_i32_0 : i32, i32
  }
  func.func @transform_7(%arg0: i32, %arg1: i32) -> (i32, i32) {
    %c0_i32 = arith.constant 0 : i32
    %c0_i32_0 = arith.constant 0 : i32
    %c0_i32_1 = arith.constant 0 : i32
    return %c0_i32, %c0_i32_0 : i32, i32
  }
  func.func @transform_8(%arg0: i32, %arg1: i32) -> (i32, i32) {
    %c0_i32 = arith.constant 0 : i32
    %c0_i32_0 = arith.constant 0 : i32
    %c0_i32_1 = arith.constant 0 : i32
    return %c0_i32, %c0_i32_0 : i32, i32
  }
  func.func @transform_9(%arg0: i32, %arg1: i32) -> (i32, i32) {
    %c0_i32 = arith.constant 0 : i32
    %c0_i32_0 = arith.constant 0 : i32
    return %arg0, %c0_i32 : i32, i32
  }
}

</mosaic_0001>

<bundles_post_ra>
// kernel: tpu_custom_call.1
= control target key start
LH: loop header
LB: loop body
LE: loop exit
PB: predicated region body
PF: predicated region fallthrough
CT: control target
= control target key end

     0   :  { %14 = vsyncpa [#allocation4], 0  ;;  %s2051_s0 = inlined_call_operand.hbm [shape: f32[8,8,32], index: 0, kind: input, shape index: {}]   ;;  %s2052_s1 = inlined_call_operand.hbm [shape: f32[256,512], index: 1, kind: input, shape index: {}]   ;;  %s2053_s2 = inlined_call_operand.vmem [shape: f32[1,512], index: 2, kind: input, shape index: {}]   ;;  %s2054_s3 = inlined_call_operand.hbm [shape: f32[512,256], index: 3, kind: input, shape index: {}]   ;;  %s2055_s4 = inlined_call_operand.vmem [shape: f32[1,256], index: 4, kind: input, shape index: {}]   ;;  %s2056_s5 = inlined_call_operand.hbm [shape: f32[256,128], index: 5, kind: input, shape index: {}]   ;;  %s2057_s6 = inlined_call_operand.vmem [shape: f32[1,128], index: 6, kind: input, shape index: {}]   ;;  %s2058_s7 = inlined_call_operand.hbm [shape: f32[128,128], index: 7, kind: input, shape index: {}]   ;;  %s2059_s8 = inlined_call_operand.vmem [shape: f32[1,128], index: 8, kind: input, shape index: {}]   ;;  %s2060_s9 = inlined_call_operand.hbm [shape: f32[8,128], index: 9, kind: output, shape index: {}]  }
   0x1   :  { %15 = vsyncpa [#allocation7], 0 }
   0x2   :  { %16 = vsyncpa [#allocation10], 0 }
   0x3   :  { %17 = vsyncpa [#allocation5], 0  ;;  %s1810_s30 = smov [#allocation6]   ;;  %s1670_s13 = scalar_lea.hbm %s2052_s1, 16384 }
   0x4   :  { %s35_s10 = sshll.u32 %s1810_s30, 4  ;;  %p1671_p0 = scmp.ne.s32.totalorder %s2052_s1, %s1670_s13  ;;  %s36_s10 = int_to_ptr.vmem [resolvable:$true] %s35_s10 }
   0x5   :  { %p1674_p1 = scmp.lt.u32.totalorder %s1670_s13, %s2052_s1 }
   0x7   :  { %p1676_p2 = pnand %p1674_p1, %p1671_p0 }
   0x9   :  { %1679 = shalt.err (!%p1676_p2)
}
   0xa   :  { %s1680_s18 = scalar_lea.vmem %s36_s10, 16384  ;;  %p1685_p4 = scmp.lt.s32.totalorder %s36_s10, %s36_s10 }
   0xb   :  { %p1681_p3 = scmp.ne.s32.totalorder %s36_s10, %s1680_s18  ;;  %p1686_p5 = scmp.lt.s32.totalorder %s1680_s18, %s1680_s18 }
   0xd   :  { %p1687_p6 = por %p1686_p5, %p1685_p4 }
   0xf   :  { %p1688_p7 = pnand %p1687_p6, %p1681_p3 }
  0x11   :  { %1691 = shalt.err (!%p1688_p7)
}
  0x12   :  { %s1811_s19 = smov 512   ;;  %s1812_s20 = smov 32  }
  0x13   :  { %41 = dma.hbm_to_vmem [thread:$0]  %s2052_s1, 16384, %s36_s10, [#allocation7], %s1811_s19, %s1811_s19, %s1812_s20  }
  0x14   :  { %s1813_s23 = smov [#allocation9]   ;;  %s1814_s25 = smov [#allocation3]  }
  0x15   :  { %s63_s24 = sshll.u32 %s1813_s23, 4  ;;  %s23_s26 = sshll.u32 %s1814_s25, 4  ;;  %s64_s24 = int_to_ptr.vmem [resolvable:$true] %s63_s24  ;;  %s24_s26 = int_to_ptr.vmem [resolvable:$true] %s23_s26 }
  0x16   :  { %s1692_s29 = scalar_lea.hbm %s2056_s5, 4096 }
  0x17   :  { %p1693_p8 = scmp.ne.s32.totalorder %s2056_s5, %s1692_s29  ;;  %p1696_p9 = scmp.lt.u32.totalorder %s1692_s29, %s2056_s5 }
  0x19   :  { %p1698_p10 = pnand %p1696_p9, %p1693_p8 }
  0x1b   :  { %1701 = shalt.err (!%p1698_p10)
}
  0x1c   :  { %s1702_s1 = scalar_lea.vmem %s64_s24, 4096  ;;  %p1707_p12 = scmp.lt.s32.totalorder %s64_s24, %s64_s24 }
  0x1d   :  { %p1703_p11 = scmp.ne.s32.totalorder %s64_s24, %s1702_s1  ;;  %p1708_p13 = scmp.lt.s32.totalorder %s1702_s1, %s1702_s1 }
  0x1f   :  { %p1709_p0 = por %p1708_p13, %p1707_p12 }
  0x21   :  { %p1710_p1 = pnand %p1709_p0, %p1703_p11 }
  0x23   :  { %1713 = shalt.err (!%p1710_p1)
}
  0x24   :  { %s1815_s10 = smov 128   ;;  %s1816_s14 = smov 8  }
  0x25   :  { %69 = dma.hbm_to_vmem [thread:$0]  %s2056_s5, 4096, %s64_s24, [#allocation10], %s1815_s10, %s1815_s10, %s1816_s14  }
  0x26   :  { %s1714_s19 = scalar_lea.hbm %s2051_s0, 1024 }
  0x27   :  { %p1715_p2 = scmp.ne.s32.totalorder %s2051_s0, %s1714_s19  ;;  %p1718_p3 = scmp.lt.u32.totalorder %s1714_s19, %s2051_s0 }
  0x29   :  { %p1720_p4 = pnand %p1718_p3, %p1715_p2 }
  0x2b   :  { %1723 = shalt.err (!%p1720_p4)
}
  0x2c   :  { %s1724_s27 = scalar_lea.vmem %s24_s26, 1024  ;;  %p1729_p6 = scmp.lt.s32.totalorder %s24_s26, %s24_s26 }
  0x2d   :  { %p1725_p5 = scmp.ne.s32.totalorder %s24_s26, %s1724_s27  ;;  %p1730_p7 = scmp.lt.s32.totalorder %s1724_s27, %s1724_s27 }
  0x2f   :  { %p1731_p8 = por %p1730_p7, %p1729_p6 }
  0x31   :  { %p1732_p9 = pnand %p1731_p8, %p1725_p5 }
  0x33   :  { %1735 = shalt.err (!%p1732_p9)
}
  0x34   :  { %29 = dma.hbm_to_vmem [thread:$0]  %s2051_s0, 1024, %s24_s26, [#allocation4], %s1815_s10, %s1815_s10, %s1816_s14  }
  0x35   :  { %s1817_s28 = smov [#allocation8]   ;;  %s1736_s12 = scalar_lea.hbm %s2054_s3, 16384 }
  0x36   :  { %s49_s29 = sshll.u32 %s1817_s28, 4  ;;  %p1737_p10 = scmp.ne.s32.totalorder %s2054_s3, %s1736_s12  ;;  %s50_s29 = int_to_ptr.vmem [resolvable:$true] %s49_s29 }
  0x37   :  { %p1740_p11 = scmp.lt.u32.totalorder %s1736_s12, %s2054_s3 }
  0x39   :  { %p1742_p12 = pnand %p1740_p11, %p1737_p10 }
  0x3b   :  { %1745 = shalt.err (!%p1742_p12)
}
  0x3c   :  { %s1746_s17 = scalar_lea.vmem %s50_s29, 16384  ;;  %p1751_p0 = scmp.lt.s32.totalorder %s50_s29, %s50_s29 }
  0x3d   :  { %p1747_p13 = scmp.ne.s32.totalorder %s50_s29, %s1746_s17  ;;  %p1752_p1 = scmp.lt.s32.totalorder %s1746_s17, %s1746_s17 }
  0x3f   :  { %p1753_p2 = por %p1752_p1, %p1751_p0 }
  0x41   :  { %p1754_p3 = pnand %p1753_p2, %p1747_p13 }
  0x43   :  { %1757 = shalt.err (!%p1754_p3)
}
  0x44   :  { %s1818_s0 = smov 256   ;;  %s1819_s26 = smov 16  }
  0x45   :  { %55 = dma.hbm_to_vmem [thread:$0]  %s2054_s3, 16384, %s50_s29, [#allocation7], %s1818_s0, %s1818_s0, %s1819_s26  }
  0x46   :  { %s1820_s21 = smov [#allocation11]   ;;  %s1758_s27 = scalar_lea.hbm %s2058_s7, 2048 }
  0x47   :  { %s77_s22 = sshll.u32 %s1820_s21, 4  ;;  %p1759_p4 = scmp.ne.s32.totalorder %s2058_s7, %s1758_s27  ;;  %s78_s22 = int_to_ptr.vmem [resolvable:$true] %s77_s22 }
  0x48   :  { %p1762_p5 = scmp.lt.u32.totalorder %s1758_s27, %s2058_s7 }
  0x4a   :  { %p1764_p6 = pnand %p1762_p5, %p1759_p4 }
  0x4c   :  { %1767 = shalt.err (!%p1764_p6)
}
  0x4d   :  { %s1768_s11 = scalar_lea.vmem %s78_s22, 2048  ;;  %p1773_p8 = scmp.lt.s32.totalorder %s78_s22, %s78_s22 }
  0x4e   :  { %p1769_p7 = scmp.ne.s32.totalorder %s78_s22, %s1768_s11  ;;  %p1774_p9 = scmp.lt.s32.totalorder %s1768_s11, %s1768_s11 }
  0x50   :  { %p1775_p10 = por %p1774_p9, %p1773_p8 }
  0x52   :  { %p1776_p11 = pnand %p1775_p10, %p1769_p7 }
  0x54   :  { %1779 = shalt.err (!%p1776_p11)
}
  0x55   :  { %83 = dma.hbm_to_vmem [thread:$0]  %s2058_s7, 2048, %s78_s22, [#allocation10], %s1815_s10, %s1815_s10, %s1816_s14  }
  0x56   :  { %1802 = dma.done.wait [#allocation4], 1024  }
  0x57   :  { %1803 = vsyncadd [#allocation4], 4294966272 }
  0x58   :  { %1804 = dma.done.wait [#allocation7], 32768  }
  0x59   :  { %1805 = vsyncadd [#allocation7], 4294934528 }
  0x5a   :  { %1806 = dma.done.wait [#allocation10], 6144  }
  0x5b   :  { %1807 = vsyncadd [#allocation10], 4294961152  ;;  %vm117_vm0 = vcmask 261120   ;;  %v109_v0 = vld [vmem:[#allocation3] sm:$0xff]  ;;  %v111_v1 = vld [vmem:[#allocation3 + $0x10] sm:$0xff]  ;;  %s1823_s7 = smov 64  }
  0x5c   :  { %v110_v2 = vld [vmem:[#allocation3 + $0x8] sm:$0xff]  ;;  %v118_v3 = vsel %vm117_vm0, %v109_v0, 0.0  ;;  %v124_v4 = vsel %vm117_vm0, %v111_v1, 0.0  ;;  %v112_v5 = vld [vmem:[#allocation3 + $0x18] sm:$0xff]  ;;  %v113_v8 = vld [vmem:[#allocation3 + $0x20] sm:$0xff]  ;;  %s1824_s10 = smov 96  }
  0x5d   :  { %119 = vadd.xlane.f32.xlu0 %v118_v3  ;;  %125 = vadd.xlane.f32.xlu1 %v124_v4  ;;  %v121_v6 = vsel %vm117_vm0, %v110_v2, 0.0  ;;  %v127_v7 = vsel %vm117_vm0, %v112_v5, 0.0  ;;  %v114_v9 = vld [vmem:[#allocation3 + $0x28] sm:$0xff]  ;;  %v130_v10 = vsel %vm117_vm0, %v113_v8, 0.0  ;;  %v115_v12 = vld [vmem:[#allocation3 + $0x30] sm:$0xff]  ;;  %v116_v13 = vld [vmem:[#allocation3 + $0x38] sm:$0xff] }
  0x5e   :  { %v133_v11 = vsel %vm117_vm0, %v114_v9, 0.0  ;;  %v136_v14 = vsel %vm117_vm0, %v115_v12, 0.0  ;;  %v139_v15 = vsel %vm117_vm0, %v116_v13, 0.0  ;;  %v396_v56 = vld [vmem:[#allocation6 + $0x8] sm:$0xff]  ;;  %v398_v58 = vld [vmem:[#allocation6 + $0x18] sm:$0xff]  ;;  %v395_v61 = vld [vmem:[#allocation6] sm:$0xff] }
  0x5f   :  { %v400_v57 = vld [vmem:[#allocation6 + $0x28] sm:$0xff]  ;;  %v402_v60 = vld [vmem:[#allocation6 + $0x38] sm:$0xff]  ;;  %v399_v62 = vld [vmem:[#allocation6 + $0x20] sm:$0xff]  ;;  %vm384_vm1 = vcmask 523264   ;;  %vm386_vm2 = vcmask 785408   ;;  %vm1826_vm3 = vmmov 0  }
  0x60   :  { %v1304_v59 = vpack.c.bf16 %v400_v57, %v396_v56  ;;  %v1368_v63 = vpack.c.bf16 %v402_v60, %v398_v58  ;;  %v404_v3 = vld [vmem:[#allocation6 + $0x48] sm:$0xff]  ;;  %v433_v57 = vld [vmem:[#allocation6 + $0x130] sm:$0xff]  ;;  %v438_v60 = vld [vmem:[#allocation6 + $0x158] sm:$0xff]  ;;  %s1828_s16 = smov [#allocation12]  }
  0x61   :  { %122 = vadd.xlane.f32.xlu0 %v121_v6  ;;  %128 = vadd.xlane.f32.xlu1 %v127_v7  ;;  %v406_v6 = vld [vmem:[#allocation6 + $0x58] sm:$0xff]  ;;  %v436_v58 = vld [vmem:[#allocation6 + $0x148] sm:$0xff]  ;;  %s1204_s17 = sshll.u32 %s1828_s16, 4  ;;  %s1205_s17 = int_to_ptr.vmem [resolvable:$true] %s1204_s17 }
  0x62   :  { %1305 = vmatprep.subr.bf16.mxu0 %v1304_v59  ;;  %v410_v7 = vld [vmem:[#allocation6 + $0x78] sm:$0xff]  ;;  %1369 = vmatprep.subr.bf16.mxu1 %v1368_v63  ;;  %v440_v59 = vld [vmem:[#allocation6 + $0x168] sm:$0xff]  ;;  %s1780_s0 = scalar_lea.vmem %s1205_s17, 128  ;;  %p1785_p13 = scmp.lt.s32.totalorder %s1205_s17, %s1205_s17 }
  0x63   :  { %p1781_p12 = scmp.ne.s32.totalorder %s1205_s17, %s1780_s0  ;;  %p1786_p0 = scmp.lt.s32.totalorder %s1780_s0, %s1780_s0 }
  0x65   :  { %131 = vadd.xlane.f32.xlu0 %v130_v10  ;;  %134 = vadd.xlane.f32.xlu1 %v133_v11  ;;  %v403_v10 = vld [vmem:[#allocation6 + $0x40] sm:$0xff]  ;;  %p1787_p1 = por %p1786_p0, %p1785_p13 }
  0x66   :  { %v407_v11 = vld [vmem:[#allocation6 + $0x60] sm:$0xff] }
  0x67   :  { %p1788_p2 = pnand %p1787_p1, %p1781_p12 }
  0x69   :  { %137 = vadd.xlane.f32.xlu0 %v136_v14  ;;  %140 = vadd.xlane.f32.xlu1 %v139_v15  ;;  %v409_v14 = vld [vmem:[#allocation6 + $0x70] sm:$0xff]  ;;  %v412_v15 = vld [vmem:[#allocation6 + $0x88] sm:$0xff] }
  0xea   :  { %v120_v16 = vpop.xlane.xlu0 %119  ;;  %v126_v17 = vpop.xlane.xlu1 %125 }
  0xeb   :  { %v143_v18 = vmul.f32 0.03125, %v120_v16  ;;  %v145_v19 = vmul.f32 0.03125, %v126_v17  ;;  %v416_v16 = vld [vmem:[#allocation6 + $0xa8] sm:$0xff] }
  0xed   :  { %v1957_v20 = vsub.f32 %v109_v0, %v143_v18  ;;  %v1959_v21 = vsub.f32 %v111_v1, %v145_v19  ;;  %v1306_v0 = vpack.c.bf16 %v399_v62, %v395_v61  ;;  %v397_v1 = vld [vmem:[#allocation6 + $0x10] sm:$0xff]  ;;  %v1312_v18 = vpack.c.bf16 %v416_v16, %v412_v15  ;;  %v414_v19 = vld [vmem:[#allocation6 + $0x98] sm:$0xff] }
  0xee   :  { %v123_v22 = vpop.xlane.xlu0 %122  ;;  %v129_v23 = vpop.xlane.xlu1 %128  ;;  %v442_v61 = vld [vmem:[#allocation6 + $0x178] sm:$0xff]  ;;  %v445_v15 = vld [vmem:[#allocation6 + $0x190] sm:$0xff] }
  0xef   :  { %v144_v24 = vmul.f32 0.03125, %v123_v22  ;;  %v146_v25 = vmul.f32 0.03125, %v129_v23  ;;  %v159_v26 = vmul.f32 %v1957_v20, %v1957_v20  ;;  %v161_v27 = vmul.f32 %v1959_v21, %v1959_v21  ;;  %1307 = vmatpush1.bf16.msra.mxu0 %v1306_v0  ;;  %v418_v22 = vld [vmem:[#allocation6 + $0xb8] sm:$0xff]  ;;  %v411_v23 = vld [vmem:[#allocation6 + $0x80] sm:$0xff] }
  0xf0   :  { %v1324_v0 = vpack.c.bf16 %v440_v59, %v436_v58  ;;  %v471_v58 = vld [vmem:[#allocation6 + $0x260] sm:$0xff]  ;;  %v469_v59 = vld [vmem:[#allocation6 + $0x250] sm:$0xff] }
  0xf1   :  { %v1965_v28 = vsub.f32 %v110_v2, %v144_v24  ;;  %v1967_v29 = vsub.f32 %v112_v5, %v146_v25  ;;  %v167_v30 = vsel %vm117_vm0, %v159_v26, 0.0  ;;  %v173_v33 = vsel %vm117_vm0, %v161_v27, 0.0  ;;  %v401_v2 = vld [vmem:[#allocation6 + $0x30] sm:$0xff]  ;;  %v408_v5 = vld [vmem:[#allocation6 + $0x68] sm:$0xff]  ;;  %v415_v25 = vld [vmem:[#allocation6 + $0xa0] sm:$0xff] }
  0xf2   :  { %168 = vadd.xlane.f32.xlu0 %v167_v30  ;;  %v132_v31 = vpop.xlane.xlu0 %131  ;;  %v135_v32 = vpop.xlane.xlu1 %134  ;;  %v1370_v4 = vpack.c.bf16 %v401_v2, %v397_v1  ;;  %v1376_v24 = vpack.c.bf16 %v418_v22, %v414_v19  ;;  %v413_v26 = vld [vmem:[#allocation6 + $0x90] sm:$0xff]  ;;  %v1314_v30 = vpack.c.bf16 %v415_v25, %v411_v23  ;;  %v435_v1 = vld [vmem:[#allocation6 + $0x140] sm:$0xff]  ;;  %v456_v19 = vld [vmem:[#allocation6 + $0x1e8] sm:$0xff] }
  0xf3   :  { %v147_v34 = vmul.f32 0.03125, %v132_v31  ;;  %v148_v35 = vmul.f32 0.03125, %v135_v32  ;;  %v160_v36 = vmul.f32 %v1965_v28, %v1965_v28  ;;  %v162_v37 = vmul.f32 %v1967_v29, %v1967_v29  ;;  %v417_v27 = vld [vmem:[#allocation6 + $0xb0] sm:$0xff]  ;;  %v420_v31 = vld [vmem:[#allocation6 + $0xc8] sm:$0xff]  ;;  %v439_v2 = vld [vmem:[#allocation6 + $0x160] sm:$0xff] }
  0xf4   :  { %1371 = vmatpush1.bf16.msra.mxu1 %v1370_v4  ;;  %v424_v32 = vld [vmem:[#allocation6 + $0xe8] sm:$0xff]  ;;  %v1388_v4 = vpack.c.bf16 %v442_v61, %v438_v60  ;;  %v454_v22 = vld [vmem:[#allocation6 + $0x1d8] sm:$0xff]  ;;  %v473_v61 = vld [vmem:[#allocation6 + $0x270] sm:$0xff] }
  0xf5   :  { %v1975_v38 = vsub.f32 %v113_v8, %v147_v34  ;;  %v1977_v39 = vsub.f32 %v114_v9, %v148_v35  ;;  %v170_v40 = vsel %vm117_vm0, %v160_v36, 0.0  ;;  %v176_v43 = vsel %vm117_vm0, %v162_v37, 0.0  ;;  %v426_v36 = vld [vmem:[#allocation6 + $0xf8] sm:$0xff]  ;;  %v419_v37 = vld [vmem:[#allocation6 + $0xc0] sm:$0xff] }
  0xf6   :  { %174 = vadd.xlane.f32.xlu0 %v173_v33  ;;  %171 = vadd.xlane.f32.xlu1 %v170_v40  ;;  %v138_v41 = vpop.xlane.xlu0 %137  ;;  %v141_v42 = vpop.xlane.xlu1 %140  ;;  %v1308_v8 = vpack.c.bf16 %v408_v5, %v404_v3  ;;  %v1372_v9 = vpack.c.bf16 %v410_v7, %v406_v6  ;;  %v422_v33 = vld [vmem:[#allocation6 + $0xd8] sm:$0xff]  ;;  %v1378_v34 = vpack.c.bf16 %v417_v27, %v413_v26  ;;  %v423_v40 = vld [vmem:[#allocation6 + $0xe0] sm:$0xff]  ;;  %v437_v3 = vld [vmem:[#allocation6 + $0x150] sm:$0xff] }
  0xf7   :  { %v149_v44 = vmul.f32 0.03125, %v138_v41  ;;  %v150_v45 = vmul.f32 0.03125, %v141_v42  ;;  %v163_v46 = vmul.f32 %v1975_v38, %v1975_v38  ;;  %v164_v47 = vmul.f32 %v1977_v39, %v1977_v39  ;;  %v421_v42 = vld [vmem:[#allocation6 + $0xd0] sm:$0xff]  ;;  %v444_v6 = vld [vmem:[#allocation6 + $0x188] sm:$0xff]  ;;  %v458_v23 = vld [vmem:[#allocation6 + $0x1f8] sm:$0xff] }
  0xf8   :  { %1309 = vmatprep.subr.bf16.mxu0 %v1308_v8  ;;  %1373 = vmatprep.subr.bf16.mxu1 %v1372_v9  ;;  %v1316_v35 = vpack.c.bf16 %v424_v32, %v420_v31  ;;  %v1380_v41 = vpack.c.bf16 %v426_v36, %v422_v33  ;;  %v441_v5 = vld [vmem:[#allocation6 + $0x170] sm:$0xff]  ;;  %v448_v7 = vld [vmem:[#allocation6 + $0x1a8] sm:$0xff]  ;;  %v446_v8 = vld [vmem:[#allocation6 + $0x198] sm:$0xff]  ;;  %v1396_v32 = vpack.c.bf16 %v458_v23, %v454_v22 }
  0xf9   :  { %v1985_v48 = vsub.f32 %v115_v12, %v149_v44  ;;  %v1987_v49 = vsub.f32 %v116_v13, %v150_v45  ;;  %v179_v50 = vsel %vm117_vm0, %v163_v46, 0.0  ;;  %v182_v51 = vsel %vm117_vm0, %v164_v47, 0.0  ;;  %v405_v12 = vld [vmem:[#allocation6 + $0x50] sm:$0xff]  ;;  %v428_v44 = vld [vmem:[#allocation6 + $0x108] sm:$0xff]  ;;  %v430_v46 = vld [vmem:[#allocation6 + $0x118] sm:$0xff] }
  0xfa   :  { %177 = vadd.xlane.f32.xlu1 %v176_v43  ;;  %180 = vadd.xlane.f32.xlu0 %v179_v50  ;;  %v1310_v13 = vpack.c.bf16 %v407_v11, %v403_v10  ;;  %v1374_v17 = vpack.c.bf16 %v409_v14, %v405_v12  ;;  %v425_v43 = vld [vmem:[#allocation6 + $0xf0] sm:$0xff]  ;;  %v432_v45 = vld [vmem:[#allocation6 + $0x128] sm:$0xff]  ;;  %v434_v47 = vld [vmem:[#allocation6 + $0x138] sm:$0xff]  ;;  %v1318_v50 = vpack.c.bf16 %v423_v40, %v419_v37 }
  0xfb   :  { %v165_v52 = vmul.f32 %v1985_v48, %v1985_v48  ;;  %v166_v53 = vmul.f32 %v1987_v49, %v1987_v49  ;;  %v1384_v56 = vpack.c.bf16 %v434_v47, %v430_v46  ;;  %v450_v9 = vld [vmem:[#allocation6 + $0x1b8] sm:$0xff]  ;;  %v1326_v10 = vpack.c.bf16 %v439_v2, %v435_v1  ;;  %v447_v14 = vld [vmem:[#allocation6 + $0x1a0] sm:$0xff]  ;;  %v453_v31 = vld [vmem:[#allocation6 + $0x1d0] sm:$0xff] }
  0xfc   :  { %1311 = vmatpush1.bf16.msra.mxu0 %v1310_v13  ;;  %1375 = vmatpush1.bf16.msra.mxu1 %v1374_v17  ;;  %v1390_v11 = vpack.c.bf16 %v441_v5, %v437_v3  ;;  %v1328_v12 = vpack.c.bf16 %v448_v7, %v444_v6  ;;  %v443_v13 = vld [vmem:[#allocation6 + $0x180] sm:$0xff]  ;;  %v1392_v16 = vpack.c.bf16 %v450_v9, %v446_v8  ;;  %v449_v17 = vld [vmem:[#allocation6 + $0x1b0] sm:$0xff]  ;;  %v462_v36 = vld [vmem:[#allocation6 + $0x218] sm:$0xff] }
  0xfd   :  { %v185_v54 = vsel %vm117_vm0, %v165_v52, 0.0  ;;  %v188_v55 = vsel %vm117_vm0, %v166_v53, 0.0  ;;  %1313 = vmatprep.subr.bf16.mxu0 %v1312_v18  ;;  %1377 = vmatprep.subr.bf16.mxu1 %v1376_v24  ;;  %v1320_v52 = vpack.c.bf16 %v432_v45, %v428_v44  ;;  %v427_v53 = vld [vmem:[#allocation6 + $0x100] sm:$0xff]  ;;  %v452_v18 = vld [vmem:[#allocation6 + $0x1c8] sm:$0xff]  ;;  %v1330_v24 = vpack.c.bf16 %v447_v14, %v443_v13  ;;  %v457_v33 = vld [vmem:[#allocation6 + $0x1f0] sm:$0xff] }
  0xfe   :  { %183 = vadd.xlane.f32.xlu1 %v182_v51  ;;  %186 = vadd.xlane.f32.xlu0 %v185_v54  ;;  %v1382_v51 = vpack.c.bf16 %v425_v43, %v421_v42  ;;  %v431_v54 = vld [vmem:[#allocation6 + $0x120] sm:$0xff]  ;;  %v1394_v25 = vpack.c.bf16 %v449_v17, %v445_v15  ;;  %v1332_v26 = vpack.c.bf16 %v456_v19, %v452_v18  ;;  %v466_v37 = vld [vmem:[#allocation6 + $0x238] sm:$0xff]  ;;  %v461_v45 = vld [vmem:[#allocation6 + $0x210] sm:$0xff] }
  0xff   :  { %v1322_v62 = vpack.c.bf16 %v431_v54, %v427_v53  ;;  %v451_v27 = vld [vmem:[#allocation6 + $0x1c0] sm:$0xff]  ;;  %v1400_v46 = vpack.c.bf16 %v466_v37, %v462_v36  ;;  %v465_v47 = vld [vmem:[#allocation6 + $0x230] sm:$0xff]  ;;  %v474_v53 = vld [vmem:[#allocation6 + $0x278] sm:$0xff]  ;;  %v1406_v3 = vpack.c.bf16 %v473_v61, %v469_v59 }
 0x100   :  { %1315 = vmatpush1.bf16.msra.mxu0 %v1314_v30  ;;  %1379 = vmatpush1.bf16.msra.mxu1 %v1378_v34  ;;  %v455_v30 = vld [vmem:[#allocation6 + $0x1e0] sm:$0xff]  ;;  %v460_v34 = vld [vmem:[#allocation6 + $0x208] sm:$0xff]  ;;  %v482_v1 = vld [vmem:[#allocation6 + $0x2b8] sm:$0xff] }
 0x101   :  { %1317 = vmatprep.subr.bf16.mxu0 %v1316_v35  ;;  %1381 = vmatprep.subr.bf16.mxu1 %v1380_v41  ;;  %v464_v35 = vld [vmem:[#allocation6 + $0x228] sm:$0xff]  ;;  %v1334_v40 = vpack.c.bf16 %v455_v30, %v451_v27  ;;  %v1398_v41 = vpack.c.bf16 %v457_v33, %v453_v31  ;;  %v459_v43 = vld [vmem:[#allocation6 + $0x200] sm:$0xff]  ;;  %v477_v7 = vld [vmem:[#allocation6 + $0x290] sm:$0xff] }
 0x102   :  { %189 = vadd.xlane.f32.xlu1 %v188_v55  ;;  %v429_v55 = vld [vmem:[#allocation6 + $0x110] sm:$0xff]  ;;  %v1336_v42 = vpack.c.bf16 %v464_v35, %v460_v34  ;;  %v463_v44 = vld [vmem:[#allocation6 + $0x220] sm:$0xff]  ;;  %v490_v13 = vld [vmem:[#allocation6 + $0x2f8] sm:$0xff] }
 0x103   :  { %v1386_v63 = vpack.c.bf16 %v433_v57, %v429_v55  ;;  %v1338_v54 = vpack.c.bf16 %v463_v44, %v459_v43  ;;  %v1402_v55 = vpack.c.bf16 %v465_v47, %v461_v45  ;;  %v467_v57 = vld [vmem:[#allocation6 + $0x240] sm:$0xff]  ;;  %v481_v9 = vld [vmem:[#allocation6 + $0x2b0] sm:$0xff]  ;;  %v498_v27 = vld [vmem:[#allocation6 + $0x338] sm:$0xff] }
 0x104   :  { %1319 = vmatpush1.bf16.msra.mxu0 %v1318_v50  ;;  %1383 = vmatpush1.bf16.msra.mxu1 %v1382_v51  ;;  %v468_v50 = vld [vmem:[#allocation6 + $0x248] sm:$0xff]  ;;  %v1342_v2 = vpack.c.bf16 %v471_v58, %v467_v57  ;;  %v475_v5 = vld [vmem:[#allocation6 + $0x280] sm:$0xff]  ;;  %v1410_v15 = vpack.c.bf16 %v481_v9, %v477_v7  ;;  %v485_v19 = vld [vmem:[#allocation6 + $0x2d0] sm:$0xff] }
 0x105   :  { %1321 = vmatprep.subr.bf16.mxu0 %v1320_v52  ;;  %1385 = vmatprep.subr.bf16.mxu1 %v1384_v56  ;;  %v472_v51 = vld [vmem:[#allocation6 + $0x268] sm:$0xff]  ;;  %v470_v52 = vld [vmem:[#allocation6 + $0x258] sm:$0xff]  ;;  %v479_v6 = vld [vmem:[#allocation6 + $0x2a0] sm:$0xff] }
 0x106   :  { %v1340_v56 = vpack.c.bf16 %v472_v51, %v468_v50  ;;  %v1404_v60 = vpack.c.bf16 %v474_v53, %v470_v52  ;;  %v1346_v14 = vpack.c.bf16 %v479_v6, %v475_v5  ;;  %v483_v17 = vld [vmem:[#allocation6 + $0x2c0] sm:$0xff]  ;;  %v489_v23 = vld [vmem:[#allocation6 + $0x2f0] sm:$0xff]  ;;  %v506_v43 = vld [vmem:[#allocation6 + $0x378] sm:$0xff] }
 0x107   :  { %v487_v18 = vld [vmem:[#allocation6 + $0x2e0] sm:$0xff]  ;;  %v1414_v31 = vpack.c.bf16 %v489_v23, %v485_v19  ;;  %v493_v35 = vld [vmem:[#allocation6 + $0x310] sm:$0xff] }
 0x108   :  { %1323 = vmatpush1.bf16.msra.mxu0 %v1322_v62  ;;  %1387 = vmatpush1.bf16.msra.mxu1 %v1386_v63  ;;  %v476_v62 = vld [vmem:[#allocation6 + $0x288] sm:$0xff]  ;;  %v1350_v30 = vpack.c.bf16 %v487_v18, %v483_v17  ;;  %v491_v33 = vld [vmem:[#allocation6 + $0x300] sm:$0xff]  ;;  %v497_v37 = vld [vmem:[#allocation6 + $0x330] sm:$0xff]  ;;  %v228_v18 = vlaneseq }
 0x109   :  { %1325 = vmatprep.subr.bf16.mxu0 %v1324_v0  ;;  %1389 = vmatprep.subr.bf16.mxu1 %v1388_v4  ;;  %v480_v63 = vld [vmem:[#allocation6 + $0x2a8] sm:$0xff]  ;;  %v478_v0 = vld [vmem:[#allocation6 + $0x298] sm:$0xff]  ;;  %v495_v34 = vld [vmem:[#allocation6 + $0x320] sm:$0xff]  ;;  %v1418_v45 = vpack.c.bf16 %v497_v37, %v493_v35 }
 0x10a   :  { %v1344_v4 = vpack.c.bf16 %v480_v63, %v476_v62  ;;  %v1408_v8 = vpack.c.bf16 %v482_v1, %v478_v0  ;;  %v1354_v44 = vpack.c.bf16 %v495_v34, %v491_v33  ;;  %v499_v47 = vld [vmem:[#allocation6 + $0x340] sm:$0xff]  ;;  %v501_v52 = vld [vmem:[#allocation6 + $0x350] sm:$0xff] }
 0x10b   :  { %v503_v50 = vld [vmem:[#allocation6 + $0x360] sm:$0xff]  ;;  %v505_v53 = vld [vmem:[#allocation6 + $0x370] sm:$0xff] }
 0x10c   :  { %1327 = vmatpush1.bf16.msra.mxu0 %v1326_v10  ;;  %1391 = vmatpush1.bf16.msra.mxu1 %v1390_v11  ;;  %v484_v10 = vld [vmem:[#allocation6 + $0x2c8] sm:$0xff] }
 0x10d   :  { %1329 = vmatprep.subr.bf16.mxu0 %v1328_v12  ;;  %1393 = vmatprep.subr.bf16.mxu1 %v1392_v16  ;;  %v488_v11 = vld [vmem:[#allocation6 + $0x2e8] sm:$0xff]  ;;  %v486_v12 = vld [vmem:[#allocation6 + $0x2d8] sm:$0xff] }
 0x10e   :  { %v1348_v16 = vpack.c.bf16 %v488_v11, %v484_v10  ;;  %v1412_v22 = vpack.c.bf16 %v490_v13, %v486_v12 }
 0x110   :  { %1331 = vmatpush1.bf16.msra.mxu0 %v1330_v24  ;;  %1395 = vmatpush1.bf16.msra.mxu1 %v1394_v25  ;;  %v492_v24 = vld [vmem:[#allocation6 + $0x308] sm:$0xff] }
 0x111   :  { %1333 = vmatprep.subr.bf16.mxu0 %v1332_v26  ;;  %1397 = vmatprep.subr.bf16.mxu1 %v1396_v32  ;;  %v496_v25 = vld [vmem:[#allocation6 + $0x328] sm:$0xff]  ;;  %v494_v26 = vld [vmem:[#allocation6 + $0x318] sm:$0xff] }
 0x112   :  { %v1352_v32 = vpack.c.bf16 %v496_v25, %v492_v24  ;;  %v1416_v36 = vpack.c.bf16 %v498_v27, %v494_v26  ;;  %v1998_v27 = vshrl.u32 %v228_v18, 7 }
 0x114   :  { %1335 = vmatpush1.bf16.msra.mxu0 %v1334_v40  ;;  %1399 = vmatpush1.bf16.msra.mxu1 %v1398_v41  ;;  %v500_v40 = vld [vmem:[#allocation6 + $0x348] sm:$0xff] }
 0x115   :  { %1337 = vmatprep.subr.bf16.mxu0 %v1336_v42  ;;  %1401 = vmatprep.subr.bf16.mxu1 %v1400_v46  ;;  %v504_v41 = vld [vmem:[#allocation6 + $0x368] sm:$0xff]  ;;  %v502_v42 = vld [vmem:[#allocation6 + $0x358] sm:$0xff] }
 0x116   :  { %v1356_v46 = vpack.c.bf16 %v504_v41, %v500_v40  ;;  %v1420_v51 = vpack.c.bf16 %v506_v43, %v502_v42 }
 0x118   :  { %1339 = vmatpush1.bf16.msra.mxu0 %v1338_v54  ;;  %1403 = vmatpush1.bf16.msra.mxu1 %v1402_v55  ;;  %v1358_v54 = vpack.c.bf16 %v503_v50, %v499_v47  ;;  %v1422_v55 = vpack.c.bf16 %v505_v53, %v501_v52  ;;  %v508_v53 = vld [vmem:[#allocation6 + $0x388] sm:$0xff] }
 0x119   :  { %1341 = vmatprep.subr.bf16.mxu0 %v1340_v56  ;;  %1405 = vmatprep.subr.bf16.mxu1 %v1404_v60 }
 0x11c   :  { %1343 = vmatpush1.bf16.msra.mxu0 %v1342_v2  ;;  %1407 = vmatpush1.bf16.msra.mxu1 %v1406_v3 }
 0x11d   :  { %1345 = vmatprep.subr.bf16.mxu0 %v1344_v4  ;;  %1409 = vmatprep.subr.bf16.mxu1 %v1408_v8 }
 0x120   :  { %1347 = vmatpush1.bf16.msra.mxu0 %v1346_v14  ;;  %1411 = vmatpush1.bf16.msra.mxu1 %v1410_v15 }
 0x121   :  { %1349 = vmatprep.subr.bf16.mxu0 %v1348_v16  ;;  %1413 = vmatprep.subr.bf16.mxu1 %v1412_v22  ;;  %v1821_v16 = vmov 1983009808  }
 0x122   :  { %v226_v17 = vunpack.c.l.s4 %v1821_v16  ;;  %v519_v16 = vld [vmem:[#allocation6 + $0x3e0] sm:$0xff] }
 0x124   :  { %1351 = vmatpush1.bf16.msra.mxu0 %v1350_v30  ;;  %1415 = vmatpush1.bf16.msra.mxu1 %v1414_v31  ;;  %v227_v26 = vunpack.c.0.s8 %v226_v17 }
 0x125   :  { %1353 = vmatprep.subr.bf16.mxu0 %v1352_v32  ;;  %1417 = vmatprep.subr.bf16.mxu1 %v1416_v36  ;;  %v1822_v32 = vmov 1934713408  }
 0x126   :  { %v290_v33 = vunpack.c.l.s4 %v1822_v32  ;;  %v230_v42 = vsub.s32 %v227_v26, %v1998_v27 }
 0x128   :  { %1355 = vmatpush1.bf16.msra.mxu0 %v1354_v44  ;;  %1419 = vmatpush1.bf16.msra.mxu1 %v1418_v45 }
 0x129   :  { %1357 = vmatprep.subr.bf16.mxu0 %v1356_v46  ;;  %1421 = vmatprep.subr.bf16.mxu1 %v1420_v51 }
 0x12c   :  { %1359 = vmatpush1.bf16.msra.mxu0 %v1358_v54  ;;  %1423 = vmatpush1.bf16.msra.mxu1 %v1422_v55  ;;  %v512_v54 = vld [vmem:[#allocation6 + $0x3a8] sm:$0xff]  ;;  %v510_v55 = vld [vmem:[#allocation6 + $0x398] sm:$0xff] }
 0x17f   :  { %v169_v56 = vpop.xlane.xlu0 %168 }
 0x180   :  { %v191_v57 = vmul.f32 0.03125, %v169_v56 }
 0x182   :  { %v199_v0 = vadd.f32 1e-05, %v191_v57 }
 0x183   :  { %v172_v58 = vpop.xlane.xlu1 %171  ;;  %v175_v59 = vpop.xlane.xlu0 %174 }
 0x184   :  { %v192_v60 = vmul.f32 0.03125, %v172_v58  ;;  %v193_v61 = vmul.f32 0.03125, %v175_v59  ;;  %v514_v59 = vld [vmem:[#allocation6 + $0x3b8] sm:$0xff] }
 0x186   :  { %v200_v62 = vadd.f32 1e-05, %v192_v60  ;;  %v201_v63 = vadd.f32 1e-05, %v193_v61  ;;  %v511_v60 = vld [vmem:[#allocation6 + $0x3a0] sm:$0xff] }
 0x187   :  { %v178_v1 = vpop.xlane.xlu1 %177  ;;  %v181_v2 = vpop.xlane.xlu0 %180 }
 0x188   :  { %v194_v3 = vmul.f32 0.03125, %v178_v1  ;;  %v195_v4 = vmul.f32 0.03125, %v181_v2  ;;  %1654 = vrsqrt.f32 %v201_v63  ;;  %v1360_v63 = vpack.c.bf16 %v512_v54, %v508_v53  ;;  %v513_v1 = vld [vmem:[#allocation6 + $0x3b0] sm:$0xff] }
 0x189   :  { %1656 = vrsqrt.f32 %v200_v62 }
 0x18a   :  { %v202_v5 = vadd.f32 1e-05, %v194_v3  ;;  %1658 = vrsqrt.f32 %v199_v0  ;;  %v203_v6 = vadd.f32 1e-05, %v195_v4  ;;  %v509_v0 = vld [vmem:[#allocation6 + $0x390] sm:$0xff]  ;;  %v1424_v4 = vpack.c.bf16 %v514_v59, %v510_v55  ;;  %1361 = vmatprep.subr.bf16.mxu0 %v1360_v63  ;;  %v710_v59 = vld [vmem:[#allocation8] sm:$0xff] }
 0x18b   :  { %v184_v7 = vpop.xlane.xlu1 %183  ;;  %v187_v8 = vpop.xlane.xlu0 %186  ;;  %v717_v63 = vld [vmem:[#allocation8 + $0x38] sm:$0xff] }
 0x18c   :  { %1660 = vrsqrt.f32 %v202_v5  ;;  %v196_v9 = vmul.f32 0.03125, %v184_v7  ;;  %v197_v10 = vmul.f32 0.03125, %v187_v8  ;;  %v516_v8 = vld [vmem:[#allocation6 + $0x3c8] sm:$0xff]  ;;  %1425 = vmatprep.subr.bf16.mxu1 %v1424_v4 }
 0x18d   :  { %1662 = vrsqrt.f32 %v203_v6 }
 0x18e   :  { %v204_v11 = vadd.f32 1e-05, %v196_v9  ;;  %v205_v12 = vadd.f32 1e-05, %v197_v10  ;;  %v520_v9 = vld [vmem:[#allocation6 + $0x3e8] sm:$0xff]  ;;  %v518_v10 = vld [vmem:[#allocation6 + $0x3d8] sm:$0xff] }
 0x18f   :  { %v190_v13 = vpop.xlane.xlu1 %189 }
 0x190   :  { %v198_v14 = vmul.f32 0.03125, %v190_v13  ;;  %1664 = vrsqrt.f32 %v205_v12  ;;  %v1364_v13 = vpack.c.bf16 %v520_v9, %v516_v8  ;;  %v719_v8 = vld [vmem:[#allocation8 + $0x48] sm:$0xff]  ;;  %v721_v9 = vld [vmem:[#allocation8 + $0x58] sm:$0xff] }
 0x191   :  { %1666 = vrsqrt.f32 %v204_v11 }
 0x192   :  { %v206_v15 = vadd.f32 1e-05, %v198_v14  ;;  %v1655_v19 = vpop.eup %1654  ;;  %v522_v14 = vld [vmem:[#allocation6 + $0x3f8] sm:$0xff] }
 0x193   :  { %v1657_v22 = vpop.eup %1656  ;;  %v217_v25 = vmul.f32 %v1655_v19, %v1959_v21  ;;  %v291_v21 = vunpack.c.0.s8 %v290_v33  ;;  %v1428_v18 = vpack.c.bf16 %v522_v14, %v518_v10  ;;  %v723_v14 = vld [vmem:[#allocation8 + $0x68] sm:$0xff] }
 0x194   :  { %1668 = vrsqrt.f32 %v206_v15  ;;  %v1659_v23 = vpop.eup %1658  ;;  %v216_v30 = vmul.f32 %v1657_v22, %v1965_v28  ;;  %v515_v15 = vld [vmem:[#allocation6 + $0x3c0] sm:$0xff]  ;;  %v517_v22 = vld [vmem:[#allocation6 + $0x3d0] sm:$0xff] }
 0x195   :  { %v215_v34 = vmul.f32 %v1659_v23, %v1957_v20  ;;  %v294_v58 = vsub.s32 %v291_v21, %v1998_v27  ;;  %v1366_v19 = vpack.c.bf16 %v519_v16, %v515_v15  ;;  %v521_v23 = vld [vmem:[#allocation6 + $0x3f0] sm:$0xff]  ;;  %v725_v15 = vld [vmem:[#allocation8 + $0x78] sm:$0xff] }
 0x196   :  { %v1661_v24 = vpop.eup %1660 }
 0x197   :  { %v218_v31 = vmul.f32 %v1661_v24, %v1967_v29  ;;  %v1663_v35 = vpop.eup %1662  ;;  %v223_v40 = vcombine.low %v215_v34, %v217_v25  ;;  %v224_v41 = vcombine.high %v215_v34, %v217_v25  ;;  %v1430_v34 = vpack.c.bf16 %v521_v23, %v517_v22  ;;  %v727_v22 = vld [vmem:[#allocation8 + $0x88] sm:$0xff]  ;;  %v729_v23 = vld [vmem:[#allocation8 + $0x98] sm:$0xff] }
 0x198   :  { %v219_v45 = vmul.f32 %v1663_v35, %v1975_v38  ;;  %v507_v38 = vld [vmem:[#allocation6 + $0x380] sm:$0xff] }
 0x199   :  { %v239_v36 = vcombine.low %v216_v30, %v218_v31  ;;  %v240_v37 = vcombine.high %v216_v30, %v218_v31  ;;  %v231_v50 = vrot.slane %v223_v40, %v230_v42  ;;  %v238_v51 = vrot.slane %v224_v41, %v230_v42  ;;  %v711_v41 = vld [vmem:[#allocation8 + $0x8] sm:$0xff] }
 0x19a   :  { %v1665_v43 = vpop.eup %1664  ;;  %v1362_v5 = vpack.c.bf16 %v511_v60, %v507_v38  ;;  %v712_v38 = vld [vmem:[#allocation8 + $0x10] sm:$0xff] }
 0x19b   :  { %v1667_v44 = vpop.eup %1666  ;;  %v221_v28 = vmul.f32 %v1665_v43, %v1985_v48  ;;  %v247_v46 = vrot.slane %v239_v36, %v230_v42  ;;  %v254_v29 = vrot.slane %v240_v37, %v230_v42  ;;  %v1434_v4 = vpack.c.bf16 %v712_v38, %v710_v59  ;;  %v746_v59 = vld [vmem:[#allocation8 + $0x120] sm:$0xff]  ;;  %v748_v38 = vld [vmem:[#allocation8 + $0x130] sm:$0xff] }
 0x19c   :  { %v220_v56 = vmul.f32 %v1667_v44, %v1977_v39  ;;  %1363 = vmatpush1.bf16.msra.mxu0 %v1362_v5 }
 0x19d   :  { %v255_v20 = vcombine.low %v219_v45, %v221_v28  ;;  %v256_v52 = vcombine.high %v219_v45, %v221_v28  ;;  %v288_v48 = vcombine.high %v231_v50, %v247_v46  ;;  %v304_v61 = vcombine.high %v238_v51, %v254_v29  ;;  %1365 = vmatprep.subr.bf16.mxu0 %v1364_v13  ;;  %v720_v13 = vld [vmem:[#allocation8 + $0x50] sm:$0xff] }
 0x19e   :  { %v1669_v47 = vpop.eup %1668  ;;  %v287_v62 = vcombine.low %v231_v50, %v247_v46  ;;  %v303_v39 = vcombine.low %v238_v51, %v254_v29 }
 0x19f   :  { %v222_v57 = vmul.f32 %v1669_v47, %v1987_v49  ;;  %v263_v6 = vrot.slane %v255_v20, %v230_v42  ;;  %v270_v7 = vrot.slane %v256_v52, %v230_v42  ;;  %v1426_v49 = vpack.c.bf16 %v513_v1, %v509_v0 }
 0x1a0   :  { %v302_v17 = vrot.slane %v288_v48, %v294_v58  ;;  %v318_v31 = vrot.slane %v304_v61, %v294_v58  ;;  %v295_v32 = vrot.slane %v287_v62, %v294_v58  ;;  %v311_v33 = vrot.slane %v303_v39, %v294_v58  ;;  %1367 = vmatpush1.bf16.msra.mxu0 %v1366_v19  ;;  %v715_v62 = vld [vmem:[#allocation8 + $0x28] sm:$0xff]  ;;  %v714_v39 = vld [vmem:[#allocation8 + $0x20] sm:$0xff]  ;;  %v724_v19 = vld [vmem:[#allocation8 + $0x70] sm:$0xff] }
 0x1a1   :  { %v271_v2 = vcombine.low %v220_v56, %v222_v57  ;;  %v272_v3 = vcombine.high %v220_v56, %v222_v57  ;;  %1427 = vmatpush1.bf16.msra.mxu1 %v1426_v49  ;;  %v716_v49 = vld [vmem:[#allocation8 + $0x30] sm:$0xff] }
 0x1a2   :  { %1429 = vmatprep.subr.bf16.mxu1 %v1428_v18  ;;  %v1438_v10 = vpack.c.bf16 %v716_v49, %v714_v39  ;;  %v722_v18 = vld [vmem:[#allocation8 + $0x60] sm:$0xff]  ;;  %v761_v39 = vld [vmem:[#allocation8 + $0x198] sm:$0xff] }
 0x1a3   :  { %v279_v11 = vrot.slane %v271_v2, %v230_v42  ;;  %v286_v12 = vrot.slane %v272_v3, %v230_v42  ;;  %v713_v42 = vld [vmem:[#allocation8 + $0x18] sm:$0xff] }
 0x1a4   :  { %v1432_v51 = vpack.c.bf16 %v713_v42, %v711_v41 }
 0x1a5   :  { %v320_v24 = vcombine.high %v263_v6, %v279_v11  ;;  %v336_v25 = vcombine.high %v270_v7, %v286_v12  ;;  %v319_v26 = vcombine.low %v263_v6, %v279_v11  ;;  %v335_v30 = vcombine.low %v270_v7, %v286_v12  ;;  %1431 = vmatpush1.bf16.msra.mxu1 %v1430_v34  ;;  %v718_v12 = vld [vmem:[#allocation8 + $0x40] sm:$0xff] }
 0x1a6   :  { %1433 = vmatprep.subr.bf16.mxu0 %v1432_v51  ;;  %v1436_v7 = vpack.c.bf16 %v717_v63, %v715_v62  ;;  %v1440_v11 = vpack.c.bf16 %v721_v9, %v719_v8  ;;  %v1442_v16 = vpack.c.bf16 %v720_v13, %v718_v12  ;;  %v745_v51 = vld [vmem:[#allocation8 + $0x118] sm:$0xff]  ;;  %v750_v63 = vld [vmem:[#allocation8 + $0x140] sm:$0xff] }
 0x1a7   :  { %v334_v35 = vrot.slane %v320_v24, %v294_v58  ;;  %v350_v36 = vrot.slane %v336_v25, %v294_v58  ;;  %v327_v37 = vrot.slane %v319_v26, %v294_v58  ;;  %v343_v40 = vrot.slane %v335_v30, %v294_v58  ;;  %v726_v26 = vld [vmem:[#allocation8 + $0x80] sm:$0xff]  ;;  %v728_v30 = vld [vmem:[#allocation8 + $0x90] sm:$0xff]  ;;  %v765_v12 = vld [vmem:[#allocation8 + $0x1b8] sm:$0xff] }
 0x1a8   :  { %v1446_v24 = vpack.c.bf16 %v724_v19, %v722_v18  ;;  %v1448_v25 = vpack.c.bf16 %v729_v23, %v727_v22  ;;  %v758_v9 = vld [vmem:[#allocation8 + $0x180] sm:$0xff]  ;;  %v769_v18 = vld [vmem:[#allocation8 + $0x1d8] sm:$0xff] }
 0x1a9   :  { %v353_v43 = vcombine.low %v302_v17, %v334_v35  ;;  %v357_v21 = vcombine.low %v318_v31, %v350_v36  ;;  %v352_v44 = vcombine.high %v295_v32, %v327_v37  ;;  %v355_v45 = vcombine.low %v311_v33, %v343_v40  ;;  %v766_v23 = vld [vmem:[#allocation8 + $0x1c0] sm:$0xff] }
 0x1aa   :  { %v356_v28 = vcombine.high %v311_v33, %v343_v40  ;;  %v351_v46 = vcombine.low %v295_v32, %v327_v37  ;;  %v354_v47 = vcombine.high %v302_v17, %v334_v35  ;;  %v358_v50 = vcombine.high %v318_v31, %v350_v36  ;;  %v731_v31 = vld [vmem:[#allocation8 + $0xa8] sm:$0xff]  ;;  %v733_v32 = vld [vmem:[#allocation8 + $0xb8] sm:$0xff]  ;;  %v730_v35 = vld [vmem:[#allocation8 + $0xa0] sm:$0xff] }
 0x1ab   :  { %v1644_v29 = vpack.i.bf16 %v353_v43, %v357_v21  ;;  %v1444_v17 = vpack.c.bf16 %v725_v15, %v723_v14  ;;  %v1450_v33 = vpack.c.bf16 %v728_v30, %v726_v26  ;;  %v1452_v34 = vpack.c.bf16 %v733_v32, %v731_v31  ;;  %v732_v36 = vld [vmem:[#allocation8 + $0xb0] sm:$0xff]  ;;  %v735_v37 = vld [vmem:[#allocation8 + $0xc8] sm:$0xff]  ;;  %v737_v40 = vld [vmem:[#allocation8 + $0xd8] sm:$0xff] }
 0x1ac   :  { %v1639_v20 = vpack.i.bf16 %v352_v44, %v356_v28  ;;  %v1649_v52 = vpack.i.bf16 %v354_v47, %v358_v50  ;;  %v1454_v41 = vpack.c.bf16 %v732_v36, %v730_v35  ;;  %v1456_v42 = vpack.c.bf16 %v737_v40, %v735_v37  ;;  %v734_v43 = vld [vmem:[#allocation8 + $0xc0] sm:$0xff]  ;;  %v736_v21 = vld [vmem:[#allocation8 + $0xd0] sm:$0xff]  ;;  %v739_v44 = vld [vmem:[#allocation8 + $0xe8] sm:$0xff] }
 0x1ad   :  { %1645 = vrot.lane.b32.xlu1 %v1644_v29, %s1823_s7  ;;  %v1458_v28 = vpack.c.bf16 %v736_v21, %v734_v43  ;;  %v738_v29 = vld [vmem:[#allocation8 + $0xe0] sm:$0xff]  ;;  %v740_v47 = vld [vmem:[#allocation8 + $0xf0] sm:$0xff]  ;;  %v743_v50 = vld [vmem:[#allocation8 + $0x108] sm:$0xff] }
 0x1ae   :  { %1640 = vrot.lane.b32.xlu0 %v1639_v20, %s1812_s20  ;;  %v1462_v20 = vpack.c.bf16 %v740_v47, %v738_v29  ;;  %v762_v15 = vld [vmem:[#allocation8 + $0x1a0] sm:$0xff]  ;;  %v771_v26 = vld [vmem:[#allocation8 + $0x1e8] sm:$0xff]  ;;  %v773_v30 = vld [vmem:[#allocation8 + $0x1f8] sm:$0xff] }
 0x1af   :  { %v1492_v31 = vpack.c.bf16 %v773_v30, %v771_v26  ;;  %v770_v32 = vld [vmem:[#allocation8 + $0x1e0] sm:$0xff]  ;;  %v775_v35 = vld [vmem:[#allocation8 + $0x208] sm:$0xff]  ;;  %v777_v36 = vld [vmem:[#allocation8 + $0x218] sm:$0xff] }
 0x1b0   :  { %v1496_v37 = vpack.c.bf16 %v777_v36, %v775_v35  ;;  %v1010_v40 = vld [vmem:[#allocation9 + $0x80] sm:$0xff]  ;;  %v995_v21 = vld [vmem:[#allocation9 + $0x8] sm:$0xff]  ;;  %v996_v29 = vld [vmem:[#allocation9 + $0x10] sm:$0xff] }
 0x1b1   :  { %1650 = vrot.lane.b32.xlu1 %v1649_v52, %s1824_s10  ;;  %v1464_v52 = vpack.c.bf16 %v745_v51, %v743_v50  ;;  %v997_v47 = vld [vmem:[#allocation9 + $0x18] sm:$0xff]  ;;  %v1014_v50 = vld [vmem:[#allocation9 + $0xa0] sm:$0xff]  ;;  %v1015_v51 = vld [vmem:[#allocation9 + $0xa8] sm:$0xff] }
 0x1b2   :  { %v774_v26 = vld [vmem:[#allocation8 + $0x200] sm:$0xff]  ;;  %v776_v30 = vld [vmem:[#allocation8 + $0x210] sm:$0xff] }
 0x1b3   :  { %v1498_v36 = vpack.c.bf16 %v776_v30, %v774_v26  ;;  %v812_v26 = vld [vmem:[#allocation8 + $0x330] sm:$0xff]  ;;  %v815_v30 = vld [vmem:[#allocation8 + $0x348] sm:$0xff] }
 0x21f   :  { %v1646_v53 = vpop.permute.xlu1 %1645 }
 0x220   :  { %v1641_v54 = vpop.permute.xlu0 %1640  ;;  %v1648_v55 = vunpack.i.h.bf16 %v1646_v53  ;;  %v1647_v56 = vunpack.i.l.bf16 %v1646_v53  ;;  %v742_v53 = vld [vmem:[#allocation8 + $0x100] sm:$0xff] }
 0x221   :  { %v1643_v57 = vunpack.i.h.bf16 %v1641_v54  ;;  %v1642_v58 = vunpack.i.l.bf16 %v1641_v54  ;;  %v744_v54 = vld [vmem:[#allocation8 + $0x110] sm:$0xff] }
 0x223   :  { %v383_v60 = vsel %vm117_vm0, %v351_v46, %v1643_v57  ;;  %v1651_v48 = vpop.permute.xlu1 %1650  ;;  %v388_v61 = vsel %vm117_vm0, %v355_v45, %v1642_v58  ;;  %v741_v45 = vld [vmem:[#allocation8 + $0xf8] sm:$0xff]  ;;  %v1466_v57 = vpack.c.bf16 %v744_v54, %v742_v53  ;;  %v998_v53 = vld [vmem:[#allocation9 + $0x20] sm:$0xff]  ;;  %v999_v54 = vld [vmem:[#allocation9 + $0x28] sm:$0xff] }
 0x224   :  { %v1653_v0 = vunpack.i.h.bf16 %v1651_v48  ;;  %v1652_v1 = vunpack.i.l.bf16 %v1651_v48  ;;  %v389_v2 = vsel %vm384_vm1, %v388_v61, %v1647_v56  ;;  %v385_v3 = vsel %vm384_vm1, %v383_v60, %v1648_v55  ;;  %v747_v55 = vld [vmem:[#allocation8 + $0x128] sm:$0xff]  ;;  %v749_v56 = vld [vmem:[#allocation8 + $0x138] sm:$0xff] }
 0x225   :  { %v1460_v46 = vpack.c.bf16 %v741_v45, %v739_v44  ;;  %v1468_v58 = vpack.c.bf16 %v749_v56, %v747_v55  ;;  %v751_v60 = vld [vmem:[#allocation8 + $0x148] sm:$0xff]  ;;  %v753_v48 = vld [vmem:[#allocation8 + $0x158] sm:$0xff]  ;;  %v1470_v61 = vpack.c.bf16 %v748_v38, %v746_v59  ;;  %v1012_v44 = vld [vmem:[#allocation9 + $0x90] sm:$0xff] }
 0x226   :  { %v390_v5 = vsel %vm386_vm2, %v389_v2, %v1652_v1  ;;  %v387_v6 = vsel %vm386_vm2, %v385_v3, %v1653_v0  ;;  %v1472_v62 = vpack.c.bf16 %v753_v48, %v751_v60  ;;  %v752_v0 = vld [vmem:[#allocation8 + $0x150] sm:$0xff]  ;;  %v755_v1 = vld [vmem:[#allocation8 + $0x168] sm:$0xff]  ;;  %v757_v2 = vld [vmem:[#allocation8 + $0x178] sm:$0xff] }
 0x227   :  { %587 = vmatprep.mubr.f32.mxu0 %v390_v5  ;;  %658 = vmatprep.mubr.f32.mxu1 %v390_v5  ;;  %v1474_v3 = vpack.c.bf16 %v752_v0, %v750_v63  ;;  %v754_v5 = vld [vmem:[#allocation8 + $0x160] sm:$0xff]  ;;  %v1013_v45 = vld [vmem:[#allocation9 + $0x98] sm:$0xff]  ;;  %v1016_v55 = vld [vmem:[#allocation9 + $0xb0] sm:$0xff] }
 0x228   :  { %588 = vmatmul.mubr.f32.vlgmr.msra.gmra.mrb[0].mxu0 %v387_v6  ;;  %659 = vmatmul.mubr.f32.vlgmr.msra.gmra.mrb[0].mxu1 %v387_v6  ;;  %v756_v6 = vld [vmem:[#allocation8 + $0x170] sm:$0xff]  ;;  %v1017_v56 = vld [vmem:[#allocation9 + $0xb8] sm:$0xff]  ;;  %v1018_v60 = vld [vmem:[#allocation9 + $0xc0] sm:$0xff] }
 0x229   :  { %1435 = vmatpush1.bf16.msra.mxu0 %v1434_v4  ;;  %v1476_v4 = vpack.c.bf16 %v757_v2, %v755_v1  ;;  %v1478_v49 = vpack.c.bf16 %v756_v6, %v754_v5  ;;  %v1000_v59 = vld [vmem:[#allocation9 + $0x30] sm:$0xff]  ;;  %v1001_v38 = vld [vmem:[#allocation9 + $0x38] sm:$0xff]  ;;  %v1019_v48 = vld [vmem:[#allocation9 + $0xc8] sm:$0xff] }
 0x22a   :  { %1437 = vmatprep.subr.bf16.mxu0 %v1436_v7  ;;  %v759_v7 = vld [vmem:[#allocation8 + $0x188] sm:$0xff]  ;;  %v1002_v63 = vld [vmem:[#allocation9 + $0x40] sm:$0xff]  ;;  %v1020_v1 = vld [vmem:[#allocation9 + $0xd0] sm:$0xff] }
 0x22b   :  { %v1480_v8 = vpack.c.bf16 %v761_v39, %v759_v7  ;;  %v1003_v0 = vld [vmem:[#allocation9 + $0x48] sm:$0xff]  ;;  %v1021_v2 = vld [vmem:[#allocation9 + $0xd8] sm:$0xff]  ;;  %v1004_v5 = vld [vmem:[#allocation9 + $0x50] sm:$0xff] }
 0x22c   :  { %v1005_v6 = vld [vmem:[#allocation9 + $0x58] sm:$0xff]  ;;  %v1022_v7 = vld [vmem:[#allocation9 + $0xe0] sm:$0xff]  ;;  %v1023_v39 = vld [vmem:[#allocation9 + $0xe8] sm:$0xff] }
 0x22d   :  { %1439 = vmatpush1.bf16.msra.mxu0 %v1438_v10  ;;  %v760_v10 = vld [vmem:[#allocation8 + $0x190] sm:$0xff] }
 0x22e   :  { %1441 = vmatprep.subr.bf16.mxu0 %v1440_v11  ;;  %v763_v11 = vld [vmem:[#allocation8 + $0x1a8] sm:$0xff]  ;;  %v1482_v13 = vpack.c.bf16 %v760_v10, %v758_v9  ;;  %v684_v9 = vsub.s32 0, %v1998_v27  ;;  %v692_v10 = vsub.s32 2, %v1998_v27 }
 0x22f   :  { %v1484_v14 = vpack.c.bf16 %v765_v12, %v763_v11  ;;  %v680_v11 = vld [vmem:[%s2053_s2] sm:$0xf]  ;;  %v688_v12 = vsub.s32 1, %v1998_v27 }
 0x231   :  { %1443 = vmatpush1.bf16.msra.mxu0 %v1442_v16  ;;  %v764_v16 = vld [vmem:[#allocation8 + $0x1b0] sm:$0xff] }
 0x232   :  { %1445 = vmatprep.subr.bf16.mxu0 %v1444_v17  ;;  %v767_v17 = vld [vmem:[#allocation8 + $0x1c8] sm:$0xff]  ;;  %v1486_v19 = vpack.c.bf16 %v764_v16, %v762_v15  ;;  %v693_v15 = vrot.slane %v680_v11, %v692_v10  ;;  %v689_v16 = vrot.slane %v680_v11, %v688_v12  ;;  %v804_v10 = vld [vmem:[#allocation8 + $0x2f0] sm:$0xff] }
 0x233   :  { %v1488_v22 = vpack.c.bf16 %v769_v18, %v767_v17 }
 0x235   :  { %1447 = vmatpush1.bf16.msra.mxu0 %v1446_v24  ;;  %v768_v24 = vld [vmem:[#allocation8 + $0x1d0] sm:$0xff] }
 0x236   :  { %1449 = vmatprep.subr.bf16.mxu0 %v1448_v25  ;;  %v1490_v25 = vpack.c.bf16 %v768_v24, %v766_v23 }
 0x239   :  { %1451 = vmatpush1.bf16.msra.mxu0 %v1450_v33  ;;  %v772_v33 = vld [vmem:[#allocation8 + $0x1f0] sm:$0xff] }
 0x23a   :  { %1453 = vmatprep.subr.bf16.mxu0 %v1452_v34  ;;  %v1494_v34 = vpack.c.bf16 %v772_v33, %v770_v32  ;;  %v779_v33 = vld [vmem:[#allocation8 + $0x228] sm:$0xff] }
 0x23d   :  { %1455 = vmatpush1.bf16.msra.mxu0 %v1454_v41  ;;  %v1011_v41 = vld [vmem:[#allocation9 + $0x88] sm:$0xff] }
 0x23e   :  { %1457 = vmatprep.subr.bf16.mxu0 %v1456_v42  ;;  %v994_v42 = vld [vmem:[#allocation9] sm:$0xff]  ;;  %v1560_v43 = vpack.c.bf16 %v1011_v41, %v1010_v40 }
 0x23f   :  { %v778_v41 = vld [vmem:[#allocation8 + $0x220] sm:$0xff] }
 0x240   :  { %1561 = vmatprep.subr.bf16.mxu1 %v1560_v43 }
 0x241   :  { %1459 = vmatpush1.bf16.msra.mxu0 %v1458_v28  ;;  %v1562_v28 = vpack.c.bf16 %v995_v21, %v994_v42  ;;  %v780_v42 = vld [vmem:[#allocation8 + $0x230] sm:$0xff]  ;;  %v783_v21 = vld [vmem:[#allocation8 + $0x248] sm:$0xff] }
 0x242   :  { %1461 = vmatprep.subr.bf16.mxu0 %v1460_v46  ;;  %v1564_v46 = vpack.c.bf16 %v1013_v45, %v1012_v44  ;;  %v785_v44 = vld [vmem:[#allocation8 + $0x258] sm:$0xff]  ;;  %v1502_v45 = vpack.c.bf16 %v780_v42, %v778_v41  ;;  %v818_v42 = vld [vmem:[#allocation8 + $0x360] sm:$0xff] }
 0x243   :  { %1563 = vmatpush3.bf16.msra.mxu1 %v1562_v28  ;;  %v1504_v28 = vpack.c.bf16 %v785_v44, %v783_v21  ;;  %v823_v21 = vld [vmem:[#allocation8 + $0x388] sm:$0xff]  ;;  %v825_v44 = vld [vmem:[#allocation8 + $0x398] sm:$0xff] }
 0x244   :  { %1565 = vmatprep.subr.bf16.mxu1 %v1564_v46  ;;  %v782_v46 = vld [vmem:[#allocation8 + $0x240] sm:$0xff] }
 0x245   :  { %1463 = vmatpush1.bf16.msra.mxu0 %v1462_v20  ;;  %v1566_v20 = vpack.c.bf16 %v997_v47, %v996_v29  ;;  %v784_v29 = vld [vmem:[#allocation8 + $0x250] sm:$0xff]  ;;  %v787_v47 = vld [vmem:[#allocation8 + $0x268] sm:$0xff] }
 0x246   :  { %1465 = vmatprep.subr.bf16.mxu0 %v1464_v52  ;;  %v1568_v52 = vpack.c.bf16 %v1015_v51, %v1014_v50  ;;  %v789_v50 = vld [vmem:[#allocation8 + $0x278] sm:$0xff]  ;;  %v1506_v51 = vpack.c.bf16 %v784_v29, %v782_v46  ;;  %v822_v46 = vld [vmem:[#allocation8 + $0x380] sm:$0xff]  ;;  %v824_v29 = vld [vmem:[#allocation8 + $0x390] sm:$0xff] }
 0x247   :  { %1567 = vmatpush3.bf16.msra.mxu1 %v1566_v20  ;;  %v1508_v20 = vpack.c.bf16 %v789_v50, %v787_v47  ;;  %v827_v47 = vld [vmem:[#allocation8 + $0x3a8] sm:$0xff]  ;;  %v829_v50 = vld [vmem:[#allocation8 + $0x3b8] sm:$0xff] }
 0x248   :  { %1569 = vmatprep.subr.bf16.mxu1 %v1568_v52  ;;  %v786_v52 = vld [vmem:[#allocation8 + $0x260] sm:$0xff] }
 0x249   :  { %1467 = vmatpush1.bf16.msra.mxu0 %v1466_v57  ;;  %v1570_v57 = vpack.c.bf16 %v999_v54, %v998_v53  ;;  %v788_v53 = vld [vmem:[#allocation8 + $0x270] sm:$0xff]  ;;  %v791_v54 = vld [vmem:[#allocation8 + $0x288] sm:$0xff] }
 0x24a   :  { %1469 = vmatprep.subr.bf16.mxu0 %v1468_v58  ;;  %v1572_v58 = vpack.c.bf16 %v1017_v56, %v1016_v55  ;;  %v793_v55 = vld [vmem:[#allocation8 + $0x298] sm:$0xff]  ;;  %v1510_v56 = vpack.c.bf16 %v788_v53, %v786_v52  ;;  %v826_v52 = vld [vmem:[#allocation8 + $0x3a0] sm:$0xff]  ;;  %v828_v53 = vld [vmem:[#allocation8 + $0x3b0] sm:$0xff] }
 0x24b   :  { %1571 = vmatpush3.bf16.msra.mxu1 %v1570_v57  ;;  %v1512_v57 = vpack.c.bf16 %v793_v55, %v791_v54  ;;  %v831_v54 = vld [vmem:[#allocation8 + $0x3c8] sm:$0xff]  ;;  %v833_v55 = vld [vmem:[#allocation8 + $0x3d8] sm:$0xff] }
 0x24c   :  { %1573 = vmatprep.subr.bf16.mxu1 %v1572_v58  ;;  %v790_v58 = vld [vmem:[#allocation8 + $0x280] sm:$0xff] }
 0x24d   :  { %1471 = vmatpush1.bf16.msra.mxu0 %v1470_v61  ;;  %v1574_v61 = vpack.c.bf16 %v1001_v38, %v1000_v59  ;;  %v792_v59 = vld [vmem:[#allocation8 + $0x290] sm:$0xff]  ;;  %v795_v38 = vld [vmem:[#allocation8 + $0x2a8] sm:$0xff] }
 0x24e   :  { %1473 = vmatprep.subr.bf16.mxu0 %v1472_v62  ;;  %v1576_v62 = vpack.c.bf16 %v1019_v48, %v1018_v60  ;;  %v797_v60 = vld [vmem:[#allocation8 + $0x2b8] sm:$0xff]  ;;  %v1514_v48 = vpack.c.bf16 %v792_v59, %v790_v58  ;;  %v830_v58 = vld [vmem:[#allocation8 + $0x3c0] sm:$0xff]  ;;  %v832_v59 = vld [vmem:[#allocation8 + $0x3d0] sm:$0xff] }
 0x24f   :  { %1575 = vmatpush3.bf16.msra.mxu1 %v1574_v61  ;;  %v1516_v61 = vpack.c.bf16 %v797_v60, %v795_v38  ;;  %v835_v38 = vld [vmem:[#allocation8 + $0x3e8] sm:$0xff]  ;;  %v837_v60 = vld [vmem:[#allocation8 + $0x3f8] sm:$0xff] }
 0x250   :  { %1577 = vmatprep.subr.bf16.mxu1 %v1576_v62  ;;  %v794_v62 = vld [vmem:[#allocation8 + $0x2a0] sm:$0xff] }
 0x251   :  { %1475 = vmatpush1.bf16.msra.mxu0 %v1474_v3  ;;  %v1578_v3 = vpack.c.bf16 %v1003_v0, %v1002_v63  ;;  %v796_v63 = vld [vmem:[#allocation8 + $0x2b0] sm:$0xff]  ;;  %v799_v0 = vld [vmem:[#allocation8 + $0x2c8] sm:$0xff] }
 0x252   :  { %1477 = vmatprep.subr.bf16.mxu0 %v1476_v4  ;;  %v1580_v4 = vpack.c.bf16 %v1021_v2, %v1020_v1  ;;  %v801_v1 = vld [vmem:[#allocation8 + $0x2d8] sm:$0xff]  ;;  %v1518_v2 = vpack.c.bf16 %v796_v63, %v794_v62  ;;  %v834_v62 = vld [vmem:[#allocation8 + $0x3e0] sm:$0xff]  ;;  %v836_v63 = vld [vmem:[#allocation8 + $0x3f0] sm:$0xff] }
 0x253   :  { %1579 = vmatpush3.bf16.msra.mxu1 %v1578_v3  ;;  %v1520_v3 = vpack.c.bf16 %v801_v1, %v799_v0  ;;  %v1558_v0 = vpack.c.bf16 %v836_v63, %v834_v62 }
 0x254   :  { %1581 = vmatprep.subr.bf16.mxu1 %v1580_v4  ;;  %v798_v4 = vld [vmem:[#allocation8 + $0x2c0] sm:$0xff] }
 0x255   :  { %1479 = vmatpush1.bf16.msra.mxu0 %v1478_v49  ;;  %v1582_v49 = vpack.c.bf16 %v1005_v6, %v1004_v5  ;;  %v800_v5 = vld [vmem:[#allocation8 + $0x2d0] sm:$0xff]  ;;  %v803_v6 = vld [vmem:[#allocation8 + $0x2e8] sm:$0xff] }
 0x256   :  { %1481 = vmatprep.subr.bf16.mxu0 %v1480_v8  ;;  %v1584_v8 = vpack.c.bf16 %v1023_v39, %v1022_v7  ;;  %v805_v7 = vld [vmem:[#allocation8 + $0x2f8] sm:$0xff]  ;;  %v1522_v39 = vpack.c.bf16 %v800_v5, %v798_v4  ;;  %v1024_v5 = vld [vmem:[#allocation9 + $0xf0] sm:$0xff] }
 0x257   :  { %1583 = vmatpush3.bf16.msra.mxu1 %v1582_v49  ;;  %v1524_v49 = vpack.c.bf16 %v805_v7, %v803_v6  ;;  %v1025_v6 = vld [vmem:[#allocation9 + $0xf8] sm:$0xff] }
 0x258   :  { %1585 = vmatprep.subr.bf16.mxu1 %v1584_v8  ;;  %v802_v8 = vld [vmem:[#allocation8 + $0x2e0] sm:$0xff]  ;;  %v1588_v7 = vpack.c.bf16 %v1025_v6, %v1024_v5 }
 0x259   :  { %1483 = vmatpush1.bf16.msra.mxu0 %v1482_v13  ;;  %v696_v13 = vsub.s32 3, %v1998_v27 }
 0x25a   :  { %1485 = vmatprep.subr.bf16.mxu0 %v1484_v14  ;;  %v685_v14 = vrot.slane %v680_v11, %v684_v9 }
 0x25b   :  { %v697_v17 = vrot.slane %v680_v11, %v696_v13  ;;  %v807_v11 = vld [vmem:[#allocation8 + $0x308] sm:$0xff]  ;;  %v809_v13 = vld [vmem:[#allocation8 + $0x318] sm:$0xff] }
 0x25d   :  { %1487 = vmatpush1.bf16.msra.mxu0 %v1486_v19 }
 0x25e   :  { %1489 = vmatprep.subr.bf16.mxu0 %v1488_v22 }
 0x261   :  { %1491 = vmatpush1.bf16.msra.mxu0 %v1490_v25 }
 0x262   :  { %1493 = vmatprep.subr.bf16.mxu0 %v1492_v31 }
 0x265   :  { %1495 = vmatpush1.bf16.msra.mxu0 %v1494_v34  ;;  %v781_v34 = vld [vmem:[#allocation8 + $0x238] sm:$0xff] }
 0x266   :  { %1497 = vmatprep.subr.bf16.mxu0 %v1496_v37  ;;  %v1500_v40 = vpack.c.bf16 %v781_v34, %v779_v33  ;;  %v814_v34 = vld [vmem:[#allocation8 + $0x340] sm:$0xff] }
 0x2fb   :  { %v589_v18 = vpop.f32.mrb[0].mxu0  ;;  %v660_v19 = vpop.f32.mrb[0].mxu1 }
 0x2fc   :  { %v702_v22 = vadd.f32 %v685_v14, %v589_v18  ;;  %v2023_v23 = vadd.f32 %v693_v15, %v660_v19  ;;  %v591_v24 = vpop.f32.mrb[1].mxu0  ;;  %v662_v25 = vpop.f32.mrb[1].mxu1  ;;  %v1526_v14 = vpack.c.bf16 %v804_v10, %v802_v8  ;;  %v1528_v15 = vpack.c.bf16 %v809_v13, %v807_v11  ;;  %v811_v18 = vld [vmem:[#allocation8 + $0x328] sm:$0xff]  ;;  %v813_v19 = vld [vmem:[#allocation8 + $0x338] sm:$0xff]  ;;  %v838_v11 = vld [vmem:[%s2055_s4] sm:$0x3] }
 0x2fd   :  { %v703_v31 = vadd.f32 %v689_v16, %v591_v24  ;;  %v705_v32 = vadd.f32 %v697_v17, %v662_v25  ;;  %v806_v16 = vld [vmem:[#allocation8 + $0x300] sm:$0xff]  ;;  %v808_v17 = vld [vmem:[#allocation8 + $0x310] sm:$0xff]  ;;  %v1532_v24 = vpack.c.bf16 %v813_v19, %v811_v18  ;;  %v1825_v10 = vmov 0.0|0.0   ;;  %v1105_v18 = vld [vmem:[#allocation11 + $0x8] sm:$0xff] }
 0x2fe   :  { %v706_v37 = vmax.f32 %v702_v22, 0.0  ;;  %v1530_v22 = vpack.c.bf16 %v808_v17, %v806_v16  ;;  %v810_v25 = vld [vmem:[#allocation8 + $0x320] sm:$0xff]  ;;  %v708_v1 = vmax.f32 %v2023_v23, 0.0  ;;  %v843_v23 = vrot.slane %v838_v11, %v684_v9 }
 0x2ff   :  { %v707_v35 = vmax.f32 %v703_v31, 0.0  ;;  %v709_v43 = vmax.f32 %v705_v32, 0.0  ;;  %v817_v31 = vld [vmem:[#allocation8 + $0x358] sm:$0xff]  ;;  %v1534_v32 = vpack.c.bf16 %v812_v26, %v810_v25  ;;  %v847_v13 = vrot.slane %v838_v11, %v688_v12  ;;  %v1104_v17 = vld [vmem:[#allocation11] sm:$0xff]  ;;  %v1106_v26 = vld [vmem:[#allocation11 + $0x10] sm:$0xff] }
 0x300   :  { %v1536_v33 = vpack.c.bf16 %v817_v31, %v815_v30  ;;  %v1107_v30 = vld [vmem:[#allocation11 + $0x18] sm:$0xff]  ;;  %v1108_v9 = vld [vmem:[#allocation11 + $0x20] sm:$0xff]  ;;  %v1110_v12 = vld [vmem:[#allocation11 + $0x30] sm:$0xff] }
 0x301   :  { %914 = vmatprep.mubr.f32.mxu0 %v707_v35  ;;  %v816_v35 = vld [vmem:[#allocation8 + $0x350] sm:$0xff]  ;;  %v1596_v31 = vpack.c.bf16 %v1107_v30, %v1106_v26 }
 0x302   :  { %915 = vmatmul.mubr.f32.vlgmr.msra.gmra.mrb[2].mxu0 %v706_v37  ;;  %v821_v37 = vld [vmem:[#allocation8 + $0x378] sm:$0xff] }
 0x303   :  { %1499 = vmatpush1.bf16.msra.mxu0 %v1498_v36  ;;  %985 = vmatprep.mubr.f32.mxu0 %v709_v43  ;;  %v819_v36 = vld [vmem:[#allocation8 + $0x368] sm:$0xff]  ;;  %v820_v43 = vld [vmem:[#allocation8 + $0x370] sm:$0xff] }
 0x304   :  { %1501 = vmatprep.subr.bf16.mxu0 %v1500_v40  ;;  %v1538_v40 = vpack.c.bf16 %v816_v35, %v814_v34  ;;  %v1540_v41 = vpack.c.bf16 %v821_v37, %v819_v36  ;;  %v1112_v35 = vld [vmem:[#allocation11 + $0x40] sm:$0xff]  ;;  %v1113_v36 = vld [vmem:[#allocation11 + $0x48] sm:$0xff] }
 0x305   :  { %v1605_v37 = vpack.c.bf16 %v1113_v36, %v1112_v35 }
 0x307   :  { %1503 = vmatpush1.bf16.msra.mxu0 %v1502_v45  ;;  %v1542_v45 = vpack.c.bf16 %v820_v43, %v818_v42  ;;  %v1116_v43 = vld [vmem:[#allocation11 + $0x60] sm:$0xff] }
 0x308   :  { %1505 = vmatprep.subr.bf16.mxu0 %v1504_v28  ;;  %v1544_v28 = vpack.c.bf16 %v825_v44, %v823_v21  ;;  %v1117_v21 = vld [vmem:[#allocation11 + $0x68] sm:$0xff] }
 0x309   :  { %v1611_v44 = vpack.c.bf16 %v1117_v21, %v1116_v43 }
 0x30b   :  { %1507 = vmatpush1.bf16.msra.mxu0 %v1506_v51  ;;  %v1546_v51 = vpack.c.bf16 %v824_v29, %v822_v46  ;;  %v1827_v29 = vmov 0.0  }
 0x30c   :  { %1509 = vmatprep.subr.bf16.mxu0 %v1508_v20  ;;  %v1548_v20 = vpack.c.bf16 %v829_v50, %v827_v47  ;;  %v1215_v50 = vld [vmem:[%s2057_s6] ss:$0 sm:$0xff] }
 0x30f   :  { %1511 = vmatpush1.bf16.msra.mxu0 %v1510_v56  ;;  %v1550_v56 = vpack.c.bf16 %v828_v53, %v826_v52 }
 0x310   :  { %1513 = vmatprep.subr.bf16.mxu0 %v1512_v57  ;;  %v1552_v57 = vpack.c.bf16 %v833_v55, %v831_v54  ;;  %v1216_v54 = vld [vmem:[%s2059_s8] ss:$0 sm:$0xff] }
 0x313   :  { %1515 = vmatpush1.bf16.msra.mxu0 %v1514_v48  ;;  %v1554_v48 = vpack.c.bf16 %v832_v59, %v830_v58 }
 0x314   :  { %1517 = vmatprep.subr.bf16.mxu0 %v1516_v61  ;;  %v1556_v61 = vpack.c.bf16 %v837_v60, %v835_v38 }
 0x317   :  { %1519 = vmatpush1.bf16.msra.mxu0 %v1518_v2  ;;  %v1006_v2 = vld [vmem:[#allocation9 + $0x60] sm:$0xff] }
 0x318   :  { %1521 = vmatprep.subr.bf16.mxu0 %v1520_v3  ;;  %v1007_v3 = vld [vmem:[#allocation9 + $0x68] sm:$0xff] }
 0x319   :  { %v1586_v4 = vpack.c.bf16 %v1007_v3, %v1006_v2 }
 0x31b   :  { %1523 = vmatpush1.bf16.msra.mxu0 %v1522_v39  ;;  %1587 = vmatpush3.bf16.msra.mxu1 %v1586_v4  ;;  %v1008_v39 = vld [vmem:[#allocation9 + $0x70] sm:$0xff] }
 0x31c   :  { %1525 = vmatprep.subr.bf16.mxu0 %v1524_v49  ;;  %v1009_v49 = vld [vmem:[#allocation9 + $0x78] sm:$0xff]  ;;  %1589 = vmatprep.subr.bf16.mxu1 %v1588_v7 }
 0x31d   :  { %v1590_v8 = vpack.c.bf16 %v1009_v49, %v1008_v39 }
 0x31f   :  { %1527 = vmatpush1.bf16.msra.mxu0 %v1526_v14  ;;  %1591 = vmatpush3.bf16.msra.mxu1 %v1590_v8 }
 0x320   :  { %1529 = vmatprep.subr.bf16.mxu0 %v1528_v15  ;;  %1592 = vmatprep.subr.bf16.mxu1 %v1825_v10 }
 0x323   :  { %1531 = vmatpush1.bf16.msra.mxu0 %v1530_v22 }
 0x324   :  { %1533 = vmatprep.subr.bf16.mxu0 %v1532_v24  ;;  %v1593_v24 = vpack.c.bf16 %v1105_v18, %v1104_v17 }
 0x327   :  { %1535 = vmatpush1.bf16.msra.mxu0 %v1534_v32  ;;  %v1109_v32 = vld [vmem:[#allocation11 + $0x28] sm:$0xff] }
 0x328   :  { %1537 = vmatprep.subr.bf16.mxu0 %v1536_v33  ;;  %v1599_v27 = vpack.c.bf16 %v1109_v32, %v1108_v9  ;;  %v1111_v33 = vld [vmem:[#allocation11 + $0x38] sm:$0xff] }
 0x329   :  { %v1602_v34 = vpack.c.bf16 %v1111_v33, %v1110_v12 }
 0x32b   :  { %1539 = vmatpush1.bf16.msra.mxu0 %v1538_v40  ;;  %v1114_v40 = vld [vmem:[#allocation11 + $0x50] sm:$0xff] }
 0x32c   :  { %1541 = vmatprep.subr.bf16.mxu0 %v1540_v41  ;;  %v1115_v41 = vld [vmem:[#allocation11 + $0x58] sm:$0xff] }
 0x32d   :  { %v1608_v42 = vpack.c.bf16 %v1115_v41, %v1114_v40 }
 0x32f   :  { %1543 = vmatpush1.bf16.msra.mxu0 %v1542_v45  ;;  %v1118_v45 = vld [vmem:[#allocation11 + $0x70] sm:$0xff] }
 0x330   :  { %1545 = vmatprep.subr.bf16.mxu0 %v1544_v28  ;;  %v1119_v28 = vld [vmem:[#allocation11 + $0x78] sm:$0xff] }
 0x331   :  { %v1614_v46 = vpack.c.bf16 %v1119_v28, %v1118_v45 }
 0x333   :  { %1547 = vmatpush1.bf16.msra.mxu0 %v1546_v51 }
 0x334   :  { %1549 = vmatprep.subr.bf16.mxu0 %v1548_v20 }
 0x337   :  { %1551 = vmatpush1.bf16.msra.mxu0 %v1550_v56 }
 0x338   :  { %1553 = vmatprep.subr.bf16.mxu0 %v1552_v57 }
 0x33b   :  { %1555 = vmatpush1.bf16.msra.mxu0 %v1554_v48 }
 0x33c   :  { %1557 = vmatprep.subr.bf16.mxu0 %v1556_v61 }
 0x33f   :  { %1559 = vmatpush1.bf16.msra.mxu0 %v1558_v0 }
 0x342   :  { %986 = vmatmul.mubr.f32.vlgmr.msra.gmra.mrb[2].mxu0 %v708_v1 }
 0x415   :  { %v987_v14 = vpop.f32.mrb[2].mxu0 }
 0x416   :  { %v1616_v15 = vadd.f32 %v987_v14, %v843_v23  ;;  %v989_v16 = vpop.f32.mrb[3].mxu0 }
 0x417   :  { %v1617_v19 = vadd.f32 %v989_v16, %v847_v13 }
 0x418   :  { %v992_v25 = vmax.f32 %v1616_v15, 0.0 }
 0x419   :  { %v993_v22 = vmax.f32 %v1617_v19, 0.0 }
 0x41b   :  { %1097 = vmatprep.mubr.f32.mxu1 %v993_v22 }
 0x41c   :  { %1098 = vmatmul.mubr.f32.vlgmr.msra.gmra.mrb[2].mxu1 %v992_v25 }
 0x41d   :  { %1594 = vmatpush3.bf16.msra.mxu1 %v1593_v24  ;;  %1301 = vmatprep.mubr.msk.f32.mxu1 %vm1826_vm3, %v1827_v29 }
 0x41e   :  { %1595 = vmatprep.subr.bf16.mxu1 %v1825_v10 }
 0x421   :  { %1597 = vmatpush3.bf16.msra.mxu1 %v1596_v31 }
 0x422   :  { %1598 = vmatprep.subr.bf16.mxu1 %v1825_v10 }
 0x425   :  { %1600 = vmatpush3.bf16.msra.mxu1 %v1599_v27 }
 0x426   :  { %1601 = vmatprep.subr.bf16.mxu1 %v1825_v10 }
 0x429   :  { %1603 = vmatpush3.bf16.msra.mxu1 %v1602_v34 }
 0x42a   :  { %1604 = vmatprep.subr.bf16.mxu1 %v1825_v10 }
 0x42d   :  { %1606 = vmatpush3.bf16.msra.mxu1 %v1605_v37 }
 0x42e   :  { %1607 = vmatprep.subr.bf16.mxu1 %v1825_v10 }
 0x431   :  { %1609 = vmatpush3.bf16.msra.mxu1 %v1608_v42 }
 0x432   :  { %1610 = vmatprep.subr.bf16.mxu1 %v1825_v10 }
 0x435   :  { %1612 = vmatpush3.bf16.msra.mxu1 %v1611_v44 }
 0x436   :  { %1613 = vmatprep.subr.bf16.mxu1 %v1825_v10 }
 0x439   :  { %1615 = vmatpush3.bf16.msra.mxu1 %v1614_v46 }
 0x4ef   :  { %v1249_v47 = vpop.f32.mrb[2].mxu1 }
 0x4f0   :  { %v1250_v51 = vpop.f32.mrb[3].mxu1 }
 0x4f1   :  { %v1251_v20 = vadd.f32 %v1250_v51, %v1249_v47 }
 0x4f3   :  { %v1100_v52 = vadd.f32 %v1251_v20, %v1215_v50 }
 0x4f5   :  { %v1103_v53 = vmax.f32 %v1100_v52, 0.0 }
 0x4f7   :  { %1302 = vmatmul.mubr.f32.vlgmr.msra.gmra.mrb[4].mxu1 %v1103_v53 }
 0x5ca   :  { %v1193_v55 = vpop.f32.mrb[4].mxu1 }
 0x5cb   :  { %v1194_v56 = vadd.f32 %v1216_v54, %v1193_v55  ;;  %v1303_v57 = vpop.f32.mrb[5].mxu1 }
 0x5cd   :  { %1197 = vst [vmem:[#allocation12] sm:$0xff] %v1194_v56 }
 0x5ce   :  { %1791 = shalt.err (!%p1788_p2)
}
 0x5cf   :  { %s1792_s18 = scalar_lea.hbm %s2060_s9, 128 }
 0x5d0   :  { %p1793_p3 = scmp.ne.s32.totalorder %s2060_s9, %s1792_s18  ;;  %p1796_p4 = scmp.lt.u32.totalorder %s1792_s18, %s2060_s9 }
 0x5d2   :  { %p1798_p5 = pnand %p1796_p4, %p1793_p3 }
 0x5d4   :  { %1801 = shalt.err (!%p1798_p5)
}
 0x5d5   :  { %1207 = dma.vmem_to_hbm [thread:$0]  %s1205_s17, 128, %s2060_s9, [#allocation5]  }
 0x5d6   :  { %1808 = dma.done.wait [#allocation5], 128  }
 0x5d7   :  { %1809 = vsyncadd [#allocation5], 4294967168 }
 0x5d8   :  { %1211 = vsyncpa [#allocation4], 1 }
 0x5d9   :  { %1212 = vsyncpa [#allocation7], 1 }
 0x5da   :  { %1213 = vsyncpa [#allocation10], 1 }
 0x5db   :  { %1214 = vsyncpa [#allocation5], 1 }

// kernel: tpu_custom_call.1
= control target key start
LH: loop header
LB: loop body
LE: loop exit
PB: predicated region body
PF: predicated region fallthrough
CT: control target
= control target key end

     0   :  { %14 = vsyncpa [#allocation4], 0  ;;  %s2051_s0 = inlined_call_operand.hbm [shape: f32[8,8,32], index: 0, kind: input, shape index: {}]   ;;  %s2052_s1 = inlined_call_operand.hbm [shape: f32[256,512], index: 1, kind: input, shape index: {}]   ;;  %s2053_s2 = inlined_call_operand.vmem [shape: f32[1,512], index: 2, kind: input, shape index: {}]   ;;  %s2054_s3 = inlined_call_operand.hbm [shape: f32[512,256], index: 3, kind: input, shape index: {}]   ;;  %s2055_s4 = inlined_call_operand.vmem [shape: f32[1,256], index: 4, kind: input, shape index: {}]   ;;  %s2056_s5 = inlined_call_operand.hbm [shape: f32[256,128], index: 5, kind: input, shape index: {}]   ;;  %s2057_s6 = inlined_call_operand.vmem [shape: f32[1,128], index: 6, kind: input, shape index: {}]   ;;  %s2058_s7 = inlined_call_operand.hbm [shape: f32[128,128], index: 7, kind: input, shape index: {}]   ;;  %s2059_s8 = inlined_call_operand.vmem [shape: f32[1,128], index: 8, kind: input, shape index: {}]   ;;  %s2060_s9 = inlined_call_operand.hbm [shape: f32[8,128], index: 9, kind: output, shape index: {}]  }
   0x1   :  { %15 = vsyncpa [#allocation7], 0 }
   0x2   :  { %16 = vsyncpa [#allocation10], 0 }
   0x3   :  { %17 = vsyncpa [#allocation5], 0  ;;  %s1810_s30 = smov [#allocation6]   ;;  %s1670_s13 = scalar_lea.hbm %s2052_s1, 16384 }
   0x4   :  { %s35_s10 = sshll.u32 %s1810_s30, 4  ;;  %p1671_p0 = scmp.ne.s32.totalorder %s2052_s1, %s1670_s13  ;;  %s36_s10 = int_to_ptr.vmem [resolvable:$true] %s35_s10 }
   0x5   :  { %p1674_p1 = scmp.lt.u32.totalorder %s1670_s13, %s2052_s1 }
   0x7   :  { %p1676_p2 = pnand %p1674_p1, %p1671_p0 }
   0x9   :  { %1679 = shalt.err (!%p1676_p2)
}
   0xa   :  { %s1680_s18 = scalar_lea.vmem %s36_s10, 16384  ;;  %p1685_p4 = scmp.lt.s32.totalorder %s36_s10, %s36_s10 }
   0xb   :  { %p1681_p3 = scmp.ne.s32.totalorder %s36_s10, %s1680_s18  ;;  %p1686_p5 = scmp.lt.s32.totalorder %s1680_s18, %s1680_s18 }
   0xd   :  { %p1687_p6 = por %p1686_p5, %p1685_p4 }
   0xf   :  { %p1688_p7 = pnand %p1687_p6, %p1681_p3 }
  0x11   :  { %1691 = shalt.err (!%p1688_p7)
}
  0x12   :  { %s1811_s19 = smov 512   ;;  %s1812_s20 = smov 32  }
  0x13   :  { %41 = dma.hbm_to_vmem [thread:$0]  %s2052_s1, 16384, %s36_s10, [#allocation7], %s1811_s19, %s1811_s19, %s1812_s20  }
  0x14   :  { %s1813_s23 = smov [#allocation9]   ;;  %s1814_s25 = smov [#allocation3]  }
  0x15   :  { %s63_s24 = sshll.u32 %s1813_s23, 4  ;;  %s23_s26 = sshll.u32 %s1814_s25, 4  ;;  %s64_s24 = int_to_ptr.vmem [resolvable:$true] %s63_s24  ;;  %s24_s26 = int_to_ptr.vmem [resolvable:$true] %s23_s26 }
  0x16   :  { %s1692_s29 = scalar_lea.hbm %s2056_s5, 4096 }
  0x17   :  { %p1693_p8 = scmp.ne.s32.totalorder %s2056_s5, %s1692_s29  ;;  %p1696_p9 = scmp.lt.u32.totalorder %s1692_s29, %s2056_s5 }
  0x19   :  { %p1698_p10 = pnand %p1696_p9, %p1693_p8 }
  0x1b   :  { %1701 = shalt.err (!%p1698_p10)
}
  0x1c   :  { %s1702_s1 = scalar_lea.vmem %s64_s24, 4096  ;;  %p1707_p12 = scmp.lt.s32.totalorder %s64_s24, %s64_s24 }
  0x1d   :  { %p1703_p11 = scmp.ne.s32.totalorder %s64_s24, %s1702_s1  ;;  %p1708_p13 = scmp.lt.s32.totalorder %s1702_s1, %s1702_s1 }
  0x1f   :  { %p1709_p0 = por %p1708_p13, %p1707_p12 }
  0x21   :  { %p1710_p1 = pnand %p1709_p0, %p1703_p11 }
  0x23   :  { %1713 = shalt.err (!%p1710_p1)
}
  0x24   :  { %s1815_s10 = smov 128   ;;  %s1816_s14 = smov 8  }
  0x25   :  { %69 = dma.hbm_to_vmem [thread:$0]  %s2056_s5, 4096, %s64_s24, [#allocation10], %s1815_s10, %s1815_s10, %s1816_s14  }
  0x26   :  { %s1714_s19 = scalar_lea.hbm %s2051_s0, 1024 }
  0x27   :  { %p1715_p2 = scmp.ne.s32.totalorder %s2051_s0, %s1714_s19  ;;  %p1718_p3 = scmp.lt.u32.totalorder %s1714_s19, %s2051_s0 }
  0x29   :  { %p1720_p4 = pnand %p1718_p3, %p1715_p2 }
  0x2b   :  { %1723 = shalt.err (!%p1720_p4)
}
  0x2c   :  { %s1724_s27 = scalar_lea.vmem %s24_s26, 1024  ;;  %p1729_p6 = scmp.lt.s32.totalorder %s24_s26, %s24_s26 }
  0x2d   :  { %p1725_p5 = scmp.ne.s32.totalorder %s24_s26, %s1724_s27  ;;  %p1730_p7 = scmp.lt.s32.totalorder %s1724_s27, %s1724_s27 }
  0x2f   :  { %p1731_p8 = por %p1730_p7, %p1729_p6 }
  0x31   :  { %p1732_p9 = pnand %p1731_p8, %p1725_p5 }
  0x33   :  { %1735 = shalt.err (!%p1732_p9)
}
  0x34   :  { %29 = dma.hbm_to_vmem [thread:$0]  %s2051_s0, 1024, %s24_s26, [#allocation4], %s1815_s10, %s1815_s10, %s1816_s14  }
  0x35   :  { %s1817_s28 = smov [#allocation8]   ;;  %s1736_s12 = scalar_lea.hbm %s2054_s3, 16384 }
  0x36   :  { %s49_s29 = sshll.u32 %s1817_s28, 4  ;;  %p1737_p10 = scmp.ne.s32.totalorder %s2054_s3, %s1736_s12  ;;  %s50_s29 = int_to_ptr.vmem [resolvable:$true] %s49_s29 }
  0x37   :  { %p1740_p11 = scmp.lt.u32.totalorder %s1736_s12, %s2054_s3 }
  0x39   :  { %p1742_p12 = pnand %p1740_p11, %p1737_p10 }
  0x3b   :  { %1745 = shalt.err (!%p1742_p12)
}
  0x3c   :  { %s1746_s17 = scalar_lea.vmem %s50_s29, 16384  ;;  %p1751_p0 = scmp.lt.s32.totalorder %s50_s29, %s50_s29 }
  0x3d   :  { %p1747_p13 = scmp.ne.s32.totalorder %s50_s29, %s1746_s17  ;;  %p1752_p1 = scmp.lt.s32.totalorder %s1746_s17, %s1746_s17 }
  0x3f   :  { %p1753_p2 = por %p1752_p1, %p1751_p0 }
  0x41   :  { %p1754_p3 = pnand %p1753_p2, %p1747_p13 }
  0x43   :  { %1757 = shalt.err (!%p1754_p3)
}
  0x44   :  { %s1818_s0 = smov 256   ;;  %s1819_s26 = smov 16  }
  0x45   :  { %55 = dma.hbm_to_vmem [thread:$0]  %s2054_s3, 16384, %s50_s29, [#allocation7], %s1818_s0, %s1818_s0, %s1819_s26  }
  0x46   :  { %s1820_s21 = smov [#allocation11]   ;;  %s1758_s27 = scalar_lea.hbm %s2058_s7, 2048 }
  0x47   :  { %s77_s22 = sshll.u32 %s1820_s21, 4  ;;  %p1759_p4 = scmp.ne.s32.totalorder %s2058_s7, %s1758_s27  ;;  %s78_s22 = int_to_ptr.vmem [resolvable:$true] %s77_s22 }
  0x48   :  { %p1762_p5 = scmp.lt.u32.totalorder %s1758_s27, %s2058_s7 }
  0x4a   :  { %p1764_p6 = pnand %p1762_p5, %p1759_p4 }
  0x4c   :  { %1767 = shalt.err (!%p1764_p6)
}
  0x4d   :  { %s1768_s11 = scalar_lea.vmem %s78_s22, 2048  ;;  %p1773_p8 = scmp.lt.s32.totalorder %s78_s22, %s78_s22 }
  0x4e   :  { %p1769_p7 = scmp.ne.s32.totalorder %s78_s22, %s1768_s11  ;;  %p1774_p9 = scmp.lt.s32.totalorder %s1768_s11, %s1768_s11 }
  0x50   :  { %p1775_p10 = por %p1774_p9, %p1773_p8 }
  0x52   :  { %p1776_p11 = pnand %p1775_p10, %p1769_p7 }
  0x54   :  { %1779 = shalt.err (!%p1776_p11)
}
  0x55   :  { %83 = dma.hbm_to_vmem [thread:$0]  %s2058_s7, 2048, %s78_s22, [#allocation10], %s1815_s10, %s1815_s10, %s1816_s14  }
  0x56   :  { %1802 = dma.done.wait [#allocation4], 1024  }
  0x57   :  { %1803 = vsyncadd [#allocation4], 4294966272 }
  0x58   :  { %1804 = dma.done.wait [#allocation7], 32768  }
  0x59   :  { %1805 = vsyncadd [#allocation7], 4294934528 }
  0x5a   :  { %1806 = dma.done.wait [#allocation10], 6144  }
  0x5b   :  { %1807 = vsyncadd [#allocation10], 4294961152  ;;  %vm117_vm0 = vcmask 261120   ;;  %v109_v0 = vld [vmem:[#allocation3] sm:$0xff]  ;;  %v111_v1 = vld [vmem:[#allocation3 + $0x10] sm:$0xff]  ;;  %s1823_s7 = smov 64  }
  0x5c   :  { %v110_v2 = vld [vmem:[#allocation3 + $0x8] sm:$0xff]  ;;  %v118_v3 = vsel %vm117_vm0, %v109_v0, 0.0  ;;  %v124_v4 = vsel %vm117_vm0, %v111_v1, 0.0  ;;  %v112_v5 = vld [vmem:[#allocation3 + $0x18] sm:$0xff]  ;;  %v113_v8 = vld [vmem:[#allocation3 + $0x20] sm:$0xff]  ;;  %s1824_s10 = smov 96  }
  0x5d   :  { %119 = vadd.xlane.f32.xlu0 %v118_v3  ;;  %125 = vadd.xlane.f32.xlu1 %v124_v4  ;;  %v121_v6 = vsel %vm117_vm0, %v110_v2, 0.0  ;;  %v127_v7 = vsel %vm117_vm0, %v112_v5, 0.0  ;;  %v114_v9 = vld [vmem:[#allocation3 + $0x28] sm:$0xff]  ;;  %v130_v10 = vsel %vm117_vm0, %v113_v8, 0.0  ;;  %v115_v12 = vld [vmem:[#allocation3 + $0x30] sm:$0xff]  ;;  %v116_v13 = vld [vmem:[#allocation3 + $0x38] sm:$0xff] }
  0x5e   :  { %v133_v11 = vsel %vm117_vm0, %v114_v9, 0.0  ;;  %v136_v14 = vsel %vm117_vm0, %v115_v12, 0.0  ;;  %v139_v15 = vsel %vm117_vm0, %v116_v13, 0.0  ;;  %v396_v56 = vld [vmem:[#allocation6 + $0x8] sm:$0xff]  ;;  %v398_v58 = vld [vmem:[#allocation6 + $0x18] sm:$0xff]  ;;  %v395_v61 = vld [vmem:[#allocation6] sm:$0xff] }
  0x5f   :  { %v400_v57 = vld [vmem:[#allocation6 + $0x28] sm:$0xff]  ;;  %v402_v60 = vld [vmem:[#allocation6 + $0x38] sm:$0xff]  ;;  %v399_v62 = vld [vmem:[#allocation6 + $0x20] sm:$0xff]  ;;  %vm384_vm1 = vcmask 523264   ;;  %vm386_vm2 = vcmask 785408   ;;  %vm1826_vm3 = vmmov 0  }
  0x60   :  { %v1304_v59 = vpack.c.bf16 %v400_v57, %v396_v56  ;;  %v1368_v63 = vpack.c.bf16 %v402_v60, %v398_v58  ;;  %v404_v3 = vld [vmem:[#allocation6 + $0x48] sm:$0xff]  ;;  %v433_v57 = vld [vmem:[#allocation6 + $0x130] sm:$0xff]  ;;  %v438_v60 = vld [vmem:[#allocation6 + $0x158] sm:$0xff]  ;;  %s1828_s16 = smov [#allocation12]  }
  0x61   :  { %122 = vadd.xlane.f32.xlu0 %v121_v6  ;;  %128 = vadd.xlane.f32.xlu1 %v127_v7  ;;  %v406_v6 = vld [vmem:[#allocation6 + $0x58] sm:$0xff]  ;;  %v436_v58 = vld [vmem:[#allocation6 + $0x148] sm:$0xff]  ;;  %s1204_s17 = sshll.u32 %s1828_s16, 4  ;;  %s1205_s17 = int_to_ptr.vmem [resolvable:$true] %s1204_s17 }
  0x62   :  { %1305 = vmatprep.subr.bf16.mxu0 %v1304_v59  ;;  %v410_v7 = vld [vmem:[#allocation6 + $0x78] sm:$0xff]  ;;  %1369 = vmatprep.subr.bf16.mxu1 %v1368_v63  ;;  %v440_v59 = vld [vmem:[#allocation6 + $0x168] sm:$0xff]  ;;  %s1780_s0 = scalar_lea.vmem %s1205_s17, 128  ;;  %p1785_p13 = scmp.lt.s32.totalorder %s1205_s17, %s1205_s17 }
  0x63   :  { %p1781_p12 = scmp.ne.s32.totalorder %s1205_s17, %s1780_s0  ;;  %p1786_p0 = scmp.lt.s32.totalorder %s1780_s0, %s1780_s0 }
  0x65   :  { %131 = vadd.xlane.f32.xlu0 %v130_v10  ;;  %134 = vadd.xlane.f32.xlu1 %v133_v11  ;;  %v403_v10 = vld [vmem:[#allocation6 + $0x40] sm:$0xff]  ;;  %p1787_p1 = por %p1786_p0, %p1785_p13 }
  0x66   :  { %v407_v11 = vld [vmem:[#allocation6 + $0x60] sm:$0xff] }
  0x67   :  { %p1788_p2 = pnand %p1787_p1, %p1781_p12 }
  0x69   :  { %137 = vadd.xlane.f32.xlu0 %v136_v14  ;;  %140 = vadd.xlane.f32.xlu1 %v139_v15  ;;  %v409_v14 = vld [vmem:[#allocation6 + $0x70] sm:$0xff]  ;;  %v412_v15 = vld [vmem:[#allocation6 + $0x88] sm:$0xff] }
  0xea   :  { %v120_v16 = vpop.xlane.xlu0 %119  ;;  %v126_v17 = vpop.xlane.xlu1 %125 }
  0xeb   :  { %v143_v18 = vmul.f32 0.03125, %v120_v16  ;;  %v145_v19 = vmul.f32 0.03125, %v126_v17  ;;  %v416_v16 = vld [vmem:[#allocation6 + $0xa8] sm:$0xff] }
  0xed   :  { %v1957_v20 = vsub.f32 %v109_v0, %v143_v18  ;;  %v1959_v21 = vsub.f32 %v111_v1, %v145_v19  ;;  %v1306_v0 = vpack.c.bf16 %v399_v62, %v395_v61  ;;  %v397_v1 = vld [vmem:[#allocation6 + $0x10] sm:$0xff]  ;;  %v1312_v18 = vpack.c.bf16 %v416_v16, %v412_v15  ;;  %v414_v19 = vld [vmem:[#allocation6 + $0x98] sm:$0xff] }
  0xee   :  { %v123_v22 = vpop.xlane.xlu0 %122  ;;  %v129_v23 = vpop.xlane.xlu1 %128  ;;  %v442_v61 = vld [vmem:[#allocation6 + $0x178] sm:$0xff]  ;;  %v445_v15 = vld [vmem:[#allocation6 + $0x190] sm:$0xff] }
  0xef   :  { %v144_v24 = vmul.f32 0.03125, %v123_v22  ;;  %v146_v25 = vmul.f32 0.03125, %v129_v23  ;;  %v159_v26 = vmul.f32 %v1957_v20, %v1957_v20  ;;  %v161_v27 = vmul.f32 %v1959_v21, %v1959_v21  ;;  %1307 = vmatpush1.bf16.msra.mxu0 %v1306_v0  ;;  %v418_v22 = vld [vmem:[#allocation6 + $0xb8] sm:$0xff]  ;;  %v411_v23 = vld [vmem:[#allocation6 + $0x80] sm:$0xff] }
  0xf0   :  { %v1324_v0 = vpack.c.bf16 %v440_v59, %v436_v58  ;;  %v471_v58 = vld [vmem:[#allocation6 + $0x260] sm:$0xff]  ;;  %v469_v59 = vld [vmem:[#allocation6 + $0x250] sm:$0xff] }
  0xf1   :  { %v1965_v28 = vsub.f32 %v110_v2, %v144_v24  ;;  %v1967_v29 = vsub.f32 %v112_v5, %v146_v25  ;;  %v167_v30 = vsel %vm117_vm0, %v159_v26, 0.0  ;;  %v173_v33 = vsel %vm117_vm0, %v161_v27, 0.0  ;;  %v401_v2 = vld [vmem:[#allocation6 + $0x30] sm:$0xff]  ;;  %v408_v5 = vld [vmem:[#allocation6 + $0x68] sm:$0xff]  ;;  %v415_v25 = vld [vmem:[#allocation6 + $0xa0] sm:$0xff] }
  0xf2   :  { %168 = vadd.xlane.f32.xlu0 %v167_v30  ;;  %v132_v31 = vpop.xlane.xlu0 %131  ;;  %v135_v32 = vpop.xlane.xlu1 %134  ;;  %v1370_v4 = vpack.c.bf16 %v401_v2, %v397_v1  ;;  %v1376_v24 = vpack.c.bf16 %v418_v22, %v414_v19  ;;  %v413_v26 = vld [vmem:[#allocation6 + $0x90] sm:$0xff]  ;;  %v1314_v30 = vpack.c.bf16 %v415_v25, %v411_v23  ;;  %v435_v1 = vld [vmem:[#allocation6 + $0x140] sm:$0xff]  ;;  %v456_v19 = vld [vmem:[#allocation6 + $0x1e8] sm:$0xff] }
  0xf3   :  { %v147_v34 = vmul.f32 0.03125, %v132_v31  ;;  %v148_v35 = vmul.f32 0.03125, %v135_v32  ;;  %v160_v36 = vmul.f32 %v1965_v28, %v1965_v28  ;;  %v162_v37 = vmul.f32 %v1967_v29, %v1967_v29  ;;  %v417_v27 = vld [vmem:[#allocation6 + $0xb0] sm:$0xff]  ;;  %v420_v31 = vld [vmem:[#allocation6 + $0xc8] sm:$0xff]  ;;  %v439_v2 = vld [vmem:[#allocation6 + $0x160] sm:$0xff] }
  0xf4   :  { %1371 = vmatpush1.bf16.msra.mxu1 %v1370_v4  ;;  %v424_v32 = vld [vmem:[#allocation6 + $0xe8] sm:$0xff]  ;;  %v1388_v4 = vpack.c.bf16 %v442_v61, %v438_v60  ;;  %v454_v22 = vld [vmem:[#allocation6 + $0x1d8] sm:$0xff]  ;;  %v473_v61 = vld [vmem:[#allocation6 + $0x270] sm:$0xff] }
  0xf5   :  { %v1975_v38 = vsub.f32 %v113_v8, %v147_v34  ;;  %v1977_v39 = vsub.f32 %v114_v9, %v148_v35  ;;  %v170_v40 = vsel %vm117_vm0, %v160_v36, 0.0  ;;  %v176_v43 = vsel %vm117_vm0, %v162_v37, 0.0  ;;  %v426_v36 = vld [vmem:[#allocation6 + $0xf8] sm:$0xff]  ;;  %v419_v37 = vld [vmem:[#allocation6 + $0xc0] sm:$0xff] }
  0xf6   :  { %174 = vadd.xlane.f32.xlu0 %v173_v33  ;;  %171 = vadd.xlane.f32.xlu1 %v170_v40  ;;  %v138_v41 = vpop.xlane.xlu0 %137  ;;  %v141_v42 = vpop.xlane.xlu1 %140  ;;  %v1308_v8 = vpack.c.bf16 %v408_v5, %v404_v3  ;;  %v1372_v9 = vpack.c.bf16 %v410_v7, %v406_v6  ;;  %v422_v33 = vld [vmem:[#allocation6 + $0xd8] sm:$0xff]  ;;  %v1378_v34 = vpack.c.bf16 %v417_v27, %v413_v26  ;;  %v423_v40 = vld [vmem:[#allocation6 + $0xe0] sm:$0xff]  ;;  %v437_v3 = vld [vmem:[#allocation6 + $0x150] sm:$0xff] }
  0xf7   :  { %v149_v44 = vmul.f32 0.03125, %v138_v41  ;;  %v150_v45 = vmul.f32 0.03125, %v141_v42  ;;  %v163_v46 = vmul.f32 %v1975_v38, %v1975_v38  ;;  %v164_v47 = vmul.f32 %v1977_v39, %v1977_v39  ;;  %v421_v42 = vld [vmem:[#allocation6 + $0xd0] sm:$0xff]  ;;  %v444_v6 = vld [vmem:[#allocation6 + $0x188] sm:$0xff]  ;;  %v458_v23 = vld [vmem:[#allocation6 + $0x1f8] sm:$0xff] }
  0xf8   :  { %1309 = vmatprep.subr.bf16.mxu0 %v1308_v8  ;;  %1373 = vmatprep.subr.bf16.mxu1 %v1372_v9  ;;  %v1316_v35 = vpack.c.bf16 %v424_v32, %v420_v31  ;;  %v1380_v41 = vpack.c.bf16 %v426_v36, %v422_v33  ;;  %v441_v5 = vld [vmem:[#allocation6 + $0x170] sm:$0xff]  ;;  %v448_v7 = vld [vmem:[#allocation6 + $0x1a8] sm:$0xff]  ;;  %v446_v8 = vld [vmem:[#allocation6 + $0x198] sm:$0xff]  ;;  %v1396_v32 = vpack.c.bf16 %v458_v23, %v454_v22 }
  0xf9   :  { %v1985_v48 = vsub.f32 %v115_v12, %v149_v44  ;;  %v1987_v49 = vsub.f32 %v116_v13, %v150_v45  ;;  %v179_v50 = vsel %vm117_vm0, %v163_v46, 0.0  ;;  %v182_v51 = vsel %vm117_vm0, %v164_v47, 0.0  ;;  %v405_v12 = vld [vmem:[#allocation6 + $0x50] sm:$0xff]  ;;  %v428_v44 = vld [vmem:[#allocation6 + $0x108] sm:$0xff]  ;;  %v430_v46 = vld [vmem:[#allocation6 + $0x118] sm:$0xff] }
  0xfa   :  { %177 = vadd.xlane.f32.xlu1 %v176_v43  ;;  %180 = vadd.xlane.f32.xlu0 %v179_v50  ;;  %v1310_v13 = vpack.c.bf16 %v407_v11, %v403_v10  ;;  %v1374_v17 = vpack.c.bf16 %v409_v14, %v405_v12  ;;  %v425_v43 = vld [vmem:[#allocation6 + $0xf0] sm:$0xff]  ;;  %v432_v45 = vld [vmem:[#allocation6 + $0x128] sm:$0xff]  ;;  %v434_v47 = vld [vmem:[#allocation6 + $0x138] sm:$0xff]  ;;  %v1318_v50 = vpack.c.bf16 %v423_v40, %v419_v37 }
  0xfb   :  { %v165_v52 = vmul.f32 %v1985_v48, %v1985_v48  ;;  %v166_v53 = vmul.f32 %v1987_v49, %v1987_v49  ;;  %v1384_v56 = vpack.c.bf16 %v434_v47, %v430_v46  ;;  %v450_v9 = vld [vmem:[#allocation6 + $0x1b8] sm:$0xff]  ;;  %v1326_v10 = vpack.c.bf16 %v439_v2, %v435_v1  ;;  %v447_v14 = vld [vmem:[#allocation6 + $0x1a0] sm:$0xff]  ;;  %v453_v31 = vld [vmem:[#allocation6 + $0x1d0] sm:$0xff] }
  0xfc   :  { %1311 = vmatpush1.bf16.msra.mxu0 %v1310_v13  ;;  %1375 = vmatpush1.bf16.msra.mxu1 %v1374_v17  ;;  %v1390_v11 = vpack.c.bf16 %v441_v5, %v437_v3  ;;  %v1328_v12 = vpack.c.bf16 %v448_v7, %v444_v6  ;;  %v443_v13 = vld [vmem:[#allocation6 + $0x180] sm:$0xff]  ;;  %v1392_v16 = vpack.c.bf16 %v450_v9, %v446_v8  ;;  %v449_v17 = vld [vmem:[#allocation6 + $0x1b0] sm:$0xff]  ;;  %v462_v36 = vld [vmem:[#allocation6 + $0x218] sm:$0xff] }
  0xfd   :  { %v185_v54 = vsel %vm117_vm0, %v165_v52, 0.0  ;;  %v188_v55 = vsel %vm117_vm0, %v166_v53, 0.0  ;;  %1313 = vmatprep.subr.bf16.mxu0 %v1312_v18  ;;  %1377 = vmatprep.subr.bf16.mxu1 %v1376_v24  ;;  %v1320_v52 = vpack.c.bf16 %v432_v45, %v428_v44  ;;  %v427_v53 = vld [vmem:[#allocation6 + $0x100] sm:$0xff]  ;;  %v452_v18 = vld [vmem:[#allocation6 + $0x1c8] sm:$0xff]  ;;  %v1330_v24 = vpack.c.bf16 %v447_v14, %v443_v13  ;;  %v457_v33 = vld [vmem:[#allocation6 + $0x1f0] sm:$0xff] }
  0xfe   :  { %183 = vadd.xlane.f32.xlu1 %v182_v51  ;;  %186 = vadd.xlane.f32.xlu0 %v185_v54  ;;  %v1382_v51 = vpack.c.bf16 %v425_v43, %v421_v42  ;;  %v431_v54 = vld [vmem:[#allocation6 + $0x120] sm:$0xff]  ;;  %v1394_v25 = vpack.c.bf16 %v449_v17, %v445_v15  ;;  %v1332_v26 = vpack.c.bf16 %v456_v19, %v452_v18  ;;  %v466_v37 = vld [vmem:[#allocation6 + $0x238] sm:$0xff]  ;;  %v461_v45 = vld [vmem:[#allocation6 + $0x210] sm:$0xff] }
  0xff   :  { %v1322_v62 = vpack.c.bf16 %v431_v54, %v427_v53  ;;  %v451_v27 = vld [vmem:[#allocation6 + $0x1c0] sm:$0xff]  ;;  %v1400_v46 = vpack.c.bf16 %v466_v37, %v462_v36  ;;  %v465_v47 = vld [vmem:[#allocation6 + $0x230] sm:$0xff]  ;;  %v474_v53 = vld [vmem:[#allocation6 + $0x278] sm:$0xff]  ;;  %v1406_v3 = vpack.c.bf16 %v473_v61, %v469_v59 }
 0x100   :  { %1315 = vmatpush1.bf16.msra.mxu0 %v1314_v30  ;;  %1379 = vmatpush1.bf16.msra.mxu1 %v1378_v34  ;;  %v455_v30 = vld [vmem:[#allocation6 + $0x1e0] sm:$0xff]  ;;  %v460_v34 = vld [vmem:[#allocation6 + $0x208] sm:$0xff]  ;;  %v482_v1 = vld [vmem:[#allocation6 + $0x2b8] sm:$0xff] }
 0x101   :  { %1317 = vmatprep.subr.bf16.mxu0 %v1316_v35  ;;  %1381 = vmatprep.subr.bf16.mxu1 %v1380_v41  ;;  %v464_v35 = vld [vmem:[#allocation6 + $0x228] sm:$0xff]  ;;  %v1334_v40 = vpack.c.bf16 %v455_v30, %v451_v27  ;;  %v1398_v41 = vpack.c.bf16 %v457_v33, %v453_v31  ;;  %v459_v43 = vld [vmem:[#allocation6 + $0x200] sm:$0xff]  ;;  %v477_v7 = vld [vmem:[#allocation6 + $0x290] sm:$0xff] }
 0x102   :  { %189 = vadd.xlane.f32.xlu1 %v188_v55  ;;  %v429_v55 = vld [vmem:[#allocation6 + $0x110] sm:$0xff]  ;;  %v1336_v42 = vpack.c.bf16 %v464_v35, %v460_v34  ;;  %v463_v44 = vld [vmem:[#allocation6 + $0x220] sm:$0xff]  ;;  %v490_v13 = vld [vmem:[#allocation6 + $0x2f8] sm:$0xff] }
 0x103   :  { %v1386_v63 = vpack.c.bf16 %v433_v57, %v429_v55  ;;  %v1338_v54 = vpack.c.bf16 %v463_v44, %v459_v43  ;;  %v1402_v55 = vpack.c.bf16 %v465_v47, %v461_v45  ;;  %v467_v57 = vld [vmem:[#allocation6 + $0x240] sm:$0xff]  ;;  %v481_v9 = vld [vmem:[#allocation6 + $0x2b0] sm:$0xff]  ;;  %v498_v27 = vld [vmem:[#allocation6 + $0x338] sm:$0xff] }
 0x104   :  { %1319 = vmatpush1.bf16.msra.mxu0 %v1318_v50  ;;  %1383 = vmatpush1.bf16.msra.mxu1 %v1382_v51  ;;  %v468_v50 = vld [vmem:[#allocation6 + $0x248] sm:$0xff]  ;;  %v1342_v2 = vpack.c.bf16 %v471_v58, %v467_v57  ;;  %v475_v5 = vld [vmem:[#allocation6 + $0x280] sm:$0xff]  ;;  %v1410_v15 = vpack.c.bf16 %v481_v9, %v477_v7  ;;  %v485_v19 = vld [vmem:[#allocation6 + $0x2d0] sm:$0xff] }
 0x105   :  { %1321 = vmatprep.subr.bf16.mxu0 %v1320_v52  ;;  %1385 = vmatprep.subr.bf16.mxu1 %v1384_v56  ;;  %v472_v51 = vld [vmem:[#allocation6 + $0x268] sm:$0xff]  ;;  %v470_v52 = vld [vmem:[#allocation6 + $0x258] sm:$0xff]  ;;  %v479_v6 = vld [vmem:[#allocation6 + $0x2a0] sm:$0xff] }
 0x106   :  { %v1340_v56 = vpack.c.bf16 %v472_v51, %v468_v50  ;;  %v1404_v60 = vpack.c.bf16 %v474_v53, %v470_v52  ;;  %v1346_v14 = vpack.c.bf16 %v479_v6, %v475_v5  ;;  %v483_v17 = vld [vmem:[#allocation6 + $0x2c0] sm:$0xff]  ;;  %v489_v23 = vld [vmem:[#allocation6 + $0x2f0] sm:$0xff]  ;;  %v506_v43 = vld [vmem:[#allocation6 + $0x378] sm:$0xff] }
 0x107   :  { %v487_v18 = vld [vmem:[#allocation6 + $0x2e0] sm:$0xff]  ;;  %v1414_v31 = vpack.c.bf16 %v489_v23, %v485_v19  ;;  %v493_v35 = vld [vmem:[#allocation6 + $0x310] sm:$0xff] }
 0x108   :  { %1323 = vmatpush1.bf16.msra.mxu0 %v1322_v62  ;;  %1387 = vmatpush1.bf16.msra.mxu1 %v1386_v63  ;;  %v476_v62 = vld [vmem:[#allocation6 + $0x288] sm:$0xff]  ;;  %v1350_v30 = vpack.c.bf16 %v487_v18, %v483_v17  ;;  %v491_v33 = vld [vmem:[#allocation6 + $0x300] sm:$0xff]  ;;  %v497_v37 = vld [vmem:[#allocation6 + $0x330] sm:$0xff]  ;;  %v228_v18 = vlaneseq }
 0x109   :  { %1325 = vmatprep.subr.bf16.mxu0 %v1324_v0  ;;  %1389 = vmatprep.subr.bf16.mxu1 %v1388_v4  ;;  %v480_v63 = vld [vmem:[#allocation6 + $0x2a8] sm:$0xff]  ;;  %v478_v0 = vld [vmem:[#allocation6 + $0x298] sm:$0xff]  ;;  %v495_v34 = vld [vmem:[#allocation6 + $0x320] sm:$0xff]  ;;  %v1418_v45 = vpack.c.bf16 %v497_v37, %v493_v35 }
 0x10a   :  { %v1344_v4 = vpack.c.bf16 %v480_v63, %v476_v62  ;;  %v1408_v8 = vpack.c.bf16 %v482_v1, %v478_v0  ;;  %v1354_v44 = vpack.c.bf16 %v495_v34, %v491_v33  ;;  %v499_v47 = vld [vmem:[#allocation6 + $0x340] sm:$0xff]  ;;  %v501_v52 = vld [vmem:[#allocation6 + $0x350] sm:$0xff] }
 0x10b   :  { %v503_v50 = vld [vmem:[#allocation6 + $0x360] sm:$0xff]  ;;  %v505_v53 = vld [vmem:[#allocation6 + $0x370] sm:$0xff] }
 0x10c   :  { %1327 = vmatpush1.bf16.msra.mxu0 %v1326_v10  ;;  %1391 = vmatpush1.bf16.msra.mxu1 %v1390_v11  ;;  %v484_v10 = vld [vmem:[#allocation6 + $0x2c8] sm:$0xff] }
 0x10d   :  { %1329 = vmatprep.subr.bf16.mxu0 %v1328_v12  ;;  %1393 = vmatprep.subr.bf16.mxu1 %v1392_v16  ;;  %v488_v11 = vld [vmem:[#allocation6 + $0x2e8] sm:$0xff]  ;;  %v486_v12 = vld [vmem:[#allocation6 + $0x2d8] sm:$0xff] }
 0x10e   :  { %v1348_v16 = vpack.c.bf16 %v488_v11, %v484_v10  ;;  %v1412_v22 = vpack.c.bf16 %v490_v13, %v486_v12 }
 0x110   :  { %1331 = vmatpush1.bf16.msra.mxu0 %v1330_v24  ;;  %1395 = vmatpush1.bf16.msra.mxu1 %v1394_v25  ;;  %v492_v24 = vld [vmem:[#allocation6 + $0x308] sm:$0xff] }
 0x111   :  { %1333 = vmatprep.subr.bf16.mxu0 %v1332_v26  ;;  %1397 = vmatprep.subr.bf16.mxu1 %v1396_v32  ;;  %v496_v25 = vld [vmem:[#allocation6 + $0x328] sm:$0xff]  ;;  %v494_v26 = vld [vmem:[#allocation6 + $0x318] sm:$0xff] }
 0x112   :  { %v1352_v32 = vpack.c.bf16 %v496_v25, %v492_v24  ;;  %v1416_v36 = vpack.c.bf16 %v498_v27, %v494_v26  ;;  %v1998_v27 = vshrl.u32 %v228_v18, 7 }
 0x114   :  { %1335 = vmatpush1.bf16.msra.mxu0 %v1334_v40  ;;  %1399 = vmatpush1.bf16.msra.mxu1 %v1398_v41  ;;  %v500_v40 = vld [vmem:[#allocation6 + $0x348] sm:$0xff] }
 0x115   :  { %1337 = vmatprep.subr.bf16.mxu0 %v1336_v42  ;;  %1401 = vmatprep.subr.bf16.mxu1 %v1400_v46  ;;  %v504_v41 = vld [vmem:[#allocation6 + $0x368] sm:$0xff]  ;;  %v502_v42 = vld [vmem:[#allocation6 + $0x358] sm:$0xff] }
 0x116   :  { %v1356_v46 = vpack.c.bf16 %v504_v41, %v500_v40  ;;  %v1420_v51 = vpack.c.bf16 %v506_v43, %v502_v42 }
 0x118   :  { %1339 = vmatpush1.bf16.msra.mxu0 %v1338_v54  ;;  %1403 = vmatpush1.bf16.msra.mxu1 %v1402_v55  ;;  %v1358_v54 = vpack.c.bf16 %v503_v50, %v499_v47  ;;  %v1422_v55 = vpack.c.bf16 %v505_v53, %v501_v52  ;;  %v508_v53 = vld [vmem:[#allocation6 + $0x388] sm:$0xff] }
 0x119   :  { %1341 = vmatprep.subr.bf16.mxu0 %v1340_v56  ;;  %1405 = vmatprep.subr.bf16.mxu1 %v1404_v60 }
 0x11c   :  { %1343 = vmatpush1.bf16.msra.mxu0 %v1342_v2  ;;  %1407 = vmatpush1.bf16.msra.mxu1 %v1406_v3 }
 0x11d   :  { %1345 = vmatprep.subr.bf16.mxu0 %v1344_v4  ;;  %1409 = vmatprep.subr.bf16.mxu1 %v1408_v8 }
 0x120   :  { %1347 = vmatpush1.bf16.msra.mxu0 %v1346_v14  ;;  %1411 = vmatpush1.bf16.msra.mxu1 %v1410_v15 }
 0x121   :  { %1349 = vmatprep.subr.bf16.mxu0 %v1348_v16  ;;  %1413 = vmatprep.subr.bf16.mxu1 %v1412_v22  ;;  %v1821_v16 = vmov 1983009808  }
 0x122   :  { %v226_v17 = vunpack.c.l.s4 %v1821_v16  ;;  %v519_v16 = vld [vmem:[#allocation6 + $0x3e0] sm:$0xff] }
 0x124   :  { %1351 = vmatpush1.bf16.msra.mxu0 %v1350_v30  ;;  %1415 = vmatpush1.bf16.msra.mxu1 %v1414_v31  ;;  %v227_v26 = vunpack.c.0.s8 %v226_v17 }
 0x125   :  { %1353 = vmatprep.subr.bf16.mxu0 %v1352_v32  ;;  %1417 = vmatprep.subr.bf16.mxu1 %v1416_v36  ;;  %v1822_v32 = vmov 1934713408  }
 0x126   :  { %v290_v33 = vunpack.c.l.s4 %v1822_v32  ;;  %v230_v42 = vsub.s32 %v227_v26, %v1998_v27 }
 0x128   :  { %1355 = vmatpush1.bf16.msra.mxu0 %v1354_v44  ;;  %1419 = vmatpush1.bf16.msra.mxu1 %v1418_v45 }
 0x129   :  { %1357 = vmatprep.subr.bf16.mxu0 %v1356_v46  ;;  %1421 = vmatprep.subr.bf16.mxu1 %v1420_v51 }
 0x12c   :  { %1359 = vmatpush1.bf16.msra.mxu0 %v1358_v54  ;;  %1423 = vmatpush1.bf16.msra.mxu1 %v1422_v55  ;;  %v512_v54 = vld [vmem:[#allocation6 + $0x3a8] sm:$0xff]  ;;  %v510_v55 = vld [vmem:[#allocation6 + $0x398] sm:$0xff] }
 0x17f   :  { %v169_v56 = vpop.xlane.xlu0 %168 }
 0x180   :  { %v191_v57 = vmul.f32 0.03125, %v169_v56 }
 0x182   :  { %v199_v0 = vadd.f32 1e-05, %v191_v57 }
 0x183   :  { %v172_v58 = vpop.xlane.xlu1 %171  ;;  %v175_v59 = vpop.xlane.xlu0 %174 }
 0x184   :  { %v192_v60 = vmul.f32 0.03125, %v172_v58  ;;  %v193_v61 = vmul.f32 0.03125, %v175_v59  ;;  %v514_v59 = vld [vmem:[#allocation6 + $0x3b8] sm:$0xff] }
 0x186   :  { %v200_v62 = vadd.f32 1e-05, %v192_v60  ;;  %v201_v63 = vadd.f32 1e-05, %v193_v61  ;;  %v511_v60 = vld [vmem:[#allocation6 + $0x3a0] sm:$0xff] }
 0x187   :  { %v178_v1 = vpop.xlane.xlu1 %177  ;;  %v181_v2 = vpop.xlane.xlu0 %180 }
 0x188   :  { %v194_v3 = vmul.f32 0.03125, %v178_v1  ;;  %v195_v4 = vmul.f32 0.03125, %v181_v2  ;;  %1654 = vrsqrt.f32 %v201_v63  ;;  %v1360_v63 = vpack.c.bf16 %v512_v54, %v508_v53  ;;  %v513_v1 = vld [vmem:[#allocation6 + $0x3b0] sm:$0xff] }
 0x189   :  { %1656 = vrsqrt.f32 %v200_v62 }
 0x18a   :  { %v202_v5 = vadd.f32 1e-05, %v194_v3  ;;  %1658 = vrsqrt.f32 %v199_v0  ;;  %v203_v6 = vadd.f32 1e-05, %v195_v4  ;;  %v509_v0 = vld [vmem:[#allocation6 + $0x390] sm:$0xff]  ;;  %v1424_v4 = vpack.c.bf16 %v514_v59, %v510_v55  ;;  %1361 = vmatprep.subr.bf16.mxu0 %v1360_v63  ;;  %v710_v59 = vld [vmem:[#allocation8] sm:$0xff] }
 0x18b   :  { %v184_v7 = vpop.xlane.xlu1 %183  ;;  %v187_v8 = vpop.xlane.xlu0 %186  ;;  %v717_v63 = vld [vmem:[#allocation8 + $0x38] sm:$0xff] }
 0x18c   :  { %1660 = vrsqrt.f32 %v202_v5  ;;  %v196_v9 = vmul.f32 0.03125, %v184_v7  ;;  %v197_v10 = vmul.f32 0.03125, %v187_v8  ;;  %v516_v8 = vld [vmem:[#allocation6 + $0x3c8] sm:$0xff]  ;;  %1425 = vmatprep.subr.bf16.mxu1 %v1424_v4 }
 0x18d   :  { %1662 = vrsqrt.f32 %v203_v6 }
 0x18e   :  { %v204_v11 = vadd.f32 1e-05, %v196_v9  ;;  %v205_v12 = vadd.f32 1e-05, %v197_v10  ;;  %v520_v9 = vld [vmem:[#allocation6 + $0x3e8] sm:$0xff]  ;;  %v518_v10 = vld [vmem:[#allocation6 + $0x3d8] sm:$0xff] }
 0x18f   :  { %v190_v13 = vpop.xlane.xlu1 %189 }
 0x190   :  { %v198_v14 = vmul.f32 0.03125, %v190_v13  ;;  %1664 = vrsqrt.f32 %v205_v12  ;;  %v1364_v13 = vpack.c.bf16 %v520_v9, %v516_v8  ;;  %v719_v8 = vld [vmem:[#allocation8 + $0x48] sm:$0xff]  ;;  %v721_v9 = vld [vmem:[#allocation8 + $0x58] sm:$0xff] }
 0x191   :  { %1666 = vrsqrt.f32 %v204_v11 }
 0x192   :  { %v206_v15 = vadd.f32 1e-05, %v198_v14  ;;  %v1655_v19 = vpop.eup %1654  ;;  %v522_v14 = vld [vmem:[#allocation6 + $0x3f8] sm:$0xff] }
 0x193   :  { %v1657_v22 = vpop.eup %1656  ;;  %v217_v25 = vmul.f32 %v1655_v19, %v1959_v21  ;;  %v291_v21 = vunpack.c.0.s8 %v290_v33  ;;  %v1428_v18 = vpack.c.bf16 %v522_v14, %v518_v10  ;;  %v723_v14 = vld [vmem:[#allocation8 + $0x68] sm:$0xff] }
 0x194   :  { %1668 = vrsqrt.f32 %v206_v15  ;;  %v1659_v23 = vpop.eup %1658  ;;  %v216_v30 = vmul.f32 %v1657_v22, %v1965_v28  ;;  %v515_v15 = vld [vmem:[#allocation6 + $0x3c0] sm:$0xff]  ;;  %v517_v22 = vld [vmem:[#allocation6 + $0x3d0] sm:$0xff] }
 0x195   :  { %v215_v34 = vmul.f32 %v1659_v23, %v1957_v20  ;;  %v294_v58 = vsub.s32 %v291_v21, %v1998_v27  ;;  %v1366_v19 = vpack.c.bf16 %v519_v16, %v515_v15  ;;  %v521_v23 = vld [vmem:[#allocation6 + $0x3f0] sm:$0xff]  ;;  %v725_v15 = vld [vmem:[#allocation8 + $0x78] sm:$0xff] }
 0x196   :  { %v1661_v24 = vpop.eup %1660 }
 0x197   :  { %v218_v31 = vmul.f32 %v1661_v24, %v1967_v29  ;;  %v1663_v35 = vpop.eup %1662  ;;  %v223_v40 = vcombine.low %v215_v34, %v217_v25  ;;  %v224_v41 = vcombine.high %v215_v34, %v217_v25  ;;  %v1430_v34 = vpack.c.bf16 %v521_v23, %v517_v22  ;;  %v727_v22 = vld [vmem:[#allocation8 + $0x88] sm:$0xff]  ;;  %v729_v23 = vld [vmem:[#allocation8 + $0x98] sm:$0xff] }
 0x198   :  { %v219_v45 = vmul.f32 %v1663_v35, %v1975_v38  ;;  %v507_v38 = vld [vmem:[#allocation6 + $0x380] sm:$0xff] }
 0x199   :  { %v239_v36 = vcombine.low %v216_v30, %v218_v31  ;;  %v240_v37 = vcombine.high %v216_v30, %v218_v31  ;;  %v231_v50 = vrot.slane %v223_v40, %v230_v42  ;;  %v238_v51 = vrot.slane %v224_v41, %v230_v42  ;;  %v711_v41 = vld [vmem:[#allocation8 + $0x8] sm:$0xff] }
 0x19a   :  { %v1665_v43 = vpop.eup %1664  ;;  %v1362_v5 = vpack.c.bf16 %v511_v60, %v507_v38  ;;  %v712_v38 = vld [vmem:[#allocation8 + $0x10] sm:$0xff] }
 0x19b   :  { %v1667_v44 = vpop.eup %1666  ;;  %v221_v28 = vmul.f32 %v1665_v43, %v1985_v48  ;;  %v247_v46 = vrot.slane %v239_v36, %v230_v42  ;;  %v254_v29 = vrot.slane %v240_v37, %v230_v42  ;;  %v1434_v4 = vpack.c.bf16 %v712_v38, %v710_v59  ;;  %v746_v59 = vld [vmem:[#allocation8 + $0x120] sm:$0xff]  ;;  %v748_v38 = vld [vmem:[#allocation8 + $0x130] sm:$0xff] }
 0x19c   :  { %v220_v56 = vmul.f32 %v1667_v44, %v1977_v39  ;;  %1363 = vmatpush1.bf16.msra.mxu0 %v1362_v5 }
 0x19d   :  { %v255_v20 = vcombine.low %v219_v45, %v221_v28  ;;  %v256_v52 = vcombine.high %v219_v45, %v221_v28  ;;  %v288_v48 = vcombine.high %v231_v50, %v247_v46  ;;  %v304_v61 = vcombine.high %v238_v51, %v254_v29  ;;  %1365 = vmatprep.subr.bf16.mxu0 %v1364_v13  ;;  %v720_v13 = vld [vmem:[#allocation8 + $0x50] sm:$0xff] }
 0x19e   :  { %v1669_v47 = vpop.eup %1668  ;;  %v287_v62 = vcombine.low %v231_v50, %v247_v46  ;;  %v303_v39 = vcombine.low %v238_v51, %v254_v29 }
 0x19f   :  { %v222_v57 = vmul.f32 %v1669_v47, %v1987_v49  ;;  %v263_v6 = vrot.slane %v255_v20, %v230_v42  ;;  %v270_v7 = vrot.slane %v256_v52, %v230_v42  ;;  %v1426_v49 = vpack.c.bf16 %v513_v1, %v509_v0 }
 0x1a0   :  { %v302_v17 = vrot.slane %v288_v48, %v294_v58  ;;  %v318_v31 = vrot.slane %v304_v61, %v294_v58  ;;  %v295_v32 = vrot.slane %v287_v62, %v294_v58  ;;  %v311_v33 = vrot.slane %v303_v39, %v294_v58  ;;  %1367 = vmatpush1.bf16.msra.mxu0 %v1366_v19  ;;  %v715_v62 = vld [vmem:[#allocation8 + $0x28] sm:$0xff]  ;;  %v714_v39 = vld [vmem:[#allocation8 + $0x20] sm:$0xff]  ;;  %v724_v19 = vld [vmem:[#allocation8 + $0x70] sm:$0xff] }
 0x1a1   :  { %v271_v2 = vcombine.low %v220_v56, %v222_v57  ;;  %v272_v3 = vcombine.high %v220_v56, %v222_v57  ;;  %1427 = vmatpush1.bf16.msra.mxu1 %v1426_v49  ;;  %v716_v49 = vld [vmem:[#allocation8 + $0x30] sm:$0xff] }
 0x1a2   :  { %1429 = vmatprep.subr.bf16.mxu1 %v1428_v18  ;;  %v1438_v10 = vpack.c.bf16 %v716_v49, %v714_v39  ;;  %v722_v18 = vld [vmem:[#allocation8 + $0x60] sm:$0xff]  ;;  %v761_v39 = vld [vmem:[#allocation8 + $0x198] sm:$0xff] }
 0x1a3   :  { %v279_v11 = vrot.slane %v271_v2, %v230_v42  ;;  %v286_v12 = vrot.slane %v272_v3, %v230_v42  ;;  %v713_v42 = vld [vmem:[#allocation8 + $0x18] sm:$0xff] }
 0x1a4   :  { %v1432_v51 = vpack.c.bf16 %v713_v42, %v711_v41 }
 0x1a5   :  { %v320_v24 = vcombine.high %v263_v6, %v279_v11  ;;  %v336_v25 = vcombine.high %v270_v7, %v286_v12  ;;  %v319_v26 = vcombine.low %v263_v6, %v279_v11  ;;  %v335_v30 = vcombine.low %v270_v7, %v286_v12  ;;  %1431 = vmatpush1.bf16.msra.mxu1 %v1430_v34  ;;  %v718_v12 = vld [vmem:[#allocation8 + $0x40] sm:$0xff] }
 0x1a6   :  { %1433 = vmatprep.subr.bf16.mxu0 %v1432_v51  ;;  %v1436_v7 = vpack.c.bf16 %v717_v63, %v715_v62  ;;  %v1440_v11 = vpack.c.bf16 %v721_v9, %v719_v8  ;;  %v1442_v16 = vpack.c.bf16 %v720_v13, %v718_v12  ;;  %v745_v51 = vld [vmem:[#allocation8 + $0x118] sm:$0xff]  ;;  %v750_v63 = vld [vmem:[#allocation8 + $0x140] sm:$0xff] }
 0x1a7   :  { %v334_v35 = vrot.slane %v320_v24, %v294_v58  ;;  %v350_v36 = vrot.slane %v336_v25, %v294_v58  ;;  %v327_v37 = vrot.slane %v319_v26, %v294_v58  ;;  %v343_v40 = vrot.slane %v335_v30, %v294_v58  ;;  %v726_v26 = vld [vmem:[#allocation8 + $0x80] sm:$0xff]  ;;  %v728_v30 = vld [vmem:[#allocation8 + $0x90] sm:$0xff]  ;;  %v765_v12 = vld [vmem:[#allocation8 + $0x1b8] sm:$0xff] }
 0x1a8   :  { %v1446_v24 = vpack.c.bf16 %v724_v19, %v722_v18  ;;  %v1448_v25 = vpack.c.bf16 %v729_v23, %v727_v22  ;;  %v758_v9 = vld [vmem:[#allocation8 + $0x180] sm:$0xff]  ;;  %v769_v18 = vld [vmem:[#allocation8 + $0x1d8] sm:$0xff] }
 0x1a9   :  { %v353_v43 = vcombine.low %v302_v17, %v334_v35  ;;  %v357_v21 = vcombine.low %v318_v31, %v350_v36  ;;  %v352_v44 = vcombine.high %v295_v32, %v327_v37  ;;  %v355_v45 = vcombine.low %v311_v33, %v343_v40  ;;  %v766_v23 = vld [vmem:[#allocation8 + $0x1c0] sm:$0xff] }
 0x1aa   :  { %v356_v28 = vcombine.high %v311_v33, %v343_v40  ;;  %v351_v46 = vcombine.low %v295_v32, %v327_v37  ;;  %v354_v47 = vcombine.high %v302_v17, %v334_v35  ;;  %v358_v50 = vcombine.high %v318_v31, %v350_v36  ;;  %v731_v31 = vld [vmem:[#allocation8 + $0xa8] sm:$0xff]  ;;  %v733_v32 = vld [vmem:[#allocation8 + $0xb8] sm:$0xff]  ;;  %v730_v35 = vld [vmem:[#allocation8 + $0xa0] sm:$0xff] }
 0x1ab   :  { %v1644_v29 = vpack.i.bf16 %v353_v43, %v357_v21  ;;  %v1444_v17 = vpack.c.bf16 %v725_v15, %v723_v14  ;;  %v1450_v33 = vpack.c.bf16 %v728_v30, %v726_v26  ;;  %v1452_v34 = vpack.c.bf16 %v733_v32, %v731_v31  ;;  %v732_v36 = vld [vmem:[#allocation8 + $0xb0] sm:$0xff]  ;;  %v735_v37 = vld [vmem:[#allocation8 + $0xc8] sm:$0xff]  ;;  %v737_v40 = vld [vmem:[#allocation8 + $0xd8] sm:$0xff] }
 0x1ac   :  { %v1639_v20 = vpack.i.bf16 %v352_v44, %v356_v28  ;;  %v1649_v52 = vpack.i.bf16 %v354_v47, %v358_v50  ;;  %v1454_v41 = vpack.c.bf16 %v732_v36, %v730_v35  ;;  %v1456_v42 = vpack.c.bf16 %v737_v40, %v735_v37  ;;  %v734_v43 = vld [vmem:[#allocation8 + $0xc0] sm:$0xff]  ;;  %v736_v21 = vld [vmem:[#allocation8 + $0xd0] sm:$0xff]  ;;  %v739_v44 = vld [vmem:[#allocation8 + $0xe8] sm:$0xff] }
 0x1ad   :  { %1645 = vrot.lane.b32.xlu1 %v1644_v29, %s1823_s7  ;;  %v1458_v28 = vpack.c.bf16 %v736_v21, %v734_v43  ;;  %v738_v29 = vld [vmem:[#allocation8 + $0xe0] sm:$0xff]  ;;  %v740_v47 = vld [vmem:[#allocation8 + $0xf0] sm:$0xff]  ;;  %v743_v50 = vld [vmem:[#allocation8 + $0x108] sm:$0xff] }
 0x1ae   :  { %1640 = vrot.lane.b32.xlu0 %v1639_v20, %s1812_s20  ;;  %v1462_v20 = vpack.c.bf16 %v740_v47, %v738_v29  ;;  %v762_v15 = vld [vmem:[#allocation8 + $0x1a0] sm:$0xff]  ;;  %v771_v26 = vld [vmem:[#allocation8 + $0x1e8] sm:$0xff]  ;;  %v773_v30 = vld [vmem:[#allocation8 + $0x1f8] sm:$0xff] }
 0x1af   :  { %v1492_v31 = vpack.c.bf16 %v773_v30, %v771_v26  ;;  %v770_v32 = vld [vmem:[#allocation8 + $0x1e0] sm:$0xff]  ;;  %v775_v35 = vld [vmem:[#allocation8 + $0x208] sm:$0xff]  ;;  %v777_v36 = vld [vmem:[#allocation8 + $0x218] sm:$0xff] }
 0x1b0   :  { %v1496_v37 = vpack.c.bf16 %v777_v36, %v775_v35  ;;  %v1010_v40 = vld [vmem:[#allocation9 + $0x80] sm:$0xff]  ;;  %v995_v21 = vld [vmem:[#allocation9 + $0x8] sm:$0xff]  ;;  %v996_v29 = vld [vmem:[#allocation9 + $0x10] sm:$0xff] }
 0x1b1   :  { %1650 = vrot.lane.b32.xlu1 %v1649_v52, %s1824_s10  ;;  %v1464_v52 = vpack.c.bf16 %v745_v51, %v743_v50  ;;  %v997_v47 = vld [vmem:[#allocation9 + $0x18] sm:$0xff]  ;;  %v1014_v50 = vld [vmem:[#allocation9 + $0xa0] sm:$0xff]  ;;  %v1015_v51 = vld [vmem:[#allocation9 + $0xa8] sm:$0xff] }
 0x1b2   :  { %v774_v26 = vld [vmem:[#allocation8 + $0x200] sm:$0xff]  ;;  %v776_v30 = vld [vmem:[#allocation8 + $0x210] sm:$0xff] }
 0x1b3   :  { %v1498_v36 = vpack.c.bf16 %v776_v30, %v774_v26  ;;  %v812_v26 = vld [vmem:[#allocation8 + $0x330] sm:$0xff]  ;;  %v815_v30 = vld [vmem:[#allocation8 + $0x348] sm:$0xff] }
 0x21f   :  { %v1646_v53 = vpop.permute.xlu1 %1645 }
 0x220   :  { %v1641_v54 = vpop.permute.xlu0 %1640  ;;  %v1648_v55 = vunpack.i.h.bf16 %v1646_v53  ;;  %v1647_v56 = vunpack.i.l.bf16 %v1646_v53  ;;  %v742_v53 = vld [vmem:[#allocation8 + $0x100] sm:$0xff] }
 0x221   :  { %v1643_v57 = vunpack.i.h.bf16 %v1641_v54  ;;  %v1642_v58 = vunpack.i.l.bf16 %v1641_v54  ;;  %v744_v54 = vld [vmem:[#allocation8 + $0x110] sm:$0xff] }
 0x223   :  { %v383_v60 = vsel %vm117_vm0, %v351_v46, %v1643_v57  ;;  %v1651_v48 = vpop.permute.xlu1 %1650  ;;  %v388_v61 = vsel %vm117_vm0, %v355_v45, %v1642_v58  ;;  %v741_v45 = vld [vmem:[#allocation8 + $0xf8] sm:$0xff]  ;;  %v1466_v57 = vpack.c.bf16 %v744_v54, %v742_v53  ;;  %v998_v53 = vld [vmem:[#allocation9 + $0x20] sm:$0xff]  ;;  %v999_v54 = vld [vmem:[#allocation9 + $0x28] sm:$0xff] }
 0x224   :  { %v1653_v0 = vunpack.i.h.bf16 %v1651_v48  ;;  %v1652_v1 = vunpack.i.l.bf16 %v1651_v48  ;;  %v389_v2 = vsel %vm384_vm1, %v388_v61, %v1647_v56  ;;  %v385_v3 = vsel %vm384_vm1, %v383_v60, %v1648_v55  ;;  %v747_v55 = vld [vmem:[#allocation8 + $0x128] sm:$0xff]  ;;  %v749_v56 = vld [vmem:[#allocation8 + $0x138] sm:$0xff] }
 0x225   :  { %v1460_v46 = vpack.c.bf16 %v741_v45, %v739_v44  ;;  %v1468_v58 = vpack.c.bf16 %v749_v56, %v747_v55  ;;  %v751_v60 = vld [vmem:[#allocation8 + $0x148] sm:$0xff]  ;;  %v753_v48 = vld [vmem:[#allocation8 + $0x158] sm:$0xff]  ;;  %v1470_v61 = vpack.c.bf16 %v748_v38, %v746_v59  ;;  %v1012_v44 = vld [vmem:[#allocation9 + $0x90] sm:$0xff] }
 0x226   :  { %v390_v5 = vsel %vm386_vm2, %v389_v2, %v1652_v1  ;;  %v387_v6 = vsel %vm386_vm2, %v385_v3, %v1653_v0  ;;  %v1472_v62 = vpack.c.bf16 %v753_v48, %v751_v60  ;;  %v752_v0 = vld [vmem:[#allocation8 + $0x150] sm:$0xff]  ;;  %v755_v1 = vld [vmem:[#allocation8 + $0x168] sm:$0xff]  ;;  %v757_v2 = vld [vmem:[#allocation8 + $0x178] sm:$0xff] }
 0x227   :  { %587 = vmatprep.mubr.f32.mxu0 %v390_v5  ;;  %658 = vmatprep.mubr.f32.mxu1 %v390_v5  ;;  %v1474_v3 = vpack.c.bf16 %v752_v0, %v750_v63  ;;  %v754_v5 = vld [vmem:[#allocation8 + $0x160] sm:$0xff]  ;;  %v1013_v45 = vld [vmem:[#allocation9 + $0x98] sm:$0xff]  ;;  %v1016_v55 = vld [vmem:[#allocation9 + $0xb0] sm:$0xff] }
 0x228   :  { %588 = vmatmul.mubr.f32.vlgmr.msra.gmra.mrb[0].mxu0 %v387_v6  ;;  %659 = vmatmul.mubr.f32.vlgmr.msra.gmra.mrb[0].mxu1 %v387_v6  ;;  %v756_v6 = vld [vmem:[#allocation8 + $0x170] sm:$0xff]  ;;  %v1017_v56 = vld [vmem:[#allocation9 + $0xb8] sm:$0xff]  ;;  %v1018_v60 = vld [vmem:[#allocation9 + $0xc0] sm:$0xff] }
 0x229   :  { %1435 = vmatpush1.bf16.msra.mxu0 %v1434_v4  ;;  %v1476_v4 = vpack.c.bf16 %v757_v2, %v755_v1  ;;  %v1478_v49 = vpack.c.bf16 %v756_v6, %v754_v5  ;;  %v1000_v59 = vld [vmem:[#allocation9 + $0x30] sm:$0xff]  ;;  %v1001_v38 = vld [vmem:[#allocation9 + $0x38] sm:$0xff]  ;;  %v1019_v48 = vld [vmem:[#allocation9 + $0xc8] sm:$0xff] }
 0x22a   :  { %1437 = vmatprep.subr.bf16.mxu0 %v1436_v7  ;;  %v759_v7 = vld [vmem:[#allocation8 + $0x188] sm:$0xff]  ;;  %v1002_v63 = vld [vmem:[#allocation9 + $0x40] sm:$0xff]  ;;  %v1020_v1 = vld [vmem:[#allocation9 + $0xd0] sm:$0xff] }
 0x22b   :  { %v1480_v8 = vpack.c.bf16 %v761_v39, %v759_v7  ;;  %v1003_v0 = vld [vmem:[#allocation9 + $0x48] sm:$0xff]  ;;  %v1021_v2 = vld [vmem:[#allocation9 + $0xd8] sm:$0xff]  ;;  %v1004_v5 = vld [vmem:[#allocation9 + $0x50] sm:$0xff] }
 0x22c   :  { %v1005_v6 = vld [vmem:[#allocation9 + $0x58] sm:$0xff]  ;;  %v1022_v7 = vld [vmem:[#allocation9 + $0xe0] sm:$0xff]  ;;  %v1023_v39 = vld [vmem:[#allocation9 + $0xe8] sm:$0xff] }
 0x22d   :  { %1439 = vmatpush1.bf16.msra.mxu0 %v1438_v10  ;;  %v760_v10 = vld [vmem:[#allocation8 + $0x190] sm:$0xff] }
 0x22e   :  { %1441 = vmatprep.subr.bf16.mxu0 %v1440_v11  ;;  %v763_v11 = vld [vmem:[#allocation8 + $0x1a8] sm:$0xff]  ;;  %v1482_v13 = vpack.c.bf16 %v760_v10, %v758_v9  ;;  %v684_v9 = vsub.s32 0, %v1998_v27  ;;  %v692_v10 = vsub.s32 2, %v1998_v27 }
 0x22f   :  { %v1484_v14 = vpack.c.bf16 %v765_v12, %v763_v11  ;;  %v680_v11 = vld [vmem:[%s2053_s2] sm:$0xf]  ;;  %v688_v12 = vsub.s32 1, %v1998_v27 }
 0x231   :  { %1443 = vmatpush1.bf16.msra.mxu0 %v1442_v16  ;;  %v764_v16 = vld [vmem:[#allocation8 + $0x1b0] sm:$0xff] }
 0x232   :  { %1445 = vmatprep.subr.bf16.mxu0 %v1444_v17  ;;  %v767_v17 = vld [vmem:[#allocation8 + $0x1c8] sm:$0xff]  ;;  %v1486_v19 = vpack.c.bf16 %v764_v16, %v762_v15  ;;  %v693_v15 = vrot.slane %v680_v11, %v692_v10  ;;  %v689_v16 = vrot.slane %v680_v11, %v688_v12  ;;  %v804_v10 = vld [vmem:[#allocation8 + $0x2f0] sm:$0xff] }
 0x233   :  { %v1488_v22 = vpack.c.bf16 %v769_v18, %v767_v17 }
 0x235   :  { %1447 = vmatpush1.bf16.msra.mxu0 %v1446_v24  ;;  %v768_v24 = vld [vmem:[#allocation8 + $0x1d0] sm:$0xff] }
 0x236   :  { %1449 = vmatprep.subr.bf16.mxu0 %v1448_v25  ;;  %v1490_v25 = vpack.c.bf16 %v768_v24, %v766_v23 }
 0x239   :  { %1451 = vmatpush1.bf16.msra.mxu0 %v1450_v33  ;;  %v772_v33 = vld [vmem:[#allocation8 + $0x1f0] sm:$0xff] }
 0x23a   :  { %1453 = vmatprep.subr.bf16.mxu0 %v1452_v34  ;;  %v1494_v34 = vpack.c.bf16 %v772_v33, %v770_v32  ;;  %v779_v33 = vld [vmem:[#allocation8 + $0x228] sm:$0xff] }
 0x23d   :  { %1455 = vmatpush1.bf16.msra.mxu0 %v1454_v41  ;;  %v1011_v41 = vld [vmem:[#allocation9 + $0x88] sm:$0xff] }
 0x23e   :  { %1457 = vmatprep.subr.bf16.mxu0 %v1456_v42  ;;  %v994_v42 = vld [vmem:[#allocation9] sm:$0xff]  ;;  %v1560_v43 = vpack.c.bf16 %v1011_v41, %v1010_v40 }
 0x23f   :  { %v778_v41 = vld [vmem:[#allocation8 + $0x220] sm:$0xff] }
 0x240   :  { %1561 = vmatprep.subr.bf16.mxu1 %v1560_v43 }
 0x241   :  { %1459 = vmatpush1.bf16.msra.mxu0 %v1458_v28  ;;  %v1562_v28 = vpack.c.bf16 %v995_v21, %v994_v42  ;;  %v780_v42 = vld [vmem:[#allocation8 + $0x230] sm:$0xff]  ;;  %v783_v21 = vld [vmem:[#allocation8 + $0x248] sm:$0xff] }
 0x242   :  { %1461 = vmatprep.subr.bf16.mxu0 %v1460_v46  ;;  %v1564_v46 = vpack.c.bf16 %v1013_v45, %v1012_v44  ;;  %v785_v44 = vld [vmem:[#allocation8 + $0x258] sm:$0xff]  ;;  %v1502_v45 = vpack.c.bf16 %v780_v42, %v778_v41  ;;  %v818_v42 = vld [vmem:[#allocation8 + $0x360] sm:$0xff] }
 0x243   :  { %1563 = vmatpush3.bf16.msra.mxu1 %v1562_v28  ;;  %v1504_v28 = vpack.c.bf16 %v785_v44, %v783_v21  ;;  %v823_v21 = vld [vmem:[#allocation8 + $0x388] sm:$0xff]  ;;  %v825_v44 = vld [vmem:[#allocation8 + $0x398] sm:$0xff] }
 0x244   :  { %1565 = vmatprep.subr.bf16.mxu1 %v1564_v46  ;;  %v782_v46 = vld [vmem:[#allocation8 + $0x240] sm:$0xff] }
 0x245   :  { %1463 = vmatpush1.bf16.msra.mxu0 %v1462_v20  ;;  %v1566_v20 = vpack.c.bf16 %v997_v47, %v996_v29  ;;  %v784_v29 = vld [vmem:[#allocation8 + $0x250] sm:$0xff]  ;;  %v787_v47 = vld [vmem:[#allocation8 + $0x268] sm:$0xff] }
 0x246   :  { %1465 = vmatprep.subr.bf16.mxu0 %v1464_v52  ;;  %v1568_v52 = vpack.c.bf16 %v1015_v51, %v1014_v50  ;;  %v789_v50 = vld [vmem:[#allocation8 + $0x278] sm:$0xff]  ;;  %v1506_v51 = vpack.c.bf16 %v784_v29, %v782_v46  ;;  %v822_v46 = vld [vmem:[#allocation8 + $0x380] sm:$0xff]  ;;  %v824_v29 = vld [vmem:[#allocation8 + $0x390] sm:$0xff] }
 0x247   :  { %1567 = vmatpush3.bf16.msra.mxu1 %v1566_v20  ;;  %v1508_v20 = vpack.c.bf16 %v789_v50, %v787_v47  ;;  %v827_v47 = vld [vmem:[#allocation8 + $0x3a8] sm:$0xff]  ;;  %v829_v50 = vld [vmem:[#allocation8 + $0x3b8] sm:$0xff] }
 0x248   :  { %1569 = vmatprep.subr.bf16.mxu1 %v1568_v52  ;;  %v786_v52 = vld [vmem:[#allocation8 + $0x260] sm:$0xff] }
 0x249   :  { %1467 = vmatpush1.bf16.msra.mxu0 %v1466_v57  ;;  %v1570_v57 = vpack.c.bf16 %v999_v54, %v998_v53  ;;  %v788_v53 = vld [vmem:[#allocation8 + $0x270] sm:$0xff]  ;;  %v791_v54 = vld [vmem:[#allocation8 + $0x288] sm:$0xff] }
 0x24a   :  { %1469 = vmatprep.subr.bf16.mxu0 %v1468_v58  ;;  %v1572_v58 = vpack.c.bf16 %v1017_v56, %v1016_v55  ;;  %v793_v55 = vld [vmem:[#allocation8 + $0x298] sm:$0xff]  ;;  %v1510_v56 = vpack.c.bf16 %v788_v53, %v786_v52  ;;  %v826_v52 = vld [vmem:[#allocation8 + $0x3a0] sm:$0xff]  ;;  %v828_v53 = vld [vmem:[#allocation8 + $0x3b0] sm:$0xff] }
 0x24b   :  { %1571 = vmatpush3.bf16.msra.mxu1 %v1570_v57  ;;  %v1512_v57 = vpack.c.bf16 %v793_v55, %v791_v54  ;;  %v831_v54 = vld [vmem:[#allocation8 + $0x3c8] sm:$0xff]  ;;  %v833_v55 = vld [vmem:[#allocation8 + $0x3d8] sm:$0xff] }
 0x24c   :  { %1573 = vmatprep.subr.bf16.mxu1 %v1572_v58  ;;  %v790_v58 = vld [vmem:[#allocation8 + $0x280] sm:$0xff] }
 0x24d   :  { %1471 = vmatpush1.bf16.msra.mxu0 %v1470_v61  ;;  %v1574_v61 = vpack.c.bf16 %v1001_v38, %v1000_v59  ;;  %v792_v59 = vld [vmem:[#allocation8 + $0x290] sm:$0xff]  ;;  %v795_v38 = vld [vmem:[#allocation8 + $0x2a8] sm:$0xff] }
 0x24e   :  { %1473 = vmatprep.subr.bf16.mxu0 %v1472_v62  ;;  %v1576_v62 = vpack.c.bf16 %v1019_v48, %v1018_v60  ;;  %v797_v60 = vld [vmem:[#allocation8 + $0x2b8] sm:$0xff]  ;;  %v1514_v48 = vpack.c.bf16 %v792_v59, %v790_v58  ;;  %v830_v58 = vld [vmem:[#allocation8 + $0x3c0] sm:$0xff]  ;;  %v832_v59 = vld [vmem:[#allocation8 + $0x3d0] sm:$0xff] }
 0x24f   :  { %1575 = vmatpush3.bf16.msra.mxu1 %v1574_v61  ;;  %v1516_v61 = vpack.c.bf16 %v797_v60, %v795_v38  ;;  %v835_v38 = vld [vmem:[#allocation8 + $0x3e8] sm:$0xff]  ;;  %v837_v60 = vld [vmem:[#allocation8 + $0x3f8] sm:$0xff] }
 0x250   :  { %1577 = vmatprep.subr.bf16.mxu1 %v1576_v62  ;;  %v794_v62 = vld [vmem:[#allocation8 + $0x2a0] sm:$0xff] }
 0x251   :  { %1475 = vmatpush1.bf16.msra.mxu0 %v1474_v3  ;;  %v1578_v3 = vpack.c.bf16 %v1003_v0, %v1002_v63  ;;  %v796_v63 = vld [vmem:[#allocation8 + $0x2b0] sm:$0xff]  ;;  %v799_v0 = vld [vmem:[#allocation8 + $0x2c8] sm:$0xff] }
 0x252   :  { %1477 = vmatprep.subr.bf16.mxu0 %v1476_v4  ;;  %v1580_v4 = vpack.c.bf16 %v1021_v2, %v1020_v1  ;;  %v801_v1 = vld [vmem:[#allocation8 + $0x2d8] sm:$0xff]  ;;  %v1518_v2 = vpack.c.bf16 %v796_v63, %v794_v62  ;;  %v834_v62 = vld [vmem:[#allocation8 + $0x3e0] sm:$0xff]  ;;  %v836_v63 = vld [vmem:[#allocation8 + $0x3f0] sm:$0xff] }
 0x253   :  { %1579 = vmatpush3.bf16.msra.mxu1 %v1578_v3  ;;  %v1520_v3 = vpack.c.bf16 %v801_v1, %v799_v0  ;;  %v1558_v0 = vpack.c.bf16 %v836_v63, %v834_v62 }
 0x254   :  { %1581 = vmatprep.subr.bf16.mxu1 %v1580_v4  ;;  %v798_v4 = vld [vmem:[#allocation8 + $0x2c0] sm:$0xff] }
 0x255   :  { %1479 = vmatpush1.bf16.msra.mxu0 %v1478_v49  ;;  %v1582_v49 = vpack.c.bf16 %v1005_v6, %v1004_v5  ;;  %v800_v5 = vld [vmem:[#allocation8 + $0x2d0] sm:$0xff]  ;;  %v803_v6 = vld [vmem:[#allocation8 + $0x2e8] sm:$0xff] }
 0x256   :  { %1481 = vmatprep.subr.bf16.mxu0 %v1480_v8  ;;  %v1584_v8 = vpack.c.bf16 %v1023_v39, %v1022_v7  ;;  %v805_v7 = vld [vmem:[#allocation8 + $0x2f8] sm:$0xff]  ;;  %v1522_v39 = vpack.c.bf16 %v800_v5, %v798_v4  ;;  %v1024_v5 = vld [vmem:[#allocation9 + $0xf0] sm:$0xff] }
 0x257   :  { %1583 = vmatpush3.bf16.msra.mxu1 %v1582_v49  ;;  %v1524_v49 = vpack.c.bf16 %v805_v7, %v803_v6  ;;  %v1025_v6 = vld [vmem:[#allocation9 + $0xf8] sm:$0xff] }
 0x258   :  { %1585 = vmatprep.subr.bf16.mxu1 %v1584_v8  ;;  %v802_v8 = vld [vmem:[#allocation8 + $0x2e0] sm:$0xff]  ;;  %v1588_v7 = vpack.c.bf16 %v1025_v6, %v1024_v5 }
 0x259   :  { %1483 = vmatpush1.bf16.msra.mxu0 %v1482_v13  ;;  %v696_v13 = vsub.s32 3, %v1998_v27 }
 0x25a   :  { %1485 = vmatprep.subr.bf16.mxu0 %v1484_v14  ;;  %v685_v14 = vrot.slane %v680_v11, %v684_v9 }
 0x25b   :  { %v697_v17 = vrot.slane %v680_v11, %v696_v13  ;;  %v807_v11 = vld [vmem:[#allocation8 + $0x308] sm:$0xff]  ;;  %v809_v13 = vld [vmem:[#allocation8 + $0x318] sm:$0xff] }
 0x25d   :  { %1487 = vmatpush1.bf16.msra.mxu0 %v1486_v19 }
 0x25e   :  { %1489 = vmatprep.subr.bf16.mxu0 %v1488_v22 }
 0x261   :  { %1491 = vmatpush1.bf16.msra.mxu0 %v1490_v25 }
 0x262   :  { %1493 = vmatprep.subr.bf16.mxu0 %v1492_v31 }
 0x265   :  { %1495 = vmatpush1.bf16.msra.mxu0 %v1494_v34  ;;  %v781_v34 = vld [vmem:[#allocation8 + $0x238] sm:$0xff] }
 0x266   :  { %1497 = vmatprep.subr.bf16.mxu0 %v1496_v37  ;;  %v1500_v40 = vpack.c.bf16 %v781_v34, %v779_v33  ;;  %v814_v34 = vld [vmem:[#allocation8 + $0x340] sm:$0xff] }
 0x2fb   :  { %v589_v18 = vpop.f32.mrb[0].mxu0  ;;  %v660_v19 = vpop.f32.mrb[0].mxu1 }
 0x2fc   :  { %v702_v22 = vadd.f32 %v685_v14, %v589_v18  ;;  %v2023_v23 = vadd.f32 %v693_v15, %v660_v19  ;;  %v591_v24 = vpop.f32.mrb[1].mxu0  ;;  %v662_v25 = vpop.f32.mrb[1].mxu1  ;;  %v1526_v14 = vpack.c.bf16 %v804_v10, %v802_v8  ;;  %v1528_v15 = vpack.c.bf16 %v809_v13, %v807_v11  ;;  %v811_v18 = vld [vmem:[#allocation8 + $0x328] sm:$0xff]  ;;  %v813_v19 = vld [vmem:[#allocation8 + $0x338] sm:$0xff]  ;;  %v838_v11 = vld [vmem:[%s2055_s4] sm:$0x3] }
 0x2fd   :  { %v703_v31 = vadd.f32 %v689_v16, %v591_v24  ;;  %v705_v32 = vadd.f32 %v697_v17, %v662_v25  ;;  %v806_v16 = vld [vmem:[#allocation8 + $0x300] sm:$0xff]  ;;  %v808_v17 = vld [vmem:[#allocation8 + $0x310] sm:$0xff]  ;;  %v1532_v24 = vpack.c.bf16 %v813_v19, %v811_v18  ;;  %v1825_v10 = vmov 0.0|0.0   ;;  %v1105_v18 = vld [vmem:[#allocation11 + $0x8] sm:$0xff] }
 0x2fe   :  { %v706_v37 = vmax.f32 %v702_v22, 0.0  ;;  %v1530_v22 = vpack.c.bf16 %v808_v17, %v806_v16  ;;  %v810_v25 = vld [vmem:[#allocation8 + $0x320] sm:$0xff]  ;;  %v708_v1 = vmax.f32 %v2023_v23, 0.0  ;;  %v843_v23 = vrot.slane %v838_v11, %v684_v9 }
 0x2ff   :  { %v707_v35 = vmax.f32 %v703_v31, 0.0  ;;  %v709_v43 = vmax.f32 %v705_v32, 0.0  ;;  %v817_v31 = vld [vmem:[#allocation8 + $0x358] sm:$0xff]  ;;  %v1534_v32 = vpack.c.bf16 %v812_v26, %v810_v25  ;;  %v847_v13 = vrot.slane %v838_v11, %v688_v12  ;;  %v1104_v17 = vld [vmem:[#allocation11] sm:$0xff]  ;;  %v1106_v26 = vld [vmem:[#allocation11 + $0x10] sm:$0xff] }
 0x300   :  { %v1536_v33 = vpack.c.bf16 %v817_v31, %v815_v30  ;;  %v1107_v30 = vld [vmem:[#allocation11 + $0x18] sm:$0xff]  ;;  %v1108_v9 = vld [vmem:[#allocation11 + $0x20] sm:$0xff]  ;;  %v1110_v12 = vld [vmem:[#allocation11 + $0x30] sm:$0xff] }
 0x301   :  { %914 = vmatprep.mubr.f32.mxu0 %v707_v35  ;;  %v816_v35 = vld [vmem:[#allocation8 + $0x350] sm:$0xff]  ;;  %v1596_v31 = vpack.c.bf16 %v1107_v30, %v1106_v26 }
 0x302   :  { %915 = vmatmul.mubr.f32.vlgmr.msra.gmra.mrb[2].mxu0 %v706_v37  ;;  %v821_v37 = vld [vmem:[#allocation8 + $0x378] sm:$0xff] }
 0x303   :  { %1499 = vmatpush1.bf16.msra.mxu0 %v1498_v36  ;;  %985 = vmatprep.mubr.f32.mxu0 %v709_v43  ;;  %v819_v36 = vld [vmem:[#allocation8 + $0x368] sm:$0xff]  ;;  %v820_v43 = vld [vmem:[#allocation8 + $0x370] sm:$0xff] }
 0x304   :  { %1501 = vmatprep.subr.bf16.mxu0 %v1500_v40  ;;  %v1538_v40 = vpack.c.bf16 %v816_v35, %v814_v34  ;;  %v1540_v41 = vpack.c.bf16 %v821_v37, %v819_v36  ;;  %v1112_v35 = vld [vmem:[#allocation11 + $0x40] sm:$0xff]  ;;  %v1113_v36 = vld [vmem:[#allocation11 + $0x48] sm:$0xff] }
 0x305   :  { %v1605_v37 = vpack.c.bf16 %v1113_v36, %v1112_v35 }
 0x307   :  { %1503 = vmatpush1.bf16.msra.mxu0 %v1502_v45  ;;  %v1542_v45 = vpack.c.bf16 %v820_v43, %v818_v42  ;;  %v1116_v43 = vld [vmem:[#allocation11 + $0x60] sm:$0xff] }
 0x308   :  { %1505 = vmatprep.subr.bf16.mxu0 %v1504_v28  ;;  %v1544_v28 = vpack.c.bf16 %v825_v44, %v823_v21  ;;  %v1117_v21 = vld [vmem:[#allocation11 + $0x68] sm:$0xff] }
 0x309   :  { %v1611_v44 = vpack.c.bf16 %v1117_v21, %v1116_v43 }
 0x30b   :  { %1507 = vmatpush1.bf16.msra.mxu0 %v1506_v51  ;;  %v1546_v51 = vpack.c.bf16 %v824_v29, %v822_v46  ;;  %v1827_v29 = vmov 0.0  }
 0x30c   :  { %1509 = vmatprep.subr.bf16.mxu0 %v1508_v20  ;;  %v1548_v20 = vpack.c.bf16 %v829_v50, %v827_v47  ;;  %v1215_v50 = vld [vmem:[%s2057_s6] ss:$0 sm:$0xff] }
 0x30f   :  { %1511 = vmatpush1.bf16.msra.mxu0 %v1510_v56  ;;  %v1550_v56 = vpack.c.bf16 %v828_v53, %v826_v52 }
 0x310   :  { %1513 = vmatprep.subr.bf16.mxu0 %v1512_v57  ;;  %v1552_v57 = vpack.c.bf16 %v833_v55, %v831_v54  ;;  %v1216_v54 = vld [vmem:[%s2059_s8] ss:$0 sm:$0xff] }
 0x313   :  { %1515 = vmatpush1.bf16.msra.mxu0 %v1514_v48  ;;  %v1554_v48 = vpack.c.bf16 %v832_v59, %v830_v58 }
 0x314   :  { %1517 = vmatprep.subr.bf16.mxu0 %v1516_v61  ;;  %v1556_v61 = vpack.c.bf16 %v837_v60, %v835_v38 }
 0x317   :  { %1519 = vmatpush1.bf16.msra.mxu0 %v1518_v2  ;;  %v1006_v2 = vld [vmem:[#allocation9 + $0x60] sm:$0xff] }
 0x318   :  { %1521 = vmatprep.subr.bf16.mxu0 %v1520_v3  ;;  %v1007_v3 = vld [vmem:[#allocation9 + $0x68] sm:$0xff] }
 0x319   :  { %v1586_v4 = vpack.c.bf16 %v1007_v3, %v1006_v2 }
 0x31b   :  { %1523 = vmatpush1.bf16.msra.mxu0 %v1522_v39  ;;  %1587 = vmatpush3.bf16.msra.mxu1 %v1586_v4  ;;  %v1008_v39 = vld [vmem:[#allocation9 + $0x70] sm:$0xff] }
 0x31c   :  { %1525 = vmatprep.subr.bf16.mxu0 %v1524_v49  ;;  %v1009_v49 = vld [vmem:[#allocation9 + $0x78] sm:$0xff]  ;;  %1589 = vmatprep.subr.bf16.mxu1 %v1588_v7 }
 0x31d   :  { %v1590_v8 = vpack.c.bf16 %v1009_v49, %v1008_v39 }
 0x31f   :  { %1527 = vmatpush1.bf16.msra.mxu0 %v1526_v14  ;;  %1591 = vmatpush3.bf16.msra.mxu1 %v1590_v8 }
 0x320   :  { %1529 = vmatprep.subr.bf16.mxu0 %v1528_v15  ;;  %1592 = vmatprep.subr.bf16.mxu1 %v1825_v10 }
 0x323   :  { %1531 = vmatpush1.bf16.msra.mxu0 %v1530_v22 }
 0x324   :  { %1533 = vmatprep.subr.bf16.mxu0 %v1532_v24  ;;  %v1593_v24 = vpack.c.bf16 %v1105_v18, %v1104_v17 }
 0x327   :  { %1535 = vmatpush1.bf16.msra.mxu0 %v1534_v32  ;;  %v1109_v32 = vld [vmem:[#allocation11 + $0x28] sm:$0xff] }
 0x328   :  { %1537 = vmatprep.subr.bf16.mxu0 %v1536_v33  ;;  %v1599_v27 = vpack.c.bf16 %v1109_v32, %v1108_v9  ;;  %v1111_v33 = vld [vmem:[#allocation11 + $0x38] sm:$0xff] }
 0x329   :  { %v1602_v34 = vpack.c.bf16 %v1111_v33, %v1110_v12 }
 0x32b   :  { %1539 = vmatpush1.bf16.msra.mxu0 %v1538_v40  ;;  %v1114_v40 = vld [vmem:[#allocation11 + $0x50] sm:$0xff] }
 0x32c   :  { %1541 = vmatprep.subr.bf16.mxu0 %v1540_v41  ;;  %v1115_v41 = vld [vmem:[#allocation11 + $0x58] sm:$0xff] }
 0x32d   :  { %v1608_v42 = vpack.c.bf16 %v1115_v41, %v1114_v40 }
 0x32f   :  { %1543 = vmatpush1.bf16.msra.mxu0 %v1542_v45  ;;  %v1118_v45 = vld [vmem:[#allocation11 + $0x70] sm:$0xff] }
 0x330   :  { %1545 = vmatprep.subr.bf16.mxu0 %v1544_v28  ;;  %v1119_v28 = vld [vmem:[#allocation11 + $0x78] sm:$0xff] }
 0x331   :  { %v1614_v46 = vpack.c.bf16 %v1119_v28, %v1118_v45 }
 0x333   :  { %1547 = vmatpush1.bf16.msra.mxu0 %v1546_v51 }
 0x334   :  { %1549 = vmatprep.subr.bf16.mxu0 %v1548_v20 }
 0x337   :  { %1551 = vmatpush1.bf16.msra.mxu0 %v1550_v56 }
 0x338   :  { %1553 = vmatprep.subr.bf16.mxu0 %v1552_v57 }
 0x33b   :  { %1555 = vmatpush1.bf16.msra.mxu0 %v1554_v48 }
 0x33c   :  { %1557 = vmatprep.subr.bf16.mxu0 %v1556_v61 }
 0x33f   :  { %1559 = vmatpush1.bf16.msra.mxu0 %v1558_v0 }
 0x342   :  { %986 = vmatmul.mubr.f32.vlgmr.msra.gmra.mrb[2].mxu0 %v708_v1 }
 0x415   :  { %v987_v14 = vpop.f32.mrb[2].mxu0 }
 0x416   :  { %v1616_v15 = vadd.f32 %v987_v14, %v843_v23  ;;  %v989_v16 = vpop.f32.mrb[3].mxu0 }
 0x417   :  { %v1617_v19 = vadd.f32 %v989_v16, %v847_v13 }
 0x418   :  { %v992_v25 = vmax.f32 %v1616_v15, 0.0 }
 0x419   :  { %v993_v22 = vmax.f32 %v1617_v19, 0.0 }
 0x41b   :  { %1097 = vmatprep.mubr.f32.mxu1 %v993_v22 }
 0x41c   :  { %1098 = vmatmul.mubr.f32.vlgmr.msra.gmra.mrb[2].mxu1 %v992_v25 }
 0x41d   :  { %1594 = vmatpush3.bf16.msra.mxu1 %v1593_v24  ;;  %1301 = vmatprep.mubr.msk.f32.mxu1 %vm1826_vm3, %v1827_v29 }
 0x41e   :  { %1595 = vmatprep.subr.bf16.mxu1 %v1825_v10 }
 0x421   :  { %1597 = vmatpush3.bf16.msra.mxu1 %v1596_v31 }
 0x422   :  { %1598 = vmatprep.subr.bf16.mxu1 %v1825_v10 }
 0x425   :  { %1600 = vmatpush3.bf16.msra.mxu1 %v1599_v27 }
 0x426   :  { %1601 = vmatprep.subr.bf16.mxu1 %v1825_v10 }
 0x429   :  { %1603 = vmatpush3.bf16.msra.mxu1 %v1602_v34 }
 0x42a   :  { %1604 = vmatprep.subr.bf16.mxu1 %v1825_v10 }
 0x42d   :  { %1606 = vmatpush3.bf16.msra.mxu1 %v1605_v37 }
 0x42e   :  { %1607 = vmatprep.subr.bf16.mxu1 %v1825_v10 }
 0x431   :  { %1609 = vmatpush3.bf16.msra.mxu1 %v1608_v42 }
 0x432   :  { %1610 = vmatprep.subr.bf16.mxu1 %v1825_v10 }
 0x435   :  { %1612 = vmatpush3.bf16.msra.mxu1 %v1611_v44 }
 0x436   :  { %1613 = vmatprep.subr.bf16.mxu1 %v1825_v10 }
 0x439   :  { %1615 = vmatpush3.bf16.msra.mxu1 %v1614_v46 }
 0x4ef   :  { %v1249_v47 = vpop.f32.mrb[2].mxu1 }
 0x4f0   :  { %v1250_v51 = vpop.f32.mrb[3].mxu1 }
 0x4f1   :  { %v1251_v20 = vadd.f32 %v1250_v51, %v1249_v47 }
 0x4f3   :  { %v1100_v52 = vadd.f32 %v1251_v20, %v1215_v50 }
 0x4f5   :  { %v1103_v53 = vmax.f32 %v1100_v52, 0.0 }
 0x4f7   :  { %1302 = vmatmul.mubr.f32.vlgmr.msra.gmra.mrb[4].mxu1 %v1103_v53 }
 0x5ca   :  { %v1193_v55 = vpop.f32.mrb[4].mxu1 }
 0x5cb   :  { %v1194_v56 = vadd.f32 %v1216_v54, %v1193_v55  ;;  %v1303_v57 = vpop.f32.mrb[5].mxu1 }
 0x5cd   :  { %1197 = vst [vmem:[#allocation12] sm:$0xff] %v1194_v56 }
 0x5ce   :  { %1791 = shalt.err (!%p1788_p2)
}
 0x5cf   :  { %s1792_s18 = scalar_lea.hbm %s2060_s9, 128 }
 0x5d0   :  { %p1793_p3 = scmp.ne.s32.totalorder %s2060_s9, %s1792_s18  ;;  %p1796_p4 = scmp.lt.u32.totalorder %s1792_s18, %s2060_s9 }
 0x5d2   :  { %p1798_p5 = pnand %p1796_p4, %p1793_p3 }
 0x5d4   :  { %1801 = shalt.err (!%p1798_p5)
}
 0x5d5   :  { %1207 = dma.vmem_to_hbm [thread:$0]  %s1205_s17, 128, %s2060_s9, [#allocation5]  }
 0x5d6   :  { %1808 = dma.done.wait [#allocation5], 128  }
 0x5d7   :  { %1809 = vsyncadd [#allocation5], 4294967168 }
 0x5d8   :  { %1211 = vsyncpa [#allocation4], 1 }
 0x5d9   :  { %1212 = vsyncpa [#allocation7], 1 }
 0x5da   :  { %1213 = vsyncpa [#allocation10], 1 }
 0x5db   :  { %1214 = vsyncpa [#allocation5], 1 }

</bundles_post_ra>
